<compile_context>
chip_gen: v7x
topology: tpu7x:2x2x1
jax: 0.10.0
libtpu: 0.0.40
codegen_flags: <defaults>
</compile_context>

<pallas_src>
import functools

import jax
import jax.numpy as jnp
from jax.experimental import pallas as pl
from jax.experimental.pallas import tpu as pltpu


# --------------------------- in-kernel building blocks ---------------------- #

def _layernorm(y, gamma, beta, eps=1e-6):
    mu = jnp.mean(y, axis=-1, keepdims=True)
    var = jnp.mean((y - mu) ** 2, axis=-1, keepdims=True)
    return (y - mu) * jax.lax.rsqrt(var + eps) * gamma + beta


def _attend(q, f_k, f_v, bias, wo, residual, gamma, beta, *, n_head, d_k, d_v):
    # q: (Lq, H*dk) f32 (already projected), f_k: (Lk, H*dk), f_v: (Lk, H*dv)
    # bias: additive mask (0 keep, -1e9 drop), broadcastable to (Lq, Lk).
    scale = 1.0 / (float(d_k) ** 0.5)
    qb = (q * scale).astype(jnp.bfloat16)       # fold scale into Q once, full width
    kb = f_k.astype(jnp.bfloat16)
    vb = f_v.astype(jnp.bfloat16)

    ctx = []
    for h in range(n_head):                     # static unroll; slices of results, not refs
        qh = qb[:, h * d_k:(h + 1) * d_k]
        kh = kb[:, h * d_k:(h + 1) * d_k]
        vh = vb[:, h * d_v:(h + 1) * d_v]
        # q @ k.T without an explicit transpose (contract the feature dims).
        s = jax.lax.dot_general(qh, kh, (((1,), (1,)), ((), ())),
                                preferred_element_type=jnp.float32)
        s = s + bias
        s = s - jnp.max(s, axis=-1, keepdims=True)
        p = jnp.exp(s)
        p = p * pl.reciprocal(jnp.sum(p, axis=-1, keepdims=True), approx=True)
        ctx.append(jnp.dot(p.astype(jnp.bfloat16), vh,
                           preferred_element_type=jnp.float32))

    c = jnp.concatenate(ctx, axis=-1).astype(jnp.bfloat16)        # (Lq, H*dv)
    out = jnp.dot(c, wo, preferred_element_type=jnp.float32)      # single Wo matmul
    return _layernorm(out + residual, gamma, beta)


def _ffn(x, w1, b1, w2, b2, gamma, beta):
    h = jnp.dot(x.astype(jnp.bfloat16), w1, preferred_element_type=jnp.float32) + b1
    h = jnp.maximum(h, 0.0)                                       # ReLU
    y = jnp.dot(h.astype(jnp.bfloat16), w2, preferred_element_type=jnp.float32) + b2
    return _layernorm(y + x, gamma, beta)


# ------------------------------ fused Decoder kernel ------------------------ #

def _decoder_kernel(trg_ref, enc_ref, tmask_ref, smask_ref, pos_ref,
                    ln0g_ref, ln0b_ref,
                    swqkv_ref, swo_ref, sg_ref, sb_ref,
                    cwq_ref, cwkv_ref, cwo_ref, cg_ref, cb_ref,
                    fw1_ref, fb1_ref, fw2_ref, fb2_ref, fg_ref, fbt_ref,
                    o_ref, *, n_layers, n_head, d_k, d_v):
    # One batch element per grid step; x stays resident in VMEM/vregs throughout.
    hdk = n_head * d_k
    hdv = n_head * d_v

    x = trg_ref[0].astype(jnp.float32) + pos_ref[...]             # PositionalEncoding
    x = _layernorm(x, ln0g_ref[...], ln0b_ref[...])               # input LayerNorm
    enc_b = enc_ref[0].astype(jnp.bfloat16)                       # hoisted bf16 cast

    # Hoisted additive masks (mask is {0,1}): 0 where keep, -1e9 where masked.
    tbias = (tmask_ref[0] - 1.0) * 1e9                            # (Lq, Lq)
    sbias = (smask_ref[0] - 1.0) * 1e9                            # (1, Lk) broadcasts

    for l in range(n_layers):                                     # static unroll
        # ---- self attention: one fused QKV matmul ----
        xb = x.astype(jnp.bfloat16)
        qkv = jnp.dot(xb, swqkv_ref[l], preferred_element_type=jnp.float32)
        x = _attend(qkv[:, :hdk], qkv[:, hdk:2 * hdk], qkv[:, 2 * hdk:2 * hdk + hdv],
                    tbias, swo_ref[l], x, sg_ref[l], sb_ref[l],
                    n_head=n_head, d_k=d_k, d_v=d_v)

        # ---- cross attention: Q from x, one fused K|V matmul from encoder out ----
        xb = x.astype(jnp.bfloat16)
        q = jnp.dot(xb, cwq_ref[l], preferred_element_type=jnp.float32)
        kv = jnp.dot(enc_b, cwkv_ref[l], preferred_element_type=jnp.float32)
        x = _attend(q, kv[:, :hdk], kv[:, hdk:hdk + hdv],
                    sbias, cwo_ref[l], x, cg_ref[l], cb_ref[l],
                    n_head=n_head, d_k=d_k, d_v=d_v)

        # ---- position-wise FFN ----
        x = _ffn(x, fw1_ref[l], fb1_ref[l], fw2_ref[l], fb2_ref[l],
                 fg_ref[l], fbt_ref[l])

    o_ref[0] = x.astype(o_ref.dtype)


def decoder_forward(trg_seq, trg_mask, enc_output, src_mask, params, pos_table,
                    n_head, d_k, d_v):
    # dropout (p=0.1) is identity at inference time.
    B, Lq, D = trg_seq.shape
    _, Lk, _ = enc_output.shape
    n_layers = params["slf_wq"].shape[0]
    pos_slice = pos_table[:Lq]

    # Host-side weight fusion (pure slicing equivalence; no numeric change).
    slf_wqkv = jnp.concatenate(
        [params["slf_wq"], params["slf_wk"], params["slf_wv"]], axis=-1)
    enc_wkv = jnp.concatenate([params["enc_wk"], params["enc_wv"]], axis=-1)

    stacked = [slf_wqkv, params["slf_wo"], params["slf_gamma"], params["slf_beta"],
               params["enc_wq"], enc_wkv, params["enc_wo"],
               params["enc_gamma"], params["enc_beta"],
               params["ffn_w1"], params["ffn_b1"], params["ffn_w2"], params["ffn_b2"],
               params["ffn_gamma"], params["ffn_beta"]]

    def full(a):
        nd = a.ndim
        return pl.BlockSpec(a.shape, lambda b, nd=nd: (0,) * nd)

    kernel = functools.partial(_decoder_kernel, n_layers=n_layers,
                               n_head=n_head, d_k=d_k, d_v=d_v)

    # TODO(synk): at realistic sizes (D>=512, long Lk), tile Lk with an online-softmax
    # loop, tile d_inner, and single-buffer the constant-index weight specs
    # (pipeline_mode=pl.Buffered(1)) to fit v7x's 64 MiB VMEM.
    in_specs = ([pl.BlockSpec((1, Lq, D), lambda b: (b, 0, 0)),
                 pl.BlockSpec((1, Lk, D), lambda b: (b, 0, 0)),
                 pl.BlockSpec((1, Lq, Lq), lambda b: (b, 0, 0)),
                 pl.BlockSpec((1, 1, Lk), lambda b: (b, 0, 0)),
                 full(pos_slice), full(params["ln0_gamma"]), full(params["ln0_beta"])]
                + [full(a) for a in stacked])

    return pl.pallas_call(
        kernel,
        out_shape=jax.ShapeDtypeStruct((B, Lq, D), trg_seq.dtype),
        grid_spec=pltpu.PrefetchScalarGridSpec(
            num_scalar_prefetch=0, grid=(B,),
            in_specs=in_specs,
            out_specs=pl.BlockSpec((1, Lq, D), lambda b: (b, 0, 0)),
        ),
        compiler_params=pltpu.CompilerParams(
            dimension_semantics=("parallel",)),      # batch axis: both v7x TCs busy
    )(trg_seq, enc_output, trg_mask, src_mask, pos_slice,
      params["ln0_gamma"], params["ln0_beta"], *stacked)


# ------------------------------ params / pos table -------------------------- #

def sinusoid_pos_table(n_position, d_hid):
    pos = jnp.arange(n_position, dtype=jnp.float32)[:, None]
    i = jnp.arange(d_hid, dtype=jnp.float32)[None, :]
    angle = pos / jnp.power(10000.0, 2.0 * jnp.floor(i / 2.0) / d_hid)
    return jnp.where(jnp.mod(jnp.arange(d_hid), 2) == 0,
                     jnp.sin(angle), jnp.cos(angle)).astype(jnp.float32)


def init_decoder_params(key, d_model, d_inner, n_head, d_k, d_v, n_layers):
    # Weight matrices stored in bf16 (MXU-native); biases & LN params in f32.
    def dense(k, shape):
        return (0.02 * jax.random.normal(k, shape, jnp.float32)).astype(jnp.bfloat16)

    ks = jax.random.split(key, 10)
    L = n_layers
    ones = lambda d: jnp.ones((L, 1, d), jnp.float32)
    zeros = lambda d: jnp.zeros((L, 1, d), jnp.float32)
    return {
        "ln0_gamma": jnp.ones((1, d_model), jnp.float32),
        "ln0_beta": jnp.zeros((1, d_model), jnp.float32),
        "slf_wq": dense(ks[0], (L, d_model, n_head * d_k)),
        "slf_wk": dense(ks[1], (L, d_model, n_head * d_k)),
        "slf_wv": dense(ks[2], (L, d_model, n_head * d_v)),
        "slf_wo": dense(ks[3], (L, n_head * d_v, d_model)),
        "slf_gamma": ones(d_model), "slf_beta": zeros(d_model),
        "enc_wq": dense(ks[4], (L, d_model, n_head * d_k)),
        "enc_wk": dense(ks[5], (L, d_model, n_head * d_k)),
        "enc_wv": dense(ks[6], (L, d_model, n_head * d_v)),
        "enc_wo": dense(ks[7], (L, n_head * d_v, d_model)),
        "enc_gamma": ones(d_model), "enc_beta": zeros(d_model),
        "ffn_w1": dense(ks[8], (L, d_model, d_inner)),
        "ffn_b1": jnp.zeros((L, 1, d_inner), jnp.float32),
        "ffn_w2": dense(ks[9], (L, d_inner, d_model)),
        "ffn_b2": zeros(d_model),
        "ffn_gamma": ones(d_model), "ffn_beta": zeros(d_model),
    }


# --------------------------- pure-JAX f32 reference -------------------------- #

def _ref_ln(y, g, b):
    mu = jnp.mean(y, -1, keepdims=True)
    var = jnp.mean((y - mu) ** 2, -1, keepdims=True)
    return (y - mu) / jnp.sqrt(var + 1e-6) * g + b


def _ref_mha(x, kv, mask, wq, wk, wv, wo, g, b, n_head, d_k, d_v):
    B, Lq, D = x.shape
    Lk = kv.shape[1]
    f = jnp.float32
    q = (x @ wq.astype(f)).reshape(B, Lq, n_head, d_k).transpose(0, 2, 1, 3)
    k = (kv @ wk.astype(f)).reshape(B, Lk, n_head, d_k).transpose(0, 2, 1, 3)
    v = (kv @ wv.astype(f)).reshape(B, Lk, n_head, d_v).transpose(0, 2, 1, 3)
    s = jnp.einsum("bhqd,bhkd->bhqk", q, k) / (d_k ** 0.5)
    s = jnp.where(mask[:, None] > 0.0, s, -1e9)
    a = jax.nn.softmax(s, axis=-1)
    ctx = jnp.einsum("bhqk,bhkd->bhqd", a, v).transpose(0, 2, 1, 3)
    ctx = ctx.reshape(B, Lq, n_head * d_v)
    return _ref_ln(ctx @ wo.astype(f) + x, g[0], b[0])


def decoder_forward_ref(trg_seq, trg_mask, enc_output, src_mask, params, pos_table,
                        n_head, d_k, d_v):
    f = jnp.float32
    Lq = trg_seq.shape[1]
    x = _ref_ln(trg_seq + pos_table[:Lq][None],
                params["ln0_gamma"][0], params["ln0_beta"][0])
    n_layers = params["slf_wq"].shape[0]
    for l in range(n_layers):
        x = _ref_mha(x, x, trg_mask,
                     params["slf_wq"][l], params["slf_wk"][l], params["slf_wv"][l],
                     params["slf_wo"][l], params["slf_gamma"][l], params["slf_beta"][l],
                     n_head, d_k, d_v)
        x = _ref_mha(x, enc_output, src_mask,
                     params["enc_wq"][l], params["enc_wk"][l], params["enc_wv"][l],
                     params["enc_wo"][l], params["enc_gamma"][l], params["enc_beta"][l],
                     n_head, d_k, d_v)
        h = jnp.maximum(x @ params["ffn_w1"][l].astype(f) + params["ffn_b1"][l][0], 0.0)
        x = _ref_ln(h @ params["ffn_w2"][l].astype(f) + params["ffn_b2"][l][0] + x,
                    params["ffn_gamma"][l][0], params["ffn_beta"][l][0])
    return x


# ----------------------------------- main ----------------------------------- #

if __name__ == "__main__":
    # small config: d_patch_vec == d_model (required by the module's layer_norm)
    B, Lq, Lk = 2, 8, 8
    d_model = 32
    d_inner = 64
    n_head, d_k, d_v = 2, 16, 16
    n_layers = 2
    n_position = 200

    key = jax.random.PRNGKey(0)
    k1, k2, kp = jax.random.split(key, 3)
    trg_seq = jax.random.normal(k1, (B, Lq, d_model), jnp.float32)
    enc_output = jax.random.normal(k2, (B, Lk, d_model), jnp.float32)
    # causal self-attention mask, all-ones cross-attention mask
    trg_mask = jnp.tril(jnp.ones((Lq, Lq), jnp.float32))[None].repeat(B, axis=0)
    src_mask = jnp.ones((B, 1, Lk), jnp.float32)

    params = init_decoder_params(kp, d_model, d_inner, n_head, d_k, d_v, n_layers)
    pos_table = sinusoid_pos_table(n_position, d_model)

    out = decoder_forward(trg_seq, trg_mask, enc_output, src_mask, params,
                          pos_table, n_head, d_k, d_v)
    out = jax.block_until_ready(out)

    ref = decoder_forward_ref(trg_seq, trg_mask, enc_output, src_mask, params,
                              pos_table, n_head, d_k, d_v)
    assert out.shape == (B, Lq, d_model)
    # bf16 matmul operands in the kernel vs f32 reference -> loosened tolerance.
    assert jnp.allclose(out, ref, atol=2e-2, rtol=2e-2), "mismatch vs pure-JAX reference"

    print("KERNEL_OK")
</pallas_src>

<mosaic_0001>
module attributes {stable_mosaic.version = 11 : i64} {
  func.func @_decoder_kernel(%arg0: i32, %arg1: memref<1x8x32xf32, #tpu.memory_space<vmem>>, %arg2: memref<1x8x32xf32, #tpu.memory_space<vmem>>, %arg3: memref<1x8x8xf32, #tpu.memory_space<vmem>>, %arg4: memref<1x1x8xf32, #tpu.memory_space<vmem>>, %arg5: memref<8x32xf32, #tpu.memory_space<vmem>>, %arg6: memref<1x32xf32, #tpu.memory_space<vmem>>, %arg7: memref<1x32xf32, #tpu.memory_space<vmem>>, %arg8: memref<2x32x96xbf16, #tpu.memory_space<vmem>>, %arg9: memref<2x32x32xbf16, #tpu.memory_space<vmem>>, %arg10: memref<2x1x32xf32, #tpu.memory_space<vmem>>, %arg11: memref<2x1x32xf32, #tpu.memory_space<vmem>>, %arg12: memref<2x32x32xbf16, #tpu.memory_space<vmem>>, %arg13: memref<2x32x64xbf16, #tpu.memory_space<vmem>>, %arg14: memref<2x32x32xbf16, #tpu.memory_space<vmem>>, %arg15: memref<2x1x32xf32, #tpu.memory_space<vmem>>, %arg16: memref<2x1x32xf32, #tpu.memory_space<vmem>>, %arg17: memref<2x32x64xbf16, #tpu.memory_space<vmem>>, %arg18: memref<2x1x64xf32, #tpu.memory_space<vmem>>, %arg19: memref<2x64x32xbf16, #tpu.memory_space<vmem>>, %arg20: memref<2x1x32xf32, #tpu.memory_space<vmem>>, %arg21: memref<2x1x32xf32, #tpu.memory_space<vmem>>, %arg22: memref<2x1x32xf32, #tpu.memory_space<vmem>>, %arg23: memref<1x8x32xf32, #tpu.memory_space<vmem>>) attributes {dimension_semantics = [#tpu.dimension_semantics<parallel>], iteration_bounds = array<i64: 2>, scalar_prefetch = 0 : i64, scratch_operands = 0 : i64, tpu.core_type = #tpu.core_type<tc>, window_params = [{transform_indices = @transform_0, window_bounds = array<i64: 1, 8, 32>}, {transform_indices = @transform_1, window_bounds = array<i64: 1, 8, 32>}, {transform_indices = @transform_2, window_bounds = array<i64: 1, 8, 8>}, {transform_indices = @transform_3, window_bounds = array<i64: 1, 1, 8>}, {pipeline_mode = #tpu.pipeline_mode<synchronous>, transform_indices = @transform_4, window_bounds = array<i64: 8, 32>}, {pipeline_mode = #tpu.pipeline_mode<synchronous>, transform_indices = @transform_5, window_bounds = array<i64: 1, 32>}, {pipeline_mode = #tpu.pipeline_mode<synchronous>, transform_indices = @transform_6, window_bounds = array<i64: 1, 32>}, {pipeline_mode = #tpu.pipeline_mode<synchronous>, transform_indices = @transform_7, window_bounds = array<i64: 2, 32, 96>}, {pipeline_mode = #tpu.pipeline_mode<synchronous>, transform_indices = @transform_8, window_bounds = array<i64: 2, 32, 32>}, {pipeline_mode = #tpu.pipeline_mode<synchronous>, transform_indices = @transform_9, window_bounds = array<i64: 2, 1, 32>}, {pipeline_mode = #tpu.pipeline_mode<synchronous>, transform_indices = @transform_10, window_bounds = array<i64: 2, 1, 32>}, {pipeline_mode = #tpu.pipeline_mode<synchronous>, transform_indices = @transform_11, window_bounds = array<i64: 2, 32, 32>}, {pipeline_mode = #tpu.pipeline_mode<synchronous>, transform_indices = @transform_12, window_bounds = array<i64: 2, 32, 64>}, {pipeline_mode = #tpu.pipeline_mode<synchronous>, transform_indices = @transform_13, window_bounds = array<i64: 2, 32, 32>}, {pipeline_mode = #tpu.pipeline_mode<synchronous>, transform_indices = @transform_14, window_bounds = array<i64: 2, 1, 32>}, {pipeline_mode = #tpu.pipeline_mode<synchronous>, transform_indices = @transform_15, window_bounds = array<i64: 2, 1, 32>}, {pipeline_mode = #tpu.pipeline_mode<synchronous>, transform_indices = @transform_16, window_bounds = array<i64: 2, 32, 64>}, {pipeline_mode = #tpu.pipeline_mode<synchronous>, transform_indices = @transform_17, window_bounds = array<i64: 2, 1, 64>}, {pipeline_mode = #tpu.pipeline_mode<synchronous>, transform_indices = @transform_18, window_bounds = array<i64: 2, 64, 32>}, {pipeline_mode = #tpu.pipeline_mode<synchronous>, transform_indices = @transform_19, window_bounds = array<i64: 2, 1, 32>}, {pipeline_mode = #tpu.pipeline_mode<synchronous>, transform_indices = @transform_20, window_bounds = array<i64: 2, 1, 32>}, {pipeline_mode = #tpu.pipeline_mode<synchronous>, transform_indices = @transform_21, window_bounds = array<i64: 2, 1, 32>}, {transform_indices = @transform_22, window_bounds = array<i64: 1, 8, 32>}]} {
    %c0 = arith.constant 0 : index
    %c0_0 = arith.constant 0 : index
    %c0_1 = arith.constant 0 : index
    %0 = vector.load %arg1[%c0, %c0_0, %c0_1] : memref<1x8x32xf32, #tpu.memory_space<vmem>>, vector<1x8x32xf32>
    %1 = vector.shape_cast %0 : vector<1x8x32xf32> to vector<8x32xf32>
    %c0_2 = arith.constant 0 : index
    %c0_3 = arith.constant 0 : index
    %2 = vector.load %arg5[%c0_2, %c0_3] : memref<8x32xf32, #tpu.memory_space<vmem>>, vector<8x32xf32>
    %3 = arith.addf %1, %2 : vector<8x32xf32>
    %c0_4 = arith.constant 0 : index
    %c0_5 = arith.constant 0 : index
    %4 = vector.load %arg6[%c0_4, %c0_5] : memref<1x32xf32, #tpu.memory_space<vmem>>, vector<1x32xf32>
    %c0_6 = arith.constant 0 : index
    %c0_7 = arith.constant 0 : index
    %5 = vector.load %arg7[%c0_6, %c0_7] : memref<1x32xf32, #tpu.memory_space<vmem>>, vector<1x32xf32>
    %cst = arith.constant dense<0.000000e+00> : vector<8xf32>
    %6 = vector.multi_reduction <add>, %3, %cst [1] : vector<8x32xf32> to vector<8xf32>
    %7 = vector.shape_cast %6 : vector<8xf32> to vector<8x1xf32>
    %cst_8 = arith.constant 3.200000e+01 : f32
    %8 = vector.broadcast %cst_8 : f32 to vector<8x1xf32>
    %9 = arith.divf %7, %8 : vector<8x1xf32>
    %10 = vector.broadcast %9 : vector<8x1xf32> to vector<8x32xf32>
    %11 = arith.subf %3, %10 : vector<8x32xf32>
    %12 = arith.mulf %11, %11 : vector<8x32xf32>
    %cst_9 = arith.constant dense<0.000000e+00> : vector<8xf32>
    %13 = vector.multi_reduction <add>, %12, %cst_9 [1] : vector<8x32xf32> to vector<8xf32>
    %14 = vector.shape_cast %13 : vector<8xf32> to vector<8x1xf32>
    %cst_10 = arith.constant 3.200000e+01 : f32
    %15 = vector.broadcast %cst_10 : f32 to vector<8x1xf32>
    %16 = arith.divf %14, %15 : vector<8x1xf32>
    %17 = vector.broadcast %9 : vector<8x1xf32> to vector<8x32xf32>
    %18 = arith.subf %3, %17 : vector<8x32xf32>
    %cst_11 = arith.constant 9.99999997E-7 : f32
    %19 = vector.broadcast %cst_11 : f32 to vector<8x1xf32>
    %20 = arith.addf %16, %19 : vector<8x1xf32>
    %21 = math.rsqrt %20 : vector<8x1xf32>
    %22 = vector.broadcast %21 : vector<8x1xf32> to vector<8x32xf32>
    %23 = arith.mulf %18, %22 : vector<8x32xf32>
    %24 = vector.broadcast %4 : vector<1x32xf32> to vector<8x32xf32>
    %25 = arith.mulf %23, %24 : vector<8x32xf32>
    %26 = vector.broadcast %5 : vector<1x32xf32> to vector<8x32xf32>
    %27 = arith.addf %25, %26 : vector<8x32xf32>
    %c0_12 = arith.constant 0 : index
    %c0_13 = arith.constant 0 : index
    %c0_14 = arith.constant 0 : index
    %28 = vector.load %arg2[%c0_12, %c0_13, %c0_14] : memref<1x8x32xf32, #tpu.memory_space<vmem>>, vector<1x8x32xf32>
    %29 = vector.shape_cast %28 : vector<1x8x32xf32> to vector<8x32xf32>
    %30 = arith.truncf %29 : vector<8x32xf32> to vector<8x32xbf16>
    %c0_15 = arith.constant 0 : index
    %c0_16 = arith.constant 0 : index
    %c0_17 = arith.constant 0 : index
    %31 = vector.load %arg3[%c0_15, %c0_16, %c0_17] : memref<1x8x8xf32, #tpu.memory_space<vmem>>, vector<1x8x8xf32>
    %32 = vector.shape_cast %31 : vector<1x8x8xf32> to vector<8x8xf32>
    %cst_18 = arith.constant 1.000000e+00 : f32
    %33 = vector.broadcast %cst_18 : f32 to vector<8x8xf32>
    %34 = arith.subf %32, %33 : vector<8x8xf32>
    %cst_19 = arith.constant 1.000000e+09 : f32
    %35 = vector.broadcast %cst_19 : f32 to vector<8x8xf32>
    %36 = arith.mulf %34, %35 : vector<8x8xf32>
    %c0_20 = arith.constant 0 : index
    %c0_21 = arith.constant 0 : index
    %c0_22 = arith.constant 0 : index
    %37 = vector.load %arg4[%c0_20, %c0_21, %c0_22] : memref<1x1x8xf32, #tpu.memory_space<vmem>>, vector<1x1x8xf32>
    %38 = vector.shape_cast %37 : vector<1x1x8xf32> to vector<1x8xf32>
    %cst_23 = arith.constant 1.000000e+00 : f32
    %39 = vector.broadcast %cst_23 : f32 to vector<1x8xf32>
    %40 = arith.subf %38, %39 : vector<1x8xf32>
    %cst_24 = arith.constant 1.000000e+09 : f32
    %41 = vector.broadcast %cst_24 : f32 to vector<1x8xf32>
    %42 = arith.mulf %40, %41 : vector<1x8xf32>
    %43 = arith.truncf %27 : vector<8x32xf32> to vector<8x32xbf16>
    %c0_25 = arith.constant 0 : index
    %c0_26 = arith.constant 0 : index
    %c0_27 = arith.constant 0 : index
    %44 = vector.load %arg8[%c0_25, %c0_26, %c0_27] : memref<2x32x96xbf16, #tpu.memory_space<vmem>>, vector<1x32x96xbf16>
    %45 = vector.shape_cast %44 : vector<1x32x96xbf16> to vector<32x96xbf16>
    %cst_28 = arith.constant dense<0.000000e+00> : vector<8x96xf32>
    %46 = tpu.matmul %43, %45, %cst_28 {dimension_numbers = #tpu.dot_dimension_numbers<[1], [0], [0], [1], [0, 0, 1, 1], [], []>} : vector<8x32xbf16>, vector<32x96xbf16>, vector<8x96xf32> -> vector<8x96xf32>
    %47 = vector.extract_strided_slice %46 {offsets = [0, 0], sizes = [8, 32], strides = [1, 1]} : vector<8x96xf32> to vector<8x32xf32>
    %48 = vector.extract_strided_slice %46 {offsets = [0, 32], sizes = [8, 32], strides = [1, 1]} : vector<8x96xf32> to vector<8x32xf32>
    %49 = vector.extract_strided_slice %46 {offsets = [0, 64], sizes = [8, 32], strides = [1, 1]} : vector<8x96xf32> to vector<8x32xf32>
    %c0_29 = arith.constant 0 : index
    %c0_30 = arith.constant 0 : index
    %c0_31 = arith.constant 0 : index
    %50 = vector.load %arg9[%c0_29, %c0_30, %c0_31] : memref<2x32x32xbf16, #tpu.memory_space<vmem>>, vector<1x32x32xbf16>
    %51 = vector.shape_cast %50 : vector<1x32x32xbf16> to vector<32x32xbf16>
    %c0_32 = arith.constant 0 : index
    %c0_33 = arith.constant 0 : index
    %c0_34 = arith.constant 0 : index
    %52 = vector.load %arg10[%c0_32, %c0_33, %c0_34] : memref<2x1x32xf32, #tpu.memory_space<vmem>>, vector<1x1x32xf32>
    %53 = vector.shape_cast %52 : vector<1x1x32xf32> to vector<1x32xf32>
    %c0_35 = arith.constant 0 : index
    %c0_36 = arith.constant 0 : index
    %c0_37 = arith.constant 0 : index
    %54 = vector.load %arg11[%c0_35, %c0_36, %c0_37] : memref<2x1x32xf32, #tpu.memory_space<vmem>>, vector<1x1x32xf32>
    %55 = vector.shape_cast %54 : vector<1x1x32xf32> to vector<1x32xf32>
    %cst_38 = arith.constant 2.500000e-01 : f32
    %56 = vector.broadcast %cst_38 : f32 to vector<8x32xf32>
    %57 = arith.mulf %47, %56 : vector<8x32xf32>
    %58 = arith.truncf %57 : vector<8x32xf32> to vector<8x32xbf16>
    %59 = arith.truncf %48 : vector<8x32xf32> to vector<8x32xbf16>
    %60 = arith.truncf %49 : vector<8x32xf32> to vector<8x32xbf16>
    %61 = vector.extract_strided_slice %58 {offsets = [0, 0], sizes = [8, 16], strides = [1, 1]} : vector<8x32xbf16> to vector<8x16xbf16>
    %62 = vector.extract_strided_slice %59 {offsets = [0, 0], sizes = [8, 16], strides = [1, 1]} : vector<8x32xbf16> to vector<8x16xbf16>
    %63 = vector.extract_strided_slice %60 {offsets = [0, 0], sizes = [8, 16], strides = [1, 1]} : vector<8x32xbf16> to vector<8x16xbf16>
    %cst_39 = arith.constant dense<0.000000e+00> : vector<8x8xf32>
    %64 = tpu.matmul %61, %62, %cst_39 {dimension_numbers = #tpu.dot_dimension_numbers<[1], [1], [0], [0], [0, 0, 1, 0], [], []>} : vector<8x16xbf16>, vector<8x16xbf16>, vector<8x8xf32> -> vector<8x8xf32>
    %65 = arith.addf %64, %36 : vector<8x8xf32>
    %cst_40 = arith.constant dense<0xFF800000> : vector<8xf32>
    %66 = vector.multi_reduction <maximumf>, %65, %cst_40 [1] : vector<8x8xf32> to vector<8xf32>
    %67 = vector.shape_cast %66 : vector<8xf32> to vector<8x1xf32>
    %68 = vector.broadcast %67 : vector<8x1xf32> to vector<8x8xf32>
    %69 = arith.subf %65, %68 : vector<8x8xf32>
    %70 = math.exp %69 : vector<8x8xf32>
    %cst_41 = arith.constant dense<0.000000e+00> : vector<8xf32>
    %71 = vector.multi_reduction <add>, %70, %cst_41 [1] : vector<8x8xf32> to vector<8xf32>
    %72 = vector.shape_cast %71 : vector<8xf32> to vector<8x1xf32>
    %73 = tpu.reciprocal %72 {approx = true} : vector<8x1xf32> -> vector<8x1xf32>
    %74 = vector.broadcast %73 : vector<8x1xf32> to vector<8x8xf32>
    %75 = arith.mulf %70, %74 : vector<8x8xf32>
    %76 = arith.truncf %75 : vector<8x8xf32> to vector<8x8xbf16>
    %cst_42 = arith.constant dense<0.000000e+00> : vector<8x16xf32>
    %77 = tpu.matmul %76, %63, %cst_42 {dimension_numbers = #tpu.dot_dimension_numbers<[1], [0], [0], [1], [0, 0, 1, 1], [], []>} : vector<8x8xbf16>, vector<8x16xbf16>, vector<8x16xf32> -> vector<8x16xf32>
    %78 = vector.extract_strided_slice %58 {offsets = [0, 16], sizes = [8, 16], strides = [1, 1]} : vector<8x32xbf16> to vector<8x16xbf16>
    %79 = vector.extract_strided_slice %59 {offsets = [0, 16], sizes = [8, 16], strides = [1, 1]} : vector<8x32xbf16> to vector<8x16xbf16>
    %80 = vector.extract_strided_slice %60 {offsets = [0, 16], sizes = [8, 16], strides = [1, 1]} : vector<8x32xbf16> to vector<8x16xbf16>
    %cst_43 = arith.constant dense<0.000000e+00> : vector<8x8xf32>
    %81 = tpu.matmul %78, %79, %cst_43 {dimension_numbers = #tpu.dot_dimension_numbers<[1], [1], [0], [0], [0, 0, 1, 0], [], []>} : vector<8x16xbf16>, vector<8x16xbf16>, vector<8x8xf32> -> vector<8x8xf32>
    %82 = arith.addf %81, %36 : vector<8x8xf32>
    %cst_44 = arith.constant dense<0xFF800000> : vector<8xf32>
    %83 = vector.multi_reduction <maximumf>, %82, %cst_44 [1] : vector<8x8xf32> to vector<8xf32>
    %84 = vector.shape_cast %83 : vector<8xf32> to vector<8x1xf32>
    %85 = vector.broadcast %84 : vector<8x1xf32> to vector<8x8xf32>
    %86 = arith.subf %82, %85 : vector<8x8xf32>
    %87 = math.exp %86 : vector<8x8xf32>
    %cst_45 = arith.constant dense<0.000000e+00> : vector<8xf32>
    %88 = vector.multi_reduction <add>, %87, %cst_45 [1] : vector<8x8xf32> to vector<8xf32>
    %89 = vector.shape_cast %88 : vector<8xf32> to vector<8x1xf32>
    %90 = tpu.reciprocal %89 {approx = true} : vector<8x1xf32> -> vector<8x1xf32>
    %91 = vector.broadcast %90 : vector<8x1xf32> to vector<8x8xf32>
    %92 = arith.mulf %87, %91 : vector<8x8xf32>
    %93 = arith.truncf %92 : vector<8x8xf32> to vector<8x8xbf16>
    %cst_46 = arith.constant dense<0.000000e+00> : vector<8x16xf32>
    %94 = tpu.matmul %93, %80, %cst_46 {dimension_numbers = #tpu.dot_dimension_numbers<[1], [0], [0], [1], [0, 0, 1, 1], [], []>} : vector<8x8xbf16>, vector<8x16xbf16>, vector<8x16xf32> -> vector<8x16xf32>
    %95 = tpu.concatenate %77, %94 in 1 : vector<8x16xf32>, vector<8x16xf32> -> vector<8x32xf32>
    %96 = arith.truncf %95 : vector<8x32xf32> to vector<8x32xbf16>
    %cst_47 = arith.constant dense<0.000000e+00> : vector<8x32xf32>
    %97 = tpu.matmul %96, %51, %cst_47 {dimension_numbers = #tpu.dot_dimension_numbers<[1], [0], [0], [1], [0, 0, 1, 1], [], []>} : vector<8x32xbf16>, vector<32x32xbf16>, vector<8x32xf32> -> vector<8x32xf32>
    %98 = arith.addf %97, %27 : vector<8x32xf32>
    %cst_48 = arith.constant dense<0.000000e+00> : vector<8xf32>
    %99 = vector.multi_reduction <add>, %98, %cst_48 [1] : vector<8x32xf32> to vector<8xf32>
    %100 = vector.shape_cast %99 : vector<8xf32> to vector<8x1xf32>
    %cst_49 = arith.constant 3.200000e+01 : f32
    %101 = vector.broadcast %cst_49 : f32 to vector<8x1xf32>
    %102 = arith.divf %100, %101 : vector<8x1xf32>
    %103 = vector.broadcast %102 : vector<8x1xf32> to vector<8x32xf32>
    %104 = arith.subf %98, %103 : vector<8x32xf32>
    %105 = arith.mulf %104, %104 : vector<8x32xf32>
    %cst_50 = arith.constant dense<0.000000e+00> : vector<8xf32>
    %106 = vector.multi_reduction <add>, %105, %cst_50 [1] : vector<8x32xf32> to vector<8xf32>
    %107 = vector.shape_cast %106 : vector<8xf32> to vector<8x1xf32>
    %cst_51 = arith.constant 3.200000e+01 : f32
    %108 = vector.broadcast %cst_51 : f32 to vector<8x1xf32>
    %109 = arith.divf %107, %108 : vector<8x1xf32>
    %110 = vector.broadcast %102 : vector<8x1xf32> to vector<8x32xf32>
    %111 = arith.subf %98, %110 : vector<8x32xf32>
    %cst_52 = arith.constant 9.99999997E-7 : f32
    %112 = vector.broadcast %cst_52 : f32 to vector<8x1xf32>
    %113 = arith.addf %109, %112 : vector<8x1xf32>
    %114 = math.rsqrt %113 : vector<8x1xf32>
    %115 = vector.broadcast %114 : vector<8x1xf32> to vector<8x32xf32>
    %116 = arith.mulf %111, %115 : vector<8x32xf32>
    %117 = vector.broadcast %53 : vector<1x32xf32> to vector<8x32xf32>
    %118 = arith.mulf %116, %117 : vector<8x32xf32>
    %119 = vector.broadcast %55 : vector<1x32xf32> to vector<8x32xf32>
    %120 = arith.addf %118, %119 : vector<8x32xf32>
    %121 = arith.truncf %120 : vector<8x32xf32> to vector<8x32xbf16>
    %c0_53 = arith.constant 0 : index
    %c0_54 = arith.constant 0 : index
    %c0_55 = arith.constant 0 : index
    %122 = vector.load %arg12[%c0_53, %c0_54, %c0_55] : memref<2x32x32xbf16, #tpu.memory_space<vmem>>, vector<1x32x32xbf16>
    %123 = vector.shape_cast %122 : vector<1x32x32xbf16> to vector<32x32xbf16>
    %cst_56 = arith.constant dense<0.000000e+00> : vector<8x32xf32>
    %124 = tpu.matmul %121, %123, %cst_56 {dimension_numbers = #tpu.dot_dimension_numbers<[1], [0], [0], [1], [0, 0, 1, 1], [], []>} : vector<8x32xbf16>, vector<32x32xbf16>, vector<8x32xf32> -> vector<8x32xf32>
    %c0_57 = arith.constant 0 : index
    %c0_58 = arith.constant 0 : index
    %c0_59 = arith.constant 0 : index
    %125 = vector.load %arg13[%c0_57, %c0_58, %c0_59] : memref<2x32x64xbf16, #tpu.memory_space<vmem>>, vector<1x32x64xbf16>
    %126 = vector.shape_cast %125 : vector<1x32x64xbf16> to vector<32x64xbf16>
    %cst_60 = arith.constant dense<0.000000e+00> : vector<8x64xf32>
    %127 = tpu.matmul %30, %126, %cst_60 {dimension_numbers = #tpu.dot_dimension_numbers<[1], [0], [0], [1], [0, 0, 1, 1], [], []>} : vector<8x32xbf16>, vector<32x64xbf16>, vector<8x64xf32> -> vector<8x64xf32>
    %128 = vector.extract_strided_slice %127 {offsets = [0, 0], sizes = [8, 32], strides = [1, 1]} : vector<8x64xf32> to vector<8x32xf32>
    %129 = vector.extract_strided_slice %127 {offsets = [0, 32], sizes = [8, 32], strides = [1, 1]} : vector<8x64xf32> to vector<8x32xf32>
    %c0_61 = arith.constant 0 : index
    %c0_62 = arith.constant 0 : index
    %c0_63 = arith.constant 0 : index
    %130 = vector.load %arg14[%c0_61, %c0_62, %c0_63] : memref<2x32x32xbf16, #tpu.memory_space<vmem>>, vector<1x32x32xbf16>
    %131 = vector.shape_cast %130 : vector<1x32x32xbf16> to vector<32x32xbf16>
    %c0_64 = arith.constant 0 : index
    %c0_65 = arith.constant 0 : index
    %c0_66 = arith.constant 0 : index
    %132 = vector.load %arg15[%c0_64, %c0_65, %c0_66] : memref<2x1x32xf32, #tpu.memory_space<vmem>>, vector<1x1x32xf32>
    %133 = vector.shape_cast %132 : vector<1x1x32xf32> to vector<1x32xf32>
    %c0_67 = arith.constant 0 : index
    %c0_68 = arith.constant 0 : index
    %c0_69 = arith.constant 0 : index
    %134 = vector.load %arg16[%c0_67, %c0_68, %c0_69] : memref<2x1x32xf32, #tpu.memory_space<vmem>>, vector<1x1x32xf32>
    %135 = vector.shape_cast %134 : vector<1x1x32xf32> to vector<1x32xf32>
    %cst_70 = arith.constant 2.500000e-01 : f32
    %136 = vector.broadcast %cst_70 : f32 to vector<8x32xf32>
    %137 = arith.mulf %124, %136 : vector<8x32xf32>
    %138 = arith.truncf %137 : vector<8x32xf32> to vector<8x32xbf16>
    %139 = arith.truncf %128 : vector<8x32xf32> to vector<8x32xbf16>
    %140 = arith.truncf %129 : vector<8x32xf32> to vector<8x32xbf16>
    %141 = vector.extract_strided_slice %138 {offsets = [0, 0], sizes = [8, 16], strides = [1, 1]} : vector<8x32xbf16> to vector<8x16xbf16>
    %142 = vector.extract_strided_slice %139 {offsets = [0, 0], sizes = [8, 16], strides = [1, 1]} : vector<8x32xbf16> to vector<8x16xbf16>
    %143 = vector.extract_strided_slice %140 {offsets = [0, 0], sizes = [8, 16], strides = [1, 1]} : vector<8x32xbf16> to vector<8x16xbf16>
    %cst_71 = arith.constant dense<0.000000e+00> : vector<8x8xf32>
    %144 = tpu.matmul %141, %142, %cst_71 {dimension_numbers = #tpu.dot_dimension_numbers<[1], [1], [0], [0], [0, 0, 1, 0], [], []>} : vector<8x16xbf16>, vector<8x16xbf16>, vector<8x8xf32> -> vector<8x8xf32>
    %145 = vector.broadcast %42 : vector<1x8xf32> to vector<8x8xf32>
    %146 = arith.addf %144, %145 : vector<8x8xf32>
    %cst_72 = arith.constant dense<0xFF800000> : vector<8xf32>
    %147 = vector.multi_reduction <maximumf>, %146, %cst_72 [1] : vector<8x8xf32> to vector<8xf32>
    %148 = vector.shape_cast %147 : vector<8xf32> to vector<8x1xf32>
    %149 = vector.broadcast %148 : vector<8x1xf32> to vector<8x8xf32>
    %150 = arith.subf %146, %149 : vector<8x8xf32>
    %151 = math.exp %150 : vector<8x8xf32>
    %cst_73 = arith.constant dense<0.000000e+00> : vector<8xf32>
    %152 = vector.multi_reduction <add>, %151, %cst_73 [1] : vector<8x8xf32> to vector<8xf32>
    %153 = vector.shape_cast %152 : vector<8xf32> to vector<8x1xf32>
    %154 = tpu.reciprocal %153 {approx = true} : vector<8x1xf32> -> vector<8x1xf32>
    %155 = vector.broadcast %154 : vector<8x1xf32> to vector<8x8xf32>
    %156 = arith.mulf %151, %155 : vector<8x8xf32>
    %157 = arith.truncf %156 : vector<8x8xf32> to vector<8x8xbf16>
    %cst_74 = arith.constant dense<0.000000e+00> : vector<8x16xf32>
    %158 = tpu.matmul %157, %143, %cst_74 {dimension_numbers = #tpu.dot_dimension_numbers<[1], [0], [0], [1], [0, 0, 1, 1], [], []>} : vector<8x8xbf16>, vector<8x16xbf16>, vector<8x16xf32> -> vector<8x16xf32>
    %159 = vector.extract_strided_slice %138 {offsets = [0, 16], sizes = [8, 16], strides = [1, 1]} : vector<8x32xbf16> to vector<8x16xbf16>
    %160 = vector.extract_strided_slice %139 {offsets = [0, 16], sizes = [8, 16], strides = [1, 1]} : vector<8x32xbf16> to vector<8x16xbf16>
    %161 = vector.extract_strided_slice %140 {offsets = [0, 16], sizes = [8, 16], strides = [1, 1]} : vector<8x32xbf16> to vector<8x16xbf16>
    %cst_75 = arith.constant dense<0.000000e+00> : vector<8x8xf32>
    %162 = tpu.matmul %159, %160, %cst_75 {dimension_numbers = #tpu.dot_dimension_numbers<[1], [1], [0], [0], [0, 0, 1, 0], [], []>} : vector<8x16xbf16>, vector<8x16xbf16>, vector<8x8xf32> -> vector<8x8xf32>
    %163 = vector.broadcast %42 : vector<1x8xf32> to vector<8x8xf32>
    %164 = arith.addf %162, %163 : vector<8x8xf32>
    %cst_76 = arith.constant dense<0xFF800000> : vector<8xf32>
    %165 = vector.multi_reduction <maximumf>, %164, %cst_76 [1] : vector<8x8xf32> to vector<8xf32>
    %166 = vector.shape_cast %165 : vector<8xf32> to vector<8x1xf32>
    %167 = vector.broadcast %166 : vector<8x1xf32> to vector<8x8xf32>
    %168 = arith.subf %164, %167 : vector<8x8xf32>
    %169 = math.exp %168 : vector<8x8xf32>
    %cst_77 = arith.constant dense<0.000000e+00> : vector<8xf32>
    %170 = vector.multi_reduction <add>, %169, %cst_77 [1] : vector<8x8xf32> to vector<8xf32>
    %171 = vector.shape_cast %170 : vector<8xf32> to vector<8x1xf32>
    %172 = tpu.reciprocal %171 {approx = true} : vector<8x1xf32> -> vector<8x1xf32>
    %173 = vector.broadcast %172 : vector<8x1xf32> to vector<8x8xf32>
    %174 = arith.mulf %169, %173 : vector<8x8xf32>
    %175 = arith.truncf %174 : vector<8x8xf32> to vector<8x8xbf16>
    %cst_78 = arith.constant dense<0.000000e+00> : vector<8x16xf32>
    %176 = tpu.matmul %175, %161, %cst_78 {dimension_numbers = #tpu.dot_dimension_numbers<[1], [0], [0], [1], [0, 0, 1, 1], [], []>} : vector<8x8xbf16>, vector<8x16xbf16>, vector<8x16xf32> -> vector<8x16xf32>
    %177 = tpu.concatenate %158, %176 in 1 : vector<8x16xf32>, vector<8x16xf32> -> vector<8x32xf32>
    %178 = arith.truncf %177 : vector<8x32xf32> to vector<8x32xbf16>
    %cst_79 = arith.constant dense<0.000000e+00> : vector<8x32xf32>
    %179 = tpu.matmul %178, %131, %cst_79 {dimension_numbers = #tpu.dot_dimension_numbers<[1], [0], [0], [1], [0, 0, 1, 1], [], []>} : vector<8x32xbf16>, vector<32x32xbf16>, vector<8x32xf32> -> vector<8x32xf32>
    %180 = arith.addf %179, %120 : vector<8x32xf32>
    %cst_80 = arith.constant dense<0.000000e+00> : vector<8xf32>
    %181 = vector.multi_reduction <add>, %180, %cst_80 [1] : vector<8x32xf32> to vector<8xf32>
    %182 = vector.shape_cast %181 : vector<8xf32> to vector<8x1xf32>
    %cst_81 = arith.constant 3.200000e+01 : f32
    %183 = vector.broadcast %cst_81 : f32 to vector<8x1xf32>
    %184 = arith.divf %182, %183 : vector<8x1xf32>
    %185 = vector.broadcast %184 : vector<8x1xf32> to vector<8x32xf32>
    %186 = arith.subf %180, %185 : vector<8x32xf32>
    %187 = arith.mulf %186, %186 : vector<8x32xf32>
    %cst_82 = arith.constant dense<0.000000e+00> : vector<8xf32>
    %188 = vector.multi_reduction <add>, %187, %cst_82 [1] : vector<8x32xf32> to vector<8xf32>
    %189 = vector.shape_cast %188 : vector<8xf32> to vector<8x1xf32>
    %cst_83 = arith.constant 3.200000e+01 : f32
    %190 = vector.broadcast %cst_83 : f32 to vector<8x1xf32>
    %191 = arith.divf %189, %190 : vector<8x1xf32>
    %192 = vector.broadcast %184 : vector<8x1xf32> to vector<8x32xf32>
    %193 = arith.subf %180, %192 : vector<8x32xf32>
    %cst_84 = arith.constant 9.99999997E-7 : f32
    %194 = vector.broadcast %cst_84 : f32 to vector<8x1xf32>
    %195 = arith.addf %191, %194 : vector<8x1xf32>
    %196 = math.rsqrt %195 : vector<8x1xf32>
    %197 = vector.broadcast %196 : vector<8x1xf32> to vector<8x32xf32>
    %198 = arith.mulf %193, %197 : vector<8x32xf32>
    %199 = vector.broadcast %133 : vector<1x32xf32> to vector<8x32xf32>
    %200 = arith.mulf %198, %199 : vector<8x32xf32>
    %201 = vector.broadcast %135 : vector<1x32xf32> to vector<8x32xf32>
    %202 = arith.addf %200, %201 : vector<8x32xf32>
    %c0_85 = arith.constant 0 : index
    %c0_86 = arith.constant 0 : index
    %c0_87 = arith.constant 0 : index
    %203 = vector.load %arg17[%c0_85, %c0_86, %c0_87] : memref<2x32x64xbf16, #tpu.memory_space<vmem>>, vector<1x32x64xbf16>
    %204 = vector.shape_cast %203 : vector<1x32x64xbf16> to vector<32x64xbf16>
    %c0_88 = arith.constant 0 : index
    %c0_89 = arith.constant 0 : index
    %c0_90 = arith.constant 0 : index
    %205 = vector.load %arg18[%c0_88, %c0_89, %c0_90] : memref<2x1x64xf32, #tpu.memory_space<vmem>>, vector<1x1x64xf32>
    %206 = vector.shape_cast %205 : vector<1x1x64xf32> to vector<1x64xf32>
    %c0_91 = arith.constant 0 : index
    %c0_92 = arith.constant 0 : index
    %c0_93 = arith.constant 0 : index
    %207 = vector.load %arg19[%c0_91, %c0_92, %c0_93] : memref<2x64x32xbf16, #tpu.memory_space<vmem>>, vector<1x64x32xbf16>
    %208 = vector.shape_cast %207 : vector<1x64x32xbf16> to vector<64x32xbf16>
    %c0_94 = arith.constant 0 : index
    %c0_95 = arith.constant 0 : index
    %c0_96 = arith.constant 0 : index
    %209 = vector.load %arg20[%c0_94, %c0_95, %c0_96] : memref<2x1x32xf32, #tpu.memory_space<vmem>>, vector<1x1x32xf32>
    %210 = vector.shape_cast %209 : vector<1x1x32xf32> to vector<1x32xf32>
    %c0_97 = arith.constant 0 : index
    %c0_98 = arith.constant 0 : index
    %c0_99 = arith.constant 0 : index
    %211 = vector.load %arg21[%c0_97, %c0_98, %c0_99] : memref<2x1x32xf32, #tpu.memory_space<vmem>>, vector<1x1x32xf32>
    %212 = vector.shape_cast %211 : vector<1x1x32xf32> to vector<1x32xf32>
    %c0_100 = arith.constant 0 : index
    %c0_101 = arith.constant 0 : index
    %c0_102 = arith.constant 0 : index
    %213 = vector.load %arg22[%c0_100, %c0_101, %c0_102] : memref<2x1x32xf32, #tpu.memory_space<vmem>>, vector<1x1x32xf32>
    %214 = vector.shape_cast %213 : vector<1x1x32xf32> to vector<1x32xf32>
    %215 = arith.truncf %202 : vector<8x32xf32> to vector<8x32xbf16>
    %cst_103 = arith.constant dense<0.000000e+00> : vector<8x64xf32>
    %216 = tpu.matmul %215, %204, %cst_103 {dimension_numbers = #tpu.dot_dimension_numbers<[1], [0], [0], [1], [0, 0, 1, 1], [], []>} : vector<8x32xbf16>, vector<32x64xbf16>, vector<8x64xf32> -> vector<8x64xf32>
    %217 = vector.broadcast %206 : vector<1x64xf32> to vector<8x64xf32>
    %218 = arith.addf %216, %217 : vector<8x64xf32>
    %cst_104 = arith.constant 0.000000e+00 : f32
    %219 = vector.broadcast %cst_104 : f32 to vector<8x64xf32>
    %220 = arith.maximumf %218, %219 : vector<8x64xf32>
    %221 = arith.truncf %220 : vector<8x64xf32> to vector<8x64xbf16>
    %cst_105 = arith.constant dense<0.000000e+00> : vector<8x32xf32>
    %222 = tpu.matmul %221, %208, %cst_105 {dimension_numbers = #tpu.dot_dimension_numbers<[1], [0], [0], [1], [0, 0, 1, 1], [], []>} : vector<8x64xbf16>, vector<64x32xbf16>, vector<8x32xf32> -> vector<8x32xf32>
    %223 = vector.broadcast %210 : vector<1x32xf32> to vector<8x32xf32>
    %224 = arith.addf %222, %223 : vector<8x32xf32>
    %225 = arith.addf %224, %202 : vector<8x32xf32>
    %cst_106 = arith.constant dense<0.000000e+00> : vector<8xf32>
    %226 = vector.multi_reduction <add>, %225, %cst_106 [1] : vector<8x32xf32> to vector<8xf32>
    %227 = vector.shape_cast %226 : vector<8xf32> to vector<8x1xf32>
    %cst_107 = arith.constant 3.200000e+01 : f32
    %228 = vector.broadcast %cst_107 : f32 to vector<8x1xf32>
    %229 = arith.divf %227, %228 : vector<8x1xf32>
    %230 = vector.broadcast %229 : vector<8x1xf32> to vector<8x32xf32>
    %231 = arith.subf %225, %230 : vector<8x32xf32>
    %232 = arith.mulf %231, %231 : vector<8x32xf32>
    %cst_108 = arith.constant dense<0.000000e+00> : vector<8xf32>
    %233 = vector.multi_reduction <add>, %232, %cst_108 [1] : vector<8x32xf32> to vector<8xf32>
    %234 = vector.shape_cast %233 : vector<8xf32> to vector<8x1xf32>
    %cst_109 = arith.constant 3.200000e+01 : f32
    %235 = vector.broadcast %cst_109 : f32 to vector<8x1xf32>
    %236 = arith.divf %234, %235 : vector<8x1xf32>
    %237 = vector.broadcast %229 : vector<8x1xf32> to vector<8x32xf32>
    %238 = arith.subf %225, %237 : vector<8x32xf32>
    %cst_110 = arith.constant 9.99999997E-7 : f32
    %239 = vector.broadcast %cst_110 : f32 to vector<8x1xf32>
    %240 = arith.addf %236, %239 : vector<8x1xf32>
    %241 = math.rsqrt %240 : vector<8x1xf32>
    %242 = vector.broadcast %241 : vector<8x1xf32> to vector<8x32xf32>
    %243 = arith.mulf %238, %242 : vector<8x32xf32>
    %244 = vector.broadcast %212 : vector<1x32xf32> to vector<8x32xf32>
    %245 = arith.mulf %243, %244 : vector<8x32xf32>
    %246 = vector.broadcast %214 : vector<1x32xf32> to vector<8x32xf32>
    %247 = arith.addf %245, %246 : vector<8x32xf32>
    %248 = arith.truncf %247 : vector<8x32xf32> to vector<8x32xbf16>
    %c1 = arith.constant 1 : index
    %c0_111 = arith.constant 0 : index
    %c0_112 = arith.constant 0 : index
    %249 = vector.load %arg8[%c1, %c0_111, %c0_112] : memref<2x32x96xbf16, #tpu.memory_space<vmem>>, vector<1x32x96xbf16>
    %250 = vector.shape_cast %249 : vector<1x32x96xbf16> to vector<32x96xbf16>
    %cst_113 = arith.constant dense<0.000000e+00> : vector<8x96xf32>
    %251 = tpu.matmul %248, %250, %cst_113 {dimension_numbers = #tpu.dot_dimension_numbers<[1], [0], [0], [1], [0, 0, 1, 1], [], []>} : vector<8x32xbf16>, vector<32x96xbf16>, vector<8x96xf32> -> vector<8x96xf32>
    %252 = vector.extract_strided_slice %251 {offsets = [0, 0], sizes = [8, 32], strides = [1, 1]} : vector<8x96xf32> to vector<8x32xf32>
    %253 = vector.extract_strided_slice %251 {offsets = [0, 32], sizes = [8, 32], strides = [1, 1]} : vector<8x96xf32> to vector<8x32xf32>
    %254 = vector.extract_strided_slice %251 {offsets = [0, 64], sizes = [8, 32], strides = [1, 1]} : vector<8x96xf32> to vector<8x32xf32>
    %c1_114 = arith.constant 1 : index
    %c0_115 = arith.constant 0 : index
    %c0_116 = arith.constant 0 : index
    %255 = vector.load %arg9[%c1_114, %c0_115, %c0_116] : memref<2x32x32xbf16, #tpu.memory_space<vmem>>, vector<1x32x32xbf16>
    %256 = vector.shape_cast %255 : vector<1x32x32xbf16> to vector<32x32xbf16>
    %c1_117 = arith.constant 1 : index
    %c0_118 = arith.constant 0 : index
    %c0_119 = arith.constant 0 : index
    %257 = vector.load %arg10[%c1_117, %c0_118, %c0_119] : memref<2x1x32xf32, #tpu.memory_space<vmem>>, vector<1x1x32xf32>
    %258 = vector.shape_cast %257 : vector<1x1x32xf32> to vector<1x32xf32>
    %c1_120 = arith.constant 1 : index
    %c0_121 = arith.constant 0 : index
    %c0_122 = arith.constant 0 : index
    %259 = vector.load %arg11[%c1_120, %c0_121, %c0_122] : memref<2x1x32xf32, #tpu.memory_space<vmem>>, vector<1x1x32xf32>
    %260 = vector.shape_cast %259 : vector<1x1x32xf32> to vector<1x32xf32>
    %cst_123 = arith.constant 2.500000e-01 : f32
    %261 = vector.broadcast %cst_123 : f32 to vector<8x32xf32>
    %262 = arith.mulf %252, %261 : vector<8x32xf32>
    %263 = arith.truncf %262 : vector<8x32xf32> to vector<8x32xbf16>
    %264 = arith.truncf %253 : vector<8x32xf32> to vector<8x32xbf16>
    %265 = arith.truncf %254 : vector<8x32xf32> to vector<8x32xbf16>
    %266 = vector.extract_strided_slice %263 {offsets = [0, 0], sizes = [8, 16], strides = [1, 1]} : vector<8x32xbf16> to vector<8x16xbf16>
    %267 = vector.extract_strided_slice %264 {offsets = [0, 0], sizes = [8, 16], strides = [1, 1]} : vector<8x32xbf16> to vector<8x16xbf16>
    %268 = vector.extract_strided_slice %265 {offsets = [0, 0], sizes = [8, 16], strides = [1, 1]} : vector<8x32xbf16> to vector<8x16xbf16>
    %cst_124 = arith.constant dense<0.000000e+00> : vector<8x8xf32>
    %269 = tpu.matmul %266, %267, %cst_124 {dimension_numbers = #tpu.dot_dimension_numbers<[1], [1], [0], [0], [0, 0, 1, 0], [], []>} : vector<8x16xbf16>, vector<8x16xbf16>, vector<8x8xf32> -> vector<8x8xf32>
    %270 = arith.addf %269, %36 : vector<8x8xf32>
    %cst_125 = arith.constant dense<0xFF800000> : vector<8xf32>
    %271 = vector.multi_reduction <maximumf>, %270, %cst_125 [1] : vector<8x8xf32> to vector<8xf32>
    %272 = vector.shape_cast %271 : vector<8xf32> to vector<8x1xf32>
    %273 = vector.broadcast %272 : vector<8x1xf32> to vector<8x8xf32>
    %274 = arith.subf %270, %273 : vector<8x8xf32>
    %275 = math.exp %274 : vector<8x8xf32>
    %cst_126 = arith.constant dense<0.000000e+00> : vector<8xf32>
    %276 = vector.multi_reduction <add>, %275, %cst_126 [1] : vector<8x8xf32> to vector<8xf32>
    %277 = vector.shape_cast %276 : vector<8xf32> to vector<8x1xf32>
    %278 = tpu.reciprocal %277 {approx = true} : vector<8x1xf32> -> vector<8x1xf32>
    %279 = vector.broadcast %278 : vector<8x1xf32> to vector<8x8xf32>
    %280 = arith.mulf %275, %279 : vector<8x8xf32>
    %281 = arith.truncf %280 : vector<8x8xf32> to vector<8x8xbf16>
    %cst_127 = arith.constant dense<0.000000e+00> : vector<8x16xf32>
    %282 = tpu.matmul %281, %268, %cst_127 {dimension_numbers = #tpu.dot_dimension_numbers<[1], [0], [0], [1], [0, 0, 1, 1], [], []>} : vector<8x8xbf16>, vector<8x16xbf16>, vector<8x16xf32> -> vector<8x16xf32>
    %283 = vector.extract_strided_slice %263 {offsets = [0, 16], sizes = [8, 16], strides = [1, 1]} : vector<8x32xbf16> to vector<8x16xbf16>
    %284 = vector.extract_strided_slice %264 {offsets = [0, 16], sizes = [8, 16], strides = [1, 1]} : vector<8x32xbf16> to vector<8x16xbf16>
    %285 = vector.extract_strided_slice %265 {offsets = [0, 16], sizes = [8, 16], strides = [1, 1]} : vector<8x32xbf16> to vector<8x16xbf16>
    %cst_128 = arith.constant dense<0.000000e+00> : vector<8x8xf32>
    %286 = tpu.matmul %283, %284, %cst_128 {dimension_numbers = #tpu.dot_dimension_numbers<[1], [1], [0], [0], [0, 0, 1, 0], [], []>} : vector<8x16xbf16>, vector<8x16xbf16>, vector<8x8xf32> -> vector<8x8xf32>
    %287 = arith.addf %286, %36 : vector<8x8xf32>
    %cst_129 = arith.constant dense<0xFF800000> : vector<8xf32>
    %288 = vector.multi_reduction <maximumf>, %287, %cst_129 [1] : vector<8x8xf32> to vector<8xf32>
    %289 = vector.shape_cast %288 : vector<8xf32> to vector<8x1xf32>
    %290 = vector.broadcast %289 : vector<8x1xf32> to vector<8x8xf32>
    %291 = arith.subf %287, %290 : vector<8x8xf32>
    %292 = math.exp %291 : vector<8x8xf32>
    %cst_130 = arith.constant dense<0.000000e+00> : vector<8xf32>
    %293 = vector.multi_reduction <add>, %292, %cst_130 [1] : vector<8x8xf32> to vector<8xf32>
    %294 = vector.shape_cast %293 : vector<8xf32> to vector<8x1xf32>
    %295 = tpu.reciprocal %294 {approx = true} : vector<8x1xf32> -> vector<8x1xf32>
    %296 = vector.broadcast %295 : vector<8x1xf32> to vector<8x8xf32>
    %297 = arith.mulf %292, %296 : vector<8x8xf32>
    %298 = arith.truncf %297 : vector<8x8xf32> to vector<8x8xbf16>
    %cst_131 = arith.constant dense<0.000000e+00> : vector<8x16xf32>
    %299 = tpu.matmul %298, %285, %cst_131 {dimension_numbers = #tpu.dot_dimension_numbers<[1], [0], [0], [1], [0, 0, 1, 1], [], []>} : vector<8x8xbf16>, vector<8x16xbf16>, vector<8x16xf32> -> vector<8x16xf32>
    %300 = tpu.concatenate %282, %299 in 1 : vector<8x16xf32>, vector<8x16xf32> -> vector<8x32xf32>
    %301 = arith.truncf %300 : vector<8x32xf32> to vector<8x32xbf16>
    %cst_132 = arith.constant dense<0.000000e+00> : vector<8x32xf32>
    %302 = tpu.matmul %301, %256, %cst_132 {dimension_numbers = #tpu.dot_dimension_numbers<[1], [0], [0], [1], [0, 0, 1, 1], [], []>} : vector<8x32xbf16>, vector<32x32xbf16>, vector<8x32xf32> -> vector<8x32xf32>
    %303 = arith.addf %302, %247 : vector<8x32xf32>
    %cst_133 = arith.constant dense<0.000000e+00> : vector<8xf32>
    %304 = vector.multi_reduction <add>, %303, %cst_133 [1] : vector<8x32xf32> to vector<8xf32>
    %305 = vector.shape_cast %304 : vector<8xf32> to vector<8x1xf32>
    %cst_134 = arith.constant 3.200000e+01 : f32
    %306 = vector.broadcast %cst_134 : f32 to vector<8x1xf32>
    %307 = arith.divf %305, %306 : vector<8x1xf32>
    %308 = vector.broadcast %307 : vector<8x1xf32> to vector<8x32xf32>
    %309 = arith.subf %303, %308 : vector<8x32xf32>
    %310 = arith.mulf %309, %309 : vector<8x32xf32>
    %cst_135 = arith.constant dense<0.000000e+00> : vector<8xf32>
    %311 = vector.multi_reduction <add>, %310, %cst_135 [1] : vector<8x32xf32> to vector<8xf32>
    %312 = vector.shape_cast %311 : vector<8xf32> to vector<8x1xf32>
    %cst_136 = arith.constant 3.200000e+01 : f32
    %313 = vector.broadcast %cst_136 : f32 to vector<8x1xf32>
    %314 = arith.divf %312, %313 : vector<8x1xf32>
    %315 = vector.broadcast %307 : vector<8x1xf32> to vector<8x32xf32>
    %316 = arith.subf %303, %315 : vector<8x32xf32>
    %cst_137 = arith.constant 9.99999997E-7 : f32
    %317 = vector.broadcast %cst_137 : f32 to vector<8x1xf32>
    %318 = arith.addf %314, %317 : vector<8x1xf32>
    %319 = math.rsqrt %318 : vector<8x1xf32>
    %320 = vector.broadcast %319 : vector<8x1xf32> to vector<8x32xf32>
    %321 = arith.mulf %316, %320 : vector<8x32xf32>
    %322 = vector.broadcast %258 : vector<1x32xf32> to vector<8x32xf32>
    %323 = arith.mulf %321, %322 : vector<8x32xf32>
    %324 = vector.broadcast %260 : vector<1x32xf32> to vector<8x32xf32>
    %325 = arith.addf %323, %324 : vector<8x32xf32>
    %326 = arith.truncf %325 : vector<8x32xf32> to vector<8x32xbf16>
    %c1_138 = arith.constant 1 : index
    %c0_139 = arith.constant 0 : index
    %c0_140 = arith.constant 0 : index
    %327 = vector.load %arg12[%c1_138, %c0_139, %c0_140] : memref<2x32x32xbf16, #tpu.memory_space<vmem>>, vector<1x32x32xbf16>
    %328 = vector.shape_cast %327 : vector<1x32x32xbf16> to vector<32x32xbf16>
    %cst_141 = arith.constant dense<0.000000e+00> : vector<8x32xf32>
    %329 = tpu.matmul %326, %328, %cst_141 {dimension_numbers = #tpu.dot_dimension_numbers<[1], [0], [0], [1], [0, 0, 1, 1], [], []>} : vector<8x32xbf16>, vector<32x32xbf16>, vector<8x32xf32> -> vector<8x32xf32>
    %c1_142 = arith.constant 1 : index
    %c0_143 = arith.constant 0 : index
    %c0_144 = arith.constant 0 : index
    %330 = vector.load %arg13[%c1_142, %c0_143, %c0_144] : memref<2x32x64xbf16, #tpu.memory_space<vmem>>, vector<1x32x64xbf16>
    %331 = vector.shape_cast %330 : vector<1x32x64xbf16> to vector<32x64xbf16>
    %cst_145 = arith.constant dense<0.000000e+00> : vector<8x64xf32>
    %332 = tpu.matmul %30, %331, %cst_145 {dimension_numbers = #tpu.dot_dimension_numbers<[1], [0], [0], [1], [0, 0, 1, 1], [], []>} : vector<8x32xbf16>, vector<32x64xbf16>, vector<8x64xf32> -> vector<8x64xf32>
    %333 = vector.extract_strided_slice %332 {offsets = [0, 0], sizes = [8, 32], strides = [1, 1]} : vector<8x64xf32> to vector<8x32xf32>
    %334 = vector.extract_strided_slice %332 {offsets = [0, 32], sizes = [8, 32], strides = [1, 1]} : vector<8x64xf32> to vector<8x32xf32>
    %c1_146 = arith.constant 1 : index
    %c0_147 = arith.constant 0 : index
    %c0_148 = arith.constant 0 : index
    %335 = vector.load %arg14[%c1_146, %c0_147, %c0_148] : memref<2x32x32xbf16, #tpu.memory_space<vmem>>, vector<1x32x32xbf16>
    %336 = vector.shape_cast %335 : vector<1x32x32xbf16> to vector<32x32xbf16>
    %c1_149 = arith.constant 1 : index
    %c0_150 = arith.constant 0 : index
    %c0_151 = arith.constant 0 : index
    %337 = vector.load %arg15[%c1_149, %c0_150, %c0_151] : memref<2x1x32xf32, #tpu.memory_space<vmem>>, vector<1x1x32xf32>
    %338 = vector.shape_cast %337 : vector<1x1x32xf32> to vector<1x32xf32>
    %c1_152 = arith.constant 1 : index
    %c0_153 = arith.constant 0 : index
    %c0_154 = arith.constant 0 : index
    %339 = vector.load %arg16[%c1_152, %c0_153, %c0_154] : memref<2x1x32xf32, #tpu.memory_space<vmem>>, vector<1x1x32xf32>
    %340 = vector.shape_cast %339 : vector<1x1x32xf32> to vector<1x32xf32>
    %cst_155 = arith.constant 2.500000e-01 : f32
    %341 = vector.broadcast %cst_155 : f32 to vector<8x32xf32>
    %342 = arith.mulf %329, %341 : vector<8x32xf32>
    %343 = arith.truncf %342 : vector<8x32xf32> to vector<8x32xbf16>
    %344 = arith.truncf %333 : vector<8x32xf32> to vector<8x32xbf16>
    %345 = arith.truncf %334 : vector<8x32xf32> to vector<8x32xbf16>
    %346 = vector.extract_strided_slice %343 {offsets = [0, 0], sizes = [8, 16], strides = [1, 1]} : vector<8x32xbf16> to vector<8x16xbf16>
    %347 = vector.extract_strided_slice %344 {offsets = [0, 0], sizes = [8, 16], strides = [1, 1]} : vector<8x32xbf16> to vector<8x16xbf16>
    %348 = vector.extract_strided_slice %345 {offsets = [0, 0], sizes = [8, 16], strides = [1, 1]} : vector<8x32xbf16> to vector<8x16xbf16>
    %cst_156 = arith.constant dense<0.000000e+00> : vector<8x8xf32>
    %349 = tpu.matmul %346, %347, %cst_156 {dimension_numbers = #tpu.dot_dimension_numbers<[1], [1], [0], [0], [0, 0, 1, 0], [], []>} : vector<8x16xbf16>, vector<8x16xbf16>, vector<8x8xf32> -> vector<8x8xf32>
    %350 = vector.broadcast %42 : vector<1x8xf32> to vector<8x8xf32>
    %351 = arith.addf %349, %350 : vector<8x8xf32>
    %cst_157 = arith.constant dense<0xFF800000> : vector<8xf32>
    %352 = vector.multi_reduction <maximumf>, %351, %cst_157 [1] : vector<8x8xf32> to vector<8xf32>
    %353 = vector.shape_cast %352 : vector<8xf32> to vector<8x1xf32>
    %354 = vector.broadcast %353 : vector<8x1xf32> to vector<8x8xf32>
    %355 = arith.subf %351, %354 : vector<8x8xf32>
    %356 = math.exp %355 : vector<8x8xf32>
    %cst_158 = arith.constant dense<0.000000e+00> : vector<8xf32>
    %357 = vector.multi_reduction <add>, %356, %cst_158 [1] : vector<8x8xf32> to vector<8xf32>
    %358 = vector.shape_cast %357 : vector<8xf32> to vector<8x1xf32>
    %359 = tpu.reciprocal %358 {approx = true} : vector<8x1xf32> -> vector<8x1xf32>
    %360 = vector.broadcast %359 : vector<8x1xf32> to vector<8x8xf32>
    %361 = arith.mulf %356, %360 : vector<8x8xf32>
    %362 = arith.truncf %361 : vector<8x8xf32> to vector<8x8xbf16>
    %cst_159 = arith.constant dense<0.000000e+00> : vector<8x16xf32>
    %363 = tpu.matmul %362, %348, %cst_159 {dimension_numbers = #tpu.dot_dimension_numbers<[1], [0], [0], [1], [0, 0, 1, 1], [], []>} : vector<8x8xbf16>, vector<8x16xbf16>, vector<8x16xf32> -> vector<8x16xf32>
    %364 = vector.extract_strided_slice %343 {offsets = [0, 16], sizes = [8, 16], strides = [1, 1]} : vector<8x32xbf16> to vector<8x16xbf16>
    %365 = vector.extract_strided_slice %344 {offsets = [0, 16], sizes = [8, 16], strides = [1, 1]} : vector<8x32xbf16> to vector<8x16xbf16>
    %366 = vector.extract_strided_slice %345 {offsets = [0, 16], sizes = [8, 16], strides = [1, 1]} : vector<8x32xbf16> to vector<8x16xbf16>
    %cst_160 = arith.constant dense<0.000000e+00> : vector<8x8xf32>
    %367 = tpu.matmul %364, %365, %cst_160 {dimension_numbers = #tpu.dot_dimension_numbers<[1], [1], [0], [0], [0, 0, 1, 0], [], []>} : vector<8x16xbf16>, vector<8x16xbf16>, vector<8x8xf32> -> vector<8x8xf32>
    %368 = vector.broadcast %42 : vector<1x8xf32> to vector<8x8xf32>
    %369 = arith.addf %367, %368 : vector<8x8xf32>
    %cst_161 = arith.constant dense<0xFF800000> : vector<8xf32>
    %370 = vector.multi_reduction <maximumf>, %369, %cst_161 [1] : vector<8x8xf32> to vector<8xf32>
    %371 = vector.shape_cast %370 : vector<8xf32> to vector<8x1xf32>
    %372 = vector.broadcast %371 : vector<8x1xf32> to vector<8x8xf32>
    %373 = arith.subf %369, %372 : vector<8x8xf32>
    %374 = math.exp %373 : vector<8x8xf32>
    %cst_162 = arith.constant dense<0.000000e+00> : vector<8xf32>
    %375 = vector.multi_reduction <add>, %374, %cst_162 [1] : vector<8x8xf32> to vector<8xf32>
    %376 = vector.shape_cast %375 : vector<8xf32> to vector<8x1xf32>
    %377 = tpu.reciprocal %376 {approx = true} : vector<8x1xf32> -> vector<8x1xf32>
    %378 = vector.broadcast %377 : vector<8x1xf32> to vector<8x8xf32>
    %379 = arith.mulf %374, %378 : vector<8x8xf32>
    %380 = arith.truncf %379 : vector<8x8xf32> to vector<8x8xbf16>
    %cst_163 = arith.constant dense<0.000000e+00> : vector<8x16xf32>
    %381 = tpu.matmul %380, %366, %cst_163 {dimension_numbers = #tpu.dot_dimension_numbers<[1], [0], [0], [1], [0, 0, 1, 1], [], []>} : vector<8x8xbf16>, vector<8x16xbf16>, vector<8x16xf32> -> vector<8x16xf32>
    %382 = tpu.concatenate %363, %381 in 1 : vector<8x16xf32>, vector<8x16xf32> -> vector<8x32xf32>
    %383 = arith.truncf %382 : vector<8x32xf32> to vector<8x32xbf16>
    %cst_164 = arith.constant dense<0.000000e+00> : vector<8x32xf32>
    %384 = tpu.matmul %383, %336, %cst_164 {dimension_numbers = #tpu.dot_dimension_numbers<[1], [0], [0], [1], [0, 0, 1, 1], [], []>} : vector<8x32xbf16>, vector<32x32xbf16>, vector<8x32xf32> -> vector<8x32xf32>
    %385 = arith.addf %384, %325 : vector<8x32xf32>
    %cst_165 = arith.constant dense<0.000000e+00> : vector<8xf32>
    %386 = vector.multi_reduction <add>, %385, %cst_165 [1] : vector<8x32xf32> to vector<8xf32>
    %387 = vector.shape_cast %386 : vector<8xf32> to vector<8x1xf32>
    %cst_166 = arith.constant 3.200000e+01 : f32
    %388 = vector.broadcast %cst_166 : f32 to vector<8x1xf32>
    %389 = arith.divf %387, %388 : vector<8x1xf32>
    %390 = vector.broadcast %389 : vector<8x1xf32> to vector<8x32xf32>
    %391 = arith.subf %385, %390 : vector<8x32xf32>
    %392 = arith.mulf %391, %391 : vector<8x32xf32>
    %cst_167 = arith.constant dense<0.000000e+00> : vector<8xf32>
    %393 = vector.multi_reduction <add>, %392, %cst_167 [1] : vector<8x32xf32> to vector<8xf32>
    %394 = vector.shape_cast %393 : vector<8xf32> to vector<8x1xf32>
    %cst_168 = arith.constant 3.200000e+01 : f32
    %395 = vector.broadcast %cst_168 : f32 to vector<8x1xf32>
    %396 = arith.divf %394, %395 : vector<8x1xf32>
    %397 = vector.broadcast %389 : vector<8x1xf32> to vector<8x32xf32>
    %398 = arith.subf %385, %397 : vector<8x32xf32>
    %cst_169 = arith.constant 9.99999997E-7 : f32
    %399 = vector.broadcast %cst_169 : f32 to vector<8x1xf32>
    %400 = arith.addf %396, %399 : vector<8x1xf32>
    %401 = math.rsqrt %400 : vector<8x1xf32>
    %402 = vector.broadcast %401 : vector<8x1xf32> to vector<8x32xf32>
    %403 = arith.mulf %398, %402 : vector<8x32xf32>
    %404 = vector.broadcast %338 : vector<1x32xf32> to vector<8x32xf32>
    %405 = arith.mulf %403, %404 : vector<8x32xf32>
    %406 = vector.broadcast %340 : vector<1x32xf32> to vector<8x32xf32>
    %407 = arith.addf %405, %406 : vector<8x32xf32>
    %c1_170 = arith.constant 1 : index
    %c0_171 = arith.constant 0 : index
    %c0_172 = arith.constant 0 : index
    %408 = vector.load %arg17[%c1_170, %c0_171, %c0_172] : memref<2x32x64xbf16, #tpu.memory_space<vmem>>, vector<1x32x64xbf16>
    %409 = vector.shape_cast %408 : vector<1x32x64xbf16> to vector<32x64xbf16>
    %c1_173 = arith.constant 1 : index
    %c0_174 = arith.constant 0 : index
    %c0_175 = arith.constant 0 : index
    %410 = vector.load %arg18[%c1_173, %c0_174, %c0_175] : memref<2x1x64xf32, #tpu.memory_space<vmem>>, vector<1x1x64xf32>
    %411 = vector.shape_cast %410 : vector<1x1x64xf32> to vector<1x64xf32>
    %c1_176 = arith.constant 1 : index
    %c0_177 = arith.constant 0 : index
    %c0_178 = arith.constant 0 : index
    %412 = vector.load %arg19[%c1_176, %c0_177, %c0_178] : memref<2x64x32xbf16, #tpu.memory_space<vmem>>, vector<1x64x32xbf16>
    %413 = vector.shape_cast %412 : vector<1x64x32xbf16> to vector<64x32xbf16>
    %c1_179 = arith.constant 1 : index
    %c0_180 = arith.constant 0 : index
    %c0_181 = arith.constant 0 : index
    %414 = vector.load %arg20[%c1_179, %c0_180, %c0_181] : memref<2x1x32xf32, #tpu.memory_space<vmem>>, vector<1x1x32xf32>
    %415 = vector.shape_cast %414 : vector<1x1x32xf32> to vector<1x32xf32>
    %c1_182 = arith.constant 1 : index
    %c0_183 = arith.constant 0 : index
    %c0_184 = arith.constant 0 : index
    %416 = vector.load %arg21[%c1_182, %c0_183, %c0_184] : memref<2x1x32xf32, #tpu.memory_space<vmem>>, vector<1x1x32xf32>
    %417 = vector.shape_cast %416 : vector<1x1x32xf32> to vector<1x32xf32>
    %c1_185 = arith.constant 1 : index
    %c0_186 = arith.constant 0 : index
    %c0_187 = arith.constant 0 : index
    %418 = vector.load %arg22[%c1_185, %c0_186, %c0_187] : memref<2x1x32xf32, #tpu.memory_space<vmem>>, vector<1x1x32xf32>
    %419 = vector.shape_cast %418 : vector<1x1x32xf32> to vector<1x32xf32>
    %420 = arith.truncf %407 : vector<8x32xf32> to vector<8x32xbf16>
    %cst_188 = arith.constant dense<0.000000e+00> : vector<8x64xf32>
    %421 = tpu.matmul %420, %409, %cst_188 {dimension_numbers = #tpu.dot_dimension_numbers<[1], [0], [0], [1], [0, 0, 1, 1], [], []>} : vector<8x32xbf16>, vector<32x64xbf16>, vector<8x64xf32> -> vector<8x64xf32>
    %422 = vector.broadcast %411 : vector<1x64xf32> to vector<8x64xf32>
    %423 = arith.addf %421, %422 : vector<8x64xf32>
    %cst_189 = arith.constant 0.000000e+00 : f32
    %424 = vector.broadcast %cst_189 : f32 to vector<8x64xf32>
    %425 = arith.maximumf %423, %424 : vector<8x64xf32>
    %426 = arith.truncf %425 : vector<8x64xf32> to vector<8x64xbf16>
    %cst_190 = arith.constant dense<0.000000e+00> : vector<8x32xf32>
    %427 = tpu.matmul %426, %413, %cst_190 {dimension_numbers = #tpu.dot_dimension_numbers<[1], [0], [0], [1], [0, 0, 1, 1], [], []>} : vector<8x64xbf16>, vector<64x32xbf16>, vector<8x32xf32> -> vector<8x32xf32>
    %428 = vector.broadcast %415 : vector<1x32xf32> to vector<8x32xf32>
    %429 = arith.addf %427, %428 : vector<8x32xf32>
    %430 = arith.addf %429, %407 : vector<8x32xf32>
    %cst_191 = arith.constant dense<0.000000e+00> : vector<8xf32>
    %431 = vector.multi_reduction <add>, %430, %cst_191 [1] : vector<8x32xf32> to vector<8xf32>
    %432 = vector.shape_cast %431 : vector<8xf32> to vector<8x1xf32>
    %cst_192 = arith.constant 3.200000e+01 : f32
    %433 = vector.broadcast %cst_192 : f32 to vector<8x1xf32>
    %434 = arith.divf %432, %433 : vector<8x1xf32>
    %435 = vector.broadcast %434 : vector<8x1xf32> to vector<8x32xf32>
    %436 = arith.subf %430, %435 : vector<8x32xf32>
    %437 = arith.mulf %436, %436 : vector<8x32xf32>
    %cst_193 = arith.constant dense<0.000000e+00> : vector<8xf32>
    %438 = vector.multi_reduction <add>, %437, %cst_193 [1] : vector<8x32xf32> to vector<8xf32>
    %439 = vector.shape_cast %438 : vector<8xf32> to vector<8x1xf32>
    %cst_194 = arith.constant 3.200000e+01 : f32
    %440 = vector.broadcast %cst_194 : f32 to vector<8x1xf32>
    %441 = arith.divf %439, %440 : vector<8x1xf32>
    %442 = vector.broadcast %434 : vector<8x1xf32> to vector<8x32xf32>
    %443 = arith.subf %430, %442 : vector<8x32xf32>
    %cst_195 = arith.constant 9.99999997E-7 : f32
    %444 = vector.broadcast %cst_195 : f32 to vector<8x1xf32>
    %445 = arith.addf %441, %444 : vector<8x1xf32>
    %446 = math.rsqrt %445 : vector<8x1xf32>
    %447 = vector.broadcast %446 : vector<8x1xf32> to vector<8x32xf32>
    %448 = arith.mulf %443, %447 : vector<8x32xf32>
    %449 = vector.broadcast %417 : vector<1x32xf32> to vector<8x32xf32>
    %450 = arith.mulf %448, %449 : vector<8x32xf32>
    %451 = vector.broadcast %419 : vector<1x32xf32> to vector<8x32xf32>
    %452 = arith.addf %450, %451 : vector<8x32xf32>
    %c0_196 = arith.constant 0 : index
    %c0_197 = arith.constant 0 : index
    %c0_198 = arith.constant 0 : index
    %453 = vector.load %arg23[%c0_196, %c0_197, %c0_198] : memref<1x8x32xf32, #tpu.memory_space<vmem>>, vector<1x8x32xf32>
    %454 = vector.shape_cast %453 : vector<1x8x32xf32> to vector<8x32xf32>
    %455 = vector.shape_cast %452 : vector<8x32xf32> to vector<1x8x32xf32>
    tpu.vector_store %arg23[%c0_196, %c0_197, %c0_198], %455 {strides = array<i32>} : memref<1x8x32xf32, #tpu.memory_space<vmem>>, vector<1x8x32xf32>,
    return
  }
  func.func @transform_0(%arg0: i32) -> (i32, i32, i32) {
    %c0_i32 = arith.constant 0 : i32
    %c0_i32_0 = arith.constant 0 : i32
    %c0_i32_1 = arith.constant 0 : i32
    return %arg0, %c0_i32, %c0_i32_0 : i32, i32, i32
  }
  func.func @transform_1(%arg0: i32) -> (i32, i32, i32) {
    %c0_i32 = arith.constant 0 : i32
    %c0_i32_0 = arith.constant 0 : i32
    %c0_i32_1 = arith.constant 0 : i32
    return %arg0, %c0_i32, %c0_i32_0 : i32, i32, i32
  }
  func.func @transform_2(%arg0: i32) -> (i32, i32, i32) {
    %c0_i32 = arith.constant 0 : i32
    %c0_i32_0 = arith.constant 0 : i32
    %c0_i32_1 = arith.constant 0 : i32
    return %arg0, %c0_i32, %c0_i32_0 : i32, i32, i32
  }
  func.func @transform_3(%arg0: i32) -> (i32, i32, i32) {
    %c0_i32 = arith.constant 0 : i32
    %c0_i32_0 = arith.constant 0 : i32
    %c0_i32_1 = arith.constant 0 : i32
    return %arg0, %c0_i32, %c0_i32_0 : i32, i32, i32
  }
  func.func @transform_4(%arg0: i32) -> (i32, i32) {
    %c0_i32 = arith.constant 0 : i32
    %c0_i32_0 = arith.constant 0 : i32
    %c0_i32_1 = arith.constant 0 : i32
    return %c0_i32, %c0_i32_0 : i32, i32
  }
  func.func @transform_5(%arg0: i32) -> (i32, i32) {
    %c0_i32 = arith.constant 0 : i32
    %c0_i32_0 = arith.constant 0 : i32
    %c0_i32_1 = arith.constant 0 : i32
    return %c0_i32, %c0_i32_0 : i32, i32
  }
  func.func @transform_6(%arg0: i32) -> (i32, i32) {
    %c0_i32 = arith.constant 0 : i32
    %c0_i32_0 = arith.constant 0 : i32
    %c0_i32_1 = arith.constant 0 : i32
    return %c0_i32, %c0_i32_0 : i32, i32
  }
  func.func @transform_7(%arg0: i32) -> (i32, i32, i32) {
    %c0_i32 = arith.constant 0 : i32
    %c0_i32_0 = arith.constant 0 : i32
    %c0_i32_1 = arith.constant 0 : i32
    %c0_i32_2 = arith.constant 0 : i32
    return %c0_i32, %c0_i32_0, %c0_i32_1 : i32, i32, i32
  }
  func.func @transform_8(%arg0: i32) -> (i32, i32, i32) {
    %c0_i32 = arith.constant 0 : i32
    %c0_i32_0 = arith.constant 0 : i32
    %c0_i32_1 = arith.constant 0 : i32
    %c0_i32_2 = arith.constant 0 : i32
    return %c0_i32, %c0_i32_0, %c0_i32_1 : i32, i32, i32
  }
  func.func @transform_9(%arg0: i32) -> (i32, i32, i32) {
    %c0_i32 = arith.constant 0 : i32
    %c0_i32_0 = arith.constant 0 : i32
    %c0_i32_1 = arith.constant 0 : i32
    %c0_i32_2 = arith.constant 0 : i32
    return %c0_i32, %c0_i32_0, %c0_i32_1 : i32, i32, i32
  }
  func.func @transform_10(%arg0: i32) -> (i32, i32, i32) {
    %c0_i32 = arith.constant 0 : i32
    %c0_i32_0 = arith.constant 0 : i32
    %c0_i32_1 = arith.constant 0 : i32
    %c0_i32_2 = arith.constant 0 : i32
    return %c0_i32, %c0_i32_0, %c0_i32_1 : i32, i32, i32
  }
  func.func @transform_11(%arg0: i32) -> (i32, i32, i32) {
    %c0_i32 = arith.constant 0 : i32
    %c0_i32_0 = arith.constant 0 : i32
    %c0_i32_1 = arith.constant 0 : i32
    %c0_i32_2 = arith.constant 0 : i32
    return %c0_i32, %c0_i32_0, %c0_i32_1 : i32, i32, i32
  }
  func.func @transform_12(%arg0: i32) -> (i32, i32, i32) {
    %c0_i32 = arith.constant 0 : i32
    %c0_i32_0 = arith.constant 0 : i32
    %c0_i32_1 = arith.constant 0 : i32
    %c0_i32_2 = arith.constant 0 : i32
    return %c0_i32, %c0_i32_0, %c0_i32_1 : i32, i32, i32
  }
  func.func @transform_13(%arg0: i32) -> (i32, i32, i32) {
    %c0_i32 = arith.constant 0 : i32
    %c0_i32_0 = arith.constant 0 : i32
    %c0_i32_1 = arith.constant 0 : i32
    %c0_i32_2 = arith.constant 0 : i32
    return %c0_i32, %c0_i32_0, %c0_i32_1 : i32, i32, i32
  }
  func.func @transform_14(%arg0: i32) -> (i32, i32, i32) {
    %c0_i32 = arith.constant 0 : i32
    %c0_i32_0 = arith.constant 0 : i32
    %c0_i32_1 = arith.constant 0 : i32
    %c0_i32_2 = arith.constant 0 : i32
    return %c0_i32, %c0_i32_0, %c0_i32_1 : i32, i32, i32
  }
  func.func @transform_15(%arg0: i32) -> (i32, i32, i32) {
    %c0_i32 = arith.constant 0 : i32
    %c0_i32_0 = arith.constant 0 : i32
    %c0_i32_1 = arith.constant 0 : i32
    %c0_i32_2 = arith.constant 0 : i32
    return %c0_i32, %c0_i32_0, %c0_i32_1 : i32, i32, i32
  }
  func.func @transform_16(%arg0: i32) -> (i32, i32, i32) {
    %c0_i32 = arith.constant 0 : i32
    %c0_i32_0 = arith.constant 0 : i32
    %c0_i32_1 = arith.constant 0 : i32
    %c0_i32_2 = arith.constant 0 : i32
    return %c0_i32, %c0_i32_0, %c0_i32_1 : i32, i32, i32
  }
  func.func @transform_17(%arg0: i32) -> (i32, i32, i32) {
    %c0_i32 = arith.constant 0 : i32
    %c0_i32_0 = arith.constant 0 : i32
    %c0_i32_1 = arith.constant 0 : i32
    %c0_i32_2 = arith.constant 0 : i32
    return %c0_i32, %c0_i32_0, %c0_i32_1 : i32, i32, i32
  }
  func.func @transform_18(%arg0: i32) -> (i32, i32, i32) {
    %c0_i32 = arith.constant 0 : i32
    %c0_i32_0 = arith.constant 0 : i32
    %c0_i32_1 = arith.constant 0 : i32
    %c0_i32_2 = arith.constant 0 : i32
    return %c0_i32, %c0_i32_0, %c0_i32_1 : i32, i32, i32
  }
  func.func @transform_19(%arg0: i32) -> (i32, i32, i32) {
    %c0_i32 = arith.constant 0 : i32
    %c0_i32_0 = arith.constant 0 : i32
    %c0_i32_1 = arith.constant 0 : i32
    %c0_i32_2 = arith.constant 0 : i32
    return %c0_i32, %c0_i32_0, %c0_i32_1 : i32, i32, i32
  }
  func.func @transform_20(%arg0: i32) -> (i32, i32, i32) {
    %c0_i32 = arith.constant 0 : i32
    %c0_i32_0 = arith.constant 0 : i32
    %c0_i32_1 = arith.constant 0 : i32
    %c0_i32_2 = arith.constant 0 : i32
    return %c0_i32, %c0_i32_0, %c0_i32_1 : i32, i32, i32
  }
  func.func @transform_21(%arg0: i32) -> (i32, i32, i32) {
    %c0_i32 = arith.constant 0 : i32
    %c0_i32_0 = arith.constant 0 : i32
    %c0_i32_1 = arith.constant 0 : i32
    %c0_i32_2 = arith.constant 0 : i32
    return %c0_i32, %c0_i32_0, %c0_i32_1 : i32, i32, i32
  }
  func.func @transform_22(%arg0: i32) -> (i32, i32, i32) {
    %c0_i32 = arith.constant 0 : i32
    %c0_i32_0 = arith.constant 0 : i32
    %c0_i32_1 = arith.constant 0 : i32
    return %arg0, %c0_i32, %c0_i32_0 : i32, i32, i32
  }
}

</mosaic_0001>

<bundles_post_ra>
// kernel: tpu_custom_call.1
= control target key start
LH: loop header
LB: loop body
LE: loop exit
PB: predicated region body
PF: predicated region fallthrough
CT: control target
= control target key end

     0   :  { %s5462_s0 = inlined_call_operand.hbm [shape: f32[2,8,32], index: 0, kind: input, shape index: {}]   ;;  %s5463_s1 = inlined_call_operand.hbm [shape: f32[2,8,32], index: 1, kind: input, shape index: {}]   ;;  %s5464_s2 = inlined_call_operand.hbm [shape: f32[2,8,8], index: 2, kind: input, shape index: {}]   ;;  %s5465_s3 = inlined_call_operand.hbm [shape: f32[2,1,8], index: 3, kind: input, shape index: {}]   ;;  %s5466_s4 = inlined_call_operand.hbm [shape: f32[8,32], index: 4, kind: input, shape index: {}]   ;;  %s5467_s5 = inlined_call_operand.hbm [shape: f32[1,32], index: 5, kind: input, shape index: {}]   ;;  %s5468_s6 = inlined_call_operand.hbm [shape: f32[1,32], index: 6, kind: input, shape index: {}]   ;;  %s5469_s7 = inlined_call_operand.vmem [shape: bf16[2,32,96], index: 7, kind: input, shape index: {}]   ;;  %s5470_s8 = inlined_call_operand.vmem [shape: bf16[2,32,32], index: 8, kind: input, shape index: {}]   ;;  %s5471_s9 = inlined_call_operand.hbm [shape: f32[2,1,32], index: 9, kind: input, shape index: {}]   ;;  %s5472_s10 = inlined_call_operand.hbm [shape: f32[2,1,32], index: 10, kind: input, shape index: {}]   ;;  %s5473_s11 = inlined_call_operand.vmem [shape: bf16[2,32,32], index: 11, kind: input, shape index: {}]   ;;  %s5474_s12 = inlined_call_operand.vmem [shape: bf16[2,32,64], index: 12, kind: input, shape index: {}]   ;;  %s5475_s13 = inlined_call_operand.hbm [shape: bf16[2,32,32], index: 13, kind: input, shape index: {}]   ;;  %s5476_s14 = inlined_call_operand.hbm [shape: f32[2,1,32], index: 14, kind: input, shape index: {}]   ;;  %s5477_s15 = inlined_call_operand.hbm [shape: f32[2,1,32], index: 15, kind: input, shape index: {}]   ;;  %s5478_s16 = inlined_call_operand.hbm [shape: bf16[2,32,64], index: 16, kind: input, shape index: {}]   ;;  %s5479_s17 = inlined_call_operand.hbm [shape: f32[2,1,64], index: 17, kind: input, shape index: {}]   ;;  %s5480_s18 = inlined_call_operand.vmem [shape: bf16[2,64,32], index: 18, kind: input, shape index: {}]   ;;  %s5481_s19 = inlined_call_operand.vmem [shape: f32[2,1,32], index: 19, kind: input, shape index: {}]   ;;  %s5482_s20 = inlined_call_operand.vmem [shape: f32[2,1,32], index: 20, kind: input, shape index: {}]   ;;  %s5483_s21 = inlined_call_operand.vmem [shape: f32[2,1,32], index: 21, kind: input, shape index: {}]   ;;  %s5484_s22 = inlined_call_operand.hbm [shape: f32[2,8,32], index: 22, kind: output, shape index: {}]  }
   0x1   :  { %5535 = sst [smem:[#allocation44_spill]] %s5462_s0 }
   0x2   :  { %5536 = sst [smem:[#allocation45_spill]] %s5463_s1 }
   0x3   :  { %5537 = sst [smem:[#allocation46_spill]] %s5464_s2 }
   0x4   :  { %5538 = sst [smem:[#allocation47_spill]] %s5465_s3 }
   0x5   :  { %5539 = sst [smem:[#allocation48_spill]] %s5466_s4 }
   0x6   :  { %5540 = sst [smem:[#allocation49_spill]] %s5467_s5 }
   0x7   :  { %5541 = sst [smem:[#allocation50_spill]] %s5468_s6 }
   0x8   :  { %5542 = sst [smem:[#allocation51_spill]] %s5469_s7 }
   0x9   :  { %5543 = sst [smem:[#allocation52_spill]] %s5470_s8 }
   0xa   :  { %5544 = sst [smem:[#allocation53_spill]] %s5471_s9 }
   0xb   :  { %5545 = sst [smem:[#allocation54_spill]] %s5472_s10 }
   0xc   :  { %5546 = sst [smem:[#allocation55_spill]] %s5473_s11 }
   0xd   :  { %5547 = sst [smem:[#allocation56_spill]] %s5474_s12 }
   0xe   :  { %5548 = sst [smem:[#allocation57_spill]] %s5475_s13 }
   0xf   :  { %5549 = sst [smem:[#allocation58_spill]] %s5476_s14 }
  0x10   :  { %5550 = sst [smem:[#allocation59_spill]] %s5477_s15 }
  0x11   :  { %5551 = sst [smem:[#allocation60_spill]] %s5480_s18 }
  0x12   :  { %5552 = sst [smem:[#allocation61_spill]] %s5481_s19 }
  0x13   :  { %5553 = sst [smem:[#allocation62_spill]] %s5482_s20 }
  0x14   :  { %5554 = sst [smem:[#allocation63_spill]] %s5483_s21 }
  0x15   :  { %5555 = sst [smem:[#allocation64_spill]] %s5484_s22 }
  0x16   :  { %27 = vsyncpa [#allocation3], 0 }
  0x17   :  { %29 = vsyncpa [#allocation3 + $0x1], 0 }
  0x18   :  { %30 = vsyncpa [#allocation6], 0 }
  0x19   :  { %32 = vsyncpa [#allocation6 + $0x1], 0 }
  0x1a   :  { %33 = vsyncpa [#allocation9], 0 }
  0x1b   :  { %35 = vsyncpa [#allocation9 + $0x1], 0 }
  0x1c   :  { %36 = vsyncpa [#allocation12], 0 }
  0x1d   :  { %37 = vsyncpa [#allocation15], 0 }
  0x1e   :  { %38 = vsyncpa [#allocation18], 0 }
  0x1f   :  { %39 = vsyncpa [#allocation21], 0 }
  0x20   :  { %40 = vsyncpa [#allocation24], 0 }
  0x21   :  { %41 = vsyncpa [#allocation4], 0 }
  0x22   :  { %43 = vsyncpa [#allocation4 + $0x1], 0  ;;  %s4571_s3 = smov 0   ;;  %s4573_s28 = smov 0  }
  0x23   :  { %s4575_s29 = smov 0   ;;  %s4577_s30 = smov 0  }
  0x24 LB: > { %5556 = sst [smem:[#allocation36_spill]] %s4415_s3  ;;  %s4429_s4 = smov [#allocation10]   ;;  %s4427_s30 = sphi %s4577_s30, %s5629_s30   ;;  %s4423_s29 = sphi %s4575_s29, %s5631_s29   ;;  %s4419_s28 = sphi %s4573_s28, %s5633_s28   ;;  %s4415_s3 = sphi %s4571_s3, %s5632_s3  }
  0x25   : > { %5557 = sst [smem:[#allocation37_spill]] %s4423_s29  ;;  %s575_s0 = sshll.u32 %s4429_s4, 4  ;;  %s576_s0 = int_to_ptr.vmem [resolvable:$true] %s575_s0 }
  0x26   : > { %s4592_s23 = sadd.s32 4294967295, %s4427_s30   ;;  %p3236_p0 = scmp.ge.s32.totalorder %s4427_s30, 1 }
  0x27   : > { %5558 = sst [smem:[#allocation38_spill]] %s4592_s23  ;;  %p5496_p1 = scmp.eq.s32.totalorder %s4592_s23, 0 }
  0x28   : > { %p562_p2 = scmp.lt.s32.totalorder %s4427_s30, 3  ;;  %s4430_s5 = smov [#allocation11]  }
  0x29   : > { %s586_s24 = sshll.u32 %s4430_s5, 4  ;;  %s4431_s6 = smov [#allocation14]   ;;  %s4604_s24 = int_to_ptr.vmem [resolvable:$true] %s586_s24 }
  0x2a   : > { %p4597_p3 = pnand %p3236_p0, %p562_p2  ;;  %s613_s25 = sshll.u32 %s4431_s6, 4  ;;  %s4612_s25 = int_to_ptr.vmem [resolvable:$true] %s613_s25 }
  0x2b   : > { %s5561_s4 = sld [smem:[#allocation48_spill]] }
  0x2c   : > { %s5559_s1 = scalar_select %p4597_p3, 1, 0 }
  0x2d   : > { %p3727_p5 = pneg %p4597_p3 }
  0x2f   : > { %p4608_p6 = pnand %p3727_p5, %p5496_p1 }
  0x31   : > { %s5560_s26 = scalar_select %p4608_p6, 1, 0 }
  0x32   : > { %s3929_s22 = scalar_lea.hbm %s5561_s4, 128  ;;  %p4622_p8 = pneg %p4608_p6 }
  0x33   : > { %p3930_p7 = scmp.ne.s32.totalorder %s5561_s4, %s3929_s22  ;;  %p3936_p11 = scmp.lt.u32.totalorder %s3929_s22, %s5561_s4 }
  0x34   : > { %s5562_s5 = scalar_select %p4622_p8, 1, 0 }
  0x35   : > { %p3932_p9 = pnand %p4622_p8, %p3930_p7 }
  0x37   : > { %p3933_p10 = pneg %p3932_p9 }
  0x39   : > { %p3938_p12 = pnand %p3936_p11, %p3933_p10 }
  0x3b   : > { %3941 = shalt.err (!%p3938_p12)
}
  0x3c   : > { %s3942_s2 = scalar_lea.vmem %s576_s0, 128  ;;  %p3950_p5 = scmp.lt.s32.totalorder %s576_s0, %s576_s0 }
  0x3d   : > { %p3943_p13 = scmp.ne.s32.totalorder %s576_s0, %s3942_s2  ;;  %p3951_p4 = scmp.lt.s32.totalorder %s3942_s2, %s3942_s2 }
  0x3f   : > { %p3945_p0 = pnand %p3943_p13, %p4622_p8  ;;  %p3952_p1 = por %p3951_p4, %p3950_p5 }
  0x41   : > { %p3946_p2 = pneg %p3945_p0 }
  0x43   : > { %p3953_p3 = pnand %p3952_p1, %p3946_p2 }
  0x45   : > { %3956 = shalt.err (!%p3953_p3)
}
  0x46   : > { %3730 = dma.hbm_to_vmem [thread:$0]  (!%p4608_p6), %s5561_s4, 128, %s576_s0, [#allocation9]  }
  0x47   : > { %s5563_s27 = sld [smem:[#allocation49_spill]] }
  0x4d   : > { %s3957_s6 = scalar_lea.hbm %s5563_s27, 16 }
  0x4e   : > { %p3958_p7 = scmp.ne.s32.totalorder %s5563_s27, %s3957_s6  ;;  %p3964_p1 = scmp.lt.u32.totalorder %s3957_s6, %s5563_s27 }
  0x50   : > { %p3960_p9 = pnand %p3958_p7, %p4622_p8 }
  0x52   : > { %p3961_p4 = pneg %p3960_p9 }
  0x54   : > { %p3966_p3 = pnand %p3964_p1, %p3961_p4 }
  0x56   : > { %3969 = shalt.err (!%p3966_p3)
}
  0x57   : > { %s3970_s0 = scalar_lea.vmem %s4604_s24, 16  ;;  %s3977_s11 = scalar_lea.vmem %s4604_s24, 32 }
  0x58   : > { %p3971_p10 = scmp.ne.s32.totalorder %s4604_s24, %s3970_s0  ;;  %p3978_p13 = scmp.lt.s32.totalorder %s4604_s24, %s4604_s24 }
  0x59   : > { %p3979_p0 = scmp.lt.s32.totalorder %s3977_s11, %s3970_s0 }
  0x5a   : > { %p3973_p11 = pnand %p3971_p10, %p4622_p8 }
  0x5b   : > { %p3980_p2 = por %p3979_p0, %p3978_p13 }
  0x5c   : > { %p3974_p12 = pneg %p3973_p11 }
  0x5e   : > { %p3981_p5 = pnand %p3980_p2, %p3974_p12 }
  0x60   : > { %3984 = shalt.err (!%p3981_p5)
}
  0x61   : > { %3733 = dma.hbm_to_vmem [thread:$0]  (!%p4608_p6), %s5563_s27, 16, %s4604_s24, [#allocation12]  }
  0x62   : > { %s5564_s9 = sld [smem:[#allocation53_spill]] }
  0x68   : > { %s3985_s19 = scalar_lea.hbm %s5564_s9, 32 }
  0x69   : > { %p3986_p7 = scmp.ne.s32.totalorder %s5564_s9, %s3985_s19  ;;  %p3992_p1 = scmp.lt.u32.totalorder %s3985_s19, %s5564_s9 }
  0x6b   : > { %p3988_p9 = pnand %p3986_p7, %p4622_p8 }
  0x6d   : > { %p3989_p4 = pneg %p3988_p9 }
  0x6f   : > { %p3994_p3 = pnand %p3992_p1, %p3989_p4 }
  0x71   : > { %3997 = shalt.err (!%p3994_p3)
}
  0x72   : > { %s3998_s24 = scalar_lea.vmem %s4612_s25, 32  ;;  %p4006_p13 = scmp.lt.s32.totalorder %s4612_s25, %s4612_s25 }
  0x73   : > { %p3999_p10 = scmp.ne.s32.totalorder %s4612_s25, %s3998_s24  ;;  %p4007_p0 = scmp.lt.s32.totalorder %s3998_s24, %s3998_s24 }
  0x75   : > { %p4001_p11 = pnand %p3999_p10, %p4622_p8  ;;  %p4008_p2 = por %p4007_p0, %p4006_p13 }
  0x77   : > { %p4002_p12 = pneg %p4001_p11 }
  0x79   : > { %p4009_p5 = pnand %p4008_p2, %p4002_p12 }
  0x7b   : > { %4012 = shalt.err (!%p4009_p5)
}
  0x7c   : > { %s5503_s11 = smov 16   ;;  %s5505_s12 = smov 1  }
  0x7d   : > { %3739 = dma.hbm_to_vmem [thread:$0]  (!%p4608_p6), %s5564_s9, 32, %s4612_s25, [#allocation15], %s5503_s11, %s5503_s11, %s5505_s12  }
  0x7e   : > { %s4434_s21 = smov [#allocation17]   ;;  %s5565_s13 = sld [smem:[#allocation57_spill]] }
  0x7f   : > { %s645_s19 = sshll.u32 %s4434_s21, 4  ;;  %s646_s19 = int_to_ptr.vmem [resolvable:$true] %s645_s19 }
  0x84   : > { %s4013_s2 = scalar_lea.hbm %s5565_s13, 512 }
  0x85   : > { %p4014_p7 = scmp.ne.s32.totalorder %s5565_s13, %s4013_s2  ;;  %p4020_p1 = scmp.lt.u32.totalorder %s4013_s2, %s5565_s13 }
  0x87   : > { %p4016_p9 = pnand %p4014_p7, %p4622_p8 }
  0x89   : > { %p4017_p4 = pneg %p4016_p9 }
  0x8b   : > { %p4022_p3 = pnand %p4020_p1, %p4017_p4 }
  0x8d   : > { %4025 = shalt.err (!%p4022_p3)
}
  0x8e   : > { %s4026_s25 = scalar_lea.vmem %s646_s19, 512  ;;  %p4034_p13 = scmp.lt.s32.totalorder %s646_s19, %s646_s19 }
  0x8f   : > { %p4027_p10 = scmp.ne.s32.totalorder %s646_s19, %s4026_s25  ;;  %p4035_p0 = scmp.lt.s32.totalorder %s4026_s25, %s4026_s25 }
  0x91   : > { %p4029_p11 = pnand %p4027_p10, %p4622_p8  ;;  %p4036_p2 = por %p4035_p0, %p4034_p13 }
  0x93   : > { %p4030_p12 = pneg %p4029_p11 }
  0x95   : > { %p4037_p5 = pnand %p4036_p2, %p4030_p12 }
  0x97   : > { %4040 = shalt.err (!%p4037_p5)
}
  0x98   : > { %s5507_s18 = smov 64   ;;  %s5508_s20 = smov 4  }
  0x99   : > { %3745 = dma.hbm_to_vmem [thread:$0]  (!%p4608_p6), %s5565_s13, 512, %s646_s19, [#allocation18], %s5507_s18, %s5507_s18, %s5508_s20  }
  0x9a   : > { %s4437_s21 = smov [#allocation20]   ;;  %s5566_s15 = sld [smem:[#allocation59_spill]] }
  0x9b   : > { %s671_s22 = sshll.u32 %s4437_s21, 4  ;;  %s672_s22 = int_to_ptr.vmem [resolvable:$true] %s671_s22 }
  0xa0   : > { %s4041_s0 = scalar_lea.hbm %s5566_s15, 32 }
  0xa1   : > { %p4042_p7 = scmp.ne.s32.totalorder %s5566_s15, %s4041_s0  ;;  %p4048_p1 = scmp.lt.u32.totalorder %s4041_s0, %s5566_s15 }
  0xa3   : > { %p4044_p9 = pnand %p4042_p7, %p4622_p8 }
  0xa5   : > { %p4045_p4 = pneg %p4044_p9 }
  0xa7   : > { %p4050_p3 = pnand %p4048_p1, %p4045_p4 }
  0xa9   : > { %4053 = shalt.err (!%p4050_p3)
}
  0xaa   : > { %s4054_s19 = scalar_lea.vmem %s672_s22, 32  ;;  %p4062_p13 = scmp.lt.s32.totalorder %s672_s22, %s672_s22 }
  0xab   : > { %p4055_p10 = scmp.ne.s32.totalorder %s672_s22, %s4054_s19  ;;  %p4063_p0 = scmp.lt.s32.totalorder %s4054_s19, %s4054_s19 }
  0xad   : > { %p4057_p11 = pnand %p4055_p10, %p4622_p8  ;;  %p4064_p2 = por %p4063_p0, %p4062_p13 }
  0xaf   : > { %p4058_p12 = pneg %p4057_p11 }
  0xb1   : > { %p4065_p5 = pnand %p4064_p2, %p4058_p12 }
  0xb3   : > { %4068 = shalt.err (!%p4065_p5)
}
  0xb4   : > { %s5567_s4 = smov 1   ;;  %s5568_s27 = smov 16  }
  0xb5   : > { %3751 = dma.hbm_to_vmem [thread:$0]  (!%p4608_p6), %s5566_s15, 32, %s672_s22, [#allocation21], %s5568_s27, %s5568_s27, %s5567_s4  }
  0xb6   : > { %s3235_s21 = sadd.s32 4294967294, %s4427_s30   ;;  %s4732_s6 = sadd.s32 1, %s4427_s30  }
  0xb7   : > { %5569 = sst [smem:[#allocation39_spill]] %s4732_s6  ;;  %s56_s2 = sadd.s32 1, %s4423_s29 }
  0xb8   : > { %s53_s0 = ssub.s32 %s4427_s30, %s4732_s6  ;;  %p63_p7 = scmp.ne.s32.totalorder %s4423_s29, %s4419_s28 }
  0xb9   : > { %p54_p9 = scmp.eq.s32.totalorder %s53_s0, 0  ;;  %p64_p4 = scmp.eq.s32.totalorder %s4427_s30, 0 }
  0xba   : > { %p69_p1 = scmp.ne.s32.totalorder %s4419_s28, %s4415_s3  ;;  %p549_p3 = scmp.eq.s32.totalorder %s4592_s23, 1 }
  0xbb   : > { %s4744_s24 = scalar_select %p54_p9, %s4423_s29, %s56_s2  }
  0xbc   : > { %p65_p10 = por %p64_p4, %p63_p7  ;;  %p5571_p11 = scmp.eq.s32.totalorder %s4592_s23, 0 }
  0xbd   : > { %5570 = sst [smem:[#allocation40_spill]] %s4744_s24  ;;  %p4752_p13 = por %p549_p3, %p63_p7 }
  0xbe   : > { %p4748_p12 = por %p5571_p11, %p69_p1  ;;  %p555_p0 = scmp.eq.s32.totalorder %s3235_s21, 1 }
  0xbf   : > { %s5574_s25 = scalar_select %p4752_p13, 1, 0 }
  0xc0   : > { %s5572_s22 = scalar_select %p4748_p12, 1, 0 }
  0xc1   : > { %5575 = sst [smem:[#allocation42_spill]] %s5574_s25  ;;  %p3785_p2 = scmp.lt.s32.totalorder %s4427_s30, 2 }
  0xc2   : > { %5573 = sst [smem:[#allocation41_spill]] %s5572_s22  ;;  %s4758_s19 = sand.u32 1, %s4423_s29  }
  0xc3   : > { %p4760_p5 = por %p555_p0, %p69_p1  ;;  %s4765_s12 = sshll.u32 %s4758_s19, 3 }
  0xc4   : > { %s4768_s2 = sshll.u32 %s4427_s30, 7  ;;  %p4770_p9 = pnand %p3785_p2, %p65_p10 }
  0xc5   : > { %s5576_s11 = scalar_select %p4760_p5, 1, 0 }
  0xc6   : > { %s5578_s0 = scalar_select %p4770_p9, 1, 0 }
  0xc7   : > { %5577 = sst [smem:[#allocation43_spill]] %s5576_s11  ;;  %s5517_s21 = sand.u32 1, %s4427_s30  }
  0xc8   : > { %s5579_s9 = sld [smem:[#allocation45_spill]]  ;;  %s745_s15 = scalar_lea.vmem [#allocation5], %s4765_s12 }
  0xc9   : > { %s752_s24 = sshll.u32 %s745_s15, 4  ;;  %s4786_s29 = scalar_lea.sflag [#allocation6], %s5517_s21  ;;  %s4782_s24 = int_to_ptr.vmem [resolvable:$true] %s752_s24 }
  0xca   : > { %p4792_p4 = pneg %p4770_p9 }
  0xcc   : > { %s5580_s11 = scalar_select %p4792_p4, 1, 0 }
  0xce   : > { %s4779_s13 = scalar_lea.hbm %s5579_s9, %s4768_s2  ;;  %s4074_s15 = scalar_lea.hbm %s5579_s9, 256 }
  0xcf   : > { %s4069_s6 = scalar_lea.hbm %s4779_s13, 128  ;;  %p4075_p10 = scmp.lt.u32.totalorder %s4779_s13, %s5579_s9 }
  0xd0   : > { %p4070_p7 = scmp.ne.s32.totalorder %s4779_s13, %s4069_s6  ;;  %p4076_p11 = scmp.lt.u32.totalorder %s4074_s15, %s4069_s6 }
  0xd1   : > { %p4078_p2 = scmp.lt.u32.totalorder %s4069_s6, %s4779_s13 }
  0xd2   : > { %p4072_p1 = pnand %p4792_p4, %p4070_p7  ;;  %p4077_p0 = por %p4076_p11, %p4075_p10 }
  0xd4   : > { %p4073_p3 = pneg %p4072_p1  ;;  %p4079_p5 = por %p4078_p2, %p4077_p0 }
  0xd6   : > { %p4080_p13 = pnand %p4079_p5, %p4073_p3 }
  0xd8   : > { %4083 = shalt.err (!%p4080_p13)
}
  0xd9   : > { %s4084_s21 = scalar_lea.vmem %s4782_s24, 128  ;;  %s4438_s18 = smov [#allocation5]  }
  0xda   : > { %p4085_p7 = scmp.ne.s32.totalorder %s4782_s24, %s4084_s21  ;;  %s4089_s20 = sshll.u32 %s4438_s18, 4  ;;  %s4090_s20 = int_to_ptr.vmem [resolvable:$false] %s4089_s20 }
  0xdb   : > { %s4091_s3 = scalar_lea.vmem %s4090_s20, 256  ;;  %p4092_p6 = scmp.lt.s32.totalorder %s4782_s24, %s4090_s20 }
  0xdc   : > { %p4087_p1 = pnand %p4085_p7, %p4792_p4  ;;  %p4093_p8 = scmp.lt.s32.totalorder %s4091_s3, %s4084_s21 }
  0xde   : > { %p4088_p12 = pneg %p4087_p1  ;;  %p4094_p10 = por %p4093_p8, %p4092_p6 }
  0xe0   : > { %p4095_p11 = pnand %p4094_p10, %p4088_p12 }
  0xe2   : > { %4098 = shalt.err (!%p4095_p11)
}
  0xe3   : > { %3764 = dma.hbm_to_vmem [thread:$0]  (!%p4770_p9), %s4779_s13, 128, %s4782_s24, %s4786_s29  }
  0xe4   : > { %s4439_s6 = smov [#allocation13]   ;;  %s4440_s15 = smov [#allocation16]  }
  0xe5   : > { %s597_s25 = sshll.u32 %s4439_s6, 4  ;;  %s626_s9 = sshll.u32 %s4440_s15, 4  ;;  %s598_s25 = int_to_ptr.vmem [resolvable:$true] %s597_s25  ;;  %s4816_s9 = int_to_ptr.vmem [resolvable:$true] %s626_s9 }
  0xe6   : > { %s5581_s21 = sld [smem:[#allocation50_spill]]  ;;  %p5582_p8 = scmp.ne.s32.totalorder %s5562_s5, 0 }
  0xec   : > { %s4099_s3 = scalar_lea.hbm %s5581_s21, 16 }
  0xed   : > { %p4100_p6 = scmp.ne.s32.totalorder %s5581_s21, %s4099_s3  ;;  %p4106_p5 = scmp.lt.u32.totalorder %s4099_s3, %s5581_s21 }
  0xef   : > { %p4102_p12 = pnand %p4100_p6, %p5582_p8 }
  0xf1   : > { %p4103_p13 = pneg %p4102_p12 }
  0xf3   : > { %p4108_p3 = pnand %p4106_p5, %p4103_p13 }
  0xf5   : > { %4111 = shalt.err (!%p4108_p3)
}
  0xf6   : > { %s4112_s24 = scalar_lea.vmem %s598_s25, 16  ;;  %s4119_s6 = scalar_lea.vmem %s598_s25, 32 }
  0xf7   : > { %p4113_p0 = scmp.ne.s32.totalorder %s598_s25, %s4112_s24  ;;  %p4120_p1 = scmp.lt.s32.totalorder %s598_s25, %s598_s25 }
  0xf8   : > { %p4121_p10 = scmp.lt.s32.totalorder %s4119_s6, %s4112_s24 }
  0xf9   : > { %p4115_p2 = pnand %p4113_p0, %p5582_p8 }
  0xfa   : > { %p4122_p11 = por %p4121_p10, %p4120_p1 }
  0xfb   : > { %p4116_p7 = pneg %p4115_p2 }
  0xfd   : > { %p4123_p9 = pnand %p4122_p11, %p4116_p7 }
  0xff   : > { %4126 = shalt.err (!%p4123_p9)
}
 0x100   : > { %p5583_p6 = scmp.ne.s32.totalorder %s5560_s26, 0  ;;  %s5584_s10 = sld [smem:[#allocation54_spill]] }
 0x102   : > { %3736 = dma.hbm_to_vmem [thread:$0]  (!%p5583_p6), %s5581_s21, 16, %s598_s25, [#allocation12]  }
 0x106   : > { %s4127_s18 = scalar_lea.hbm %s5584_s10, 32 }
 0x107   : > { %p4128_p12 = scmp.ne.s32.totalorder %s5584_s10, %s4127_s18  ;;  %p4134_p9 = scmp.lt.u32.totalorder %s4127_s18, %s5584_s10 }
 0x109   : > { %p4130_p13 = pnand %p4128_p12, %p5582_p8 }
 0x10b   : > { %p4131_p5 = pneg %p4130_p13 }
 0x10d   : > { %p4136_p3 = pnand %p4134_p9, %p4131_p5 }
 0x10f   : > { %4139 = shalt.err (!%p4136_p3)
}
 0x110   : > { %s4140_s25 = scalar_lea.vmem %s4816_s9, 32  ;;  %p4148_p1 = scmp.lt.s32.totalorder %s4816_s9, %s4816_s9 }
 0x111   : > { %p4141_p0 = scmp.ne.s32.totalorder %s4816_s9, %s4140_s25  ;;  %p4149_p10 = scmp.lt.s32.totalorder %s4140_s25, %s4140_s25 }
 0x113   : > { %p4143_p2 = pnand %p4141_p0, %p5582_p8  ;;  %p4150_p11 = por %p4149_p10, %p4148_p1 }
 0x115   : > { %p4144_p7 = pneg %p4143_p2 }
 0x117   : > { %p4151_p12 = pnand %p4150_p11, %p4144_p7 }
 0x119   : > { %4154 = shalt.err (!%p4151_p12)
}
 0x11a   : > { %3742 = dma.hbm_to_vmem [thread:$0]  (!%p5583_p6), %s5584_s10, 32, %s4816_s9, [#allocation15], %s5568_s27, %s5568_s27, %s5567_s4  }
 0x11b   : > { %s4441_s8 = smov [#allocation19]   ;;  %s4442_s15 = smov [#allocation22]  }
 0x11c   : > { %s658_s23 = sshll.u32 %s4441_s8, 4  ;;  %s684_s18 = sshll.u32 %s4442_s15, 4  ;;  %s659_s23 = int_to_ptr.vmem [resolvable:$true] %s658_s23  ;;  %s4862_s18 = int_to_ptr.vmem [resolvable:$true] %s684_s18 }
 0x11d   : > { %s5585_s14 = sld [smem:[#allocation58_spill]] }
 0x123   : > { %s4155_s13 = scalar_lea.hbm %s5585_s14, 32 }
 0x124   : > { %p4156_p13 = scmp.ne.s32.totalorder %s5585_s14, %s4155_s13  ;;  %p4162_p3 = scmp.lt.u32.totalorder %s4155_s13, %s5585_s14 }
 0x126   : > { %p4158_p5 = pnand %p4156_p13, %p5582_p8 }
 0x128   : > { %p4159_p9 = pneg %p4158_p5 }
 0x12a   : > { %p4164_p0 = pnand %p4162_p3, %p4159_p9 }
 0x12c   : > { %4167 = shalt.err (!%p4164_p0)
}
 0x12d   : > { %s4168_s7 = scalar_lea.vmem %s659_s23, 32  ;;  %p4176_p10 = scmp.lt.s32.totalorder %s659_s23, %s659_s23 }
 0x12e   : > { %p4169_p2 = scmp.ne.s32.totalorder %s659_s23, %s4168_s7  ;;  %p4177_p11 = scmp.lt.s32.totalorder %s4168_s7, %s4168_s7 }
 0x130   : > { %p4171_p7 = pnand %p4169_p2, %p5582_p8  ;;  %p4178_p12 = por %p4177_p11, %p4176_p10 }
 0x132   : > { %p4172_p1 = pneg %p4171_p7 }
 0x134   : > { %p4179_p4 = pnand %p4178_p12, %p4172_p1 }
 0x136   : > { %4182 = shalt.err (!%p4179_p4)
}
 0x137   : > { %3748 = dma.hbm_to_vmem [thread:$0]  (!%p5583_p6), %s5585_s14, 32, %s659_s23, [#allocation18], %s5568_s27, %s5568_s27, %s5567_s4  }
 0x138   : > { %s4183_s13 = scalar_lea.hbm %s5478_s16, 512 }
 0x139   : > { %p4184_p13 = scmp.ne.s32.totalorder %s5478_s16, %s4183_s13  ;;  %p4190_p9 = scmp.lt.u32.totalorder %s4183_s13, %s5478_s16 }
 0x13b   : > { %p4186_p4 = pnand %p4184_p13, %p5582_p8 }
 0x13d   : > { %p4187_p5 = pneg %p4186_p4 }
 0x13f   : > { %p4192_p3 = pnand %p4190_p9, %p4187_p5 }
 0x141   : > { %4195 = shalt.err (!%p4192_p3)
}
 0x142   : > { %s4196_s23 = scalar_lea.vmem %s4862_s18, 512  ;;  %p4204_p1 = scmp.lt.s32.totalorder %s4862_s18, %s4862_s18 }
 0x143   : > { %p4197_p0 = scmp.ne.s32.totalorder %s4862_s18, %s4196_s23  ;;  %p4205_p10 = scmp.lt.s32.totalorder %s4196_s23, %s4196_s23 }
 0x145   : > { %p4199_p2 = pnand %p4197_p0, %p5582_p8  ;;  %p4206_p11 = por %p4205_p10, %p4204_p1 }
 0x147   : > { %p4200_p7 = pneg %p4199_p2 }
 0x149   : > { %p4207_p12 = pnand %p4206_p11, %p4200_p7 }
 0x14b   : > { %4210 = shalt.err (!%p4207_p12)
}
 0x14c   : > { %s5586_s7 = smov 4   ;;  %s5587_s8 = smov 64  }
 0x14d   : > { %3754 = dma.hbm_to_vmem [thread:$0]  (!%p5583_p6), %s5478_s16, 512, %s4862_s18, [#allocation21], %s5587_s8, %s5587_s8, %s5586_s7  }
 0x14e   : > { %s4443_s3 = smov [#allocation23]   ;;  %s5588_s6 = sld [smem:[#allocation44_spill]] }
 0x14f   : > { %s697_s13 = sshll.u32 %s4443_s3, 4  ;;  %s4211_s14 = scalar_lea.hbm %s5479_s17, 32  ;;  %s698_s13 = int_to_ptr.vmem [resolvable:$true] %s697_s13 }
 0x150   : > { %p4212_p13 = scmp.ne.s32.totalorder %s5479_s17, %s4211_s14  ;;  %p4218_p9 = scmp.lt.u32.totalorder %s4211_s14, %s5479_s17 }
 0x152   : > { %p4214_p4 = pnand %p4212_p13, %p5582_p8 }
 0x154   : > { %s4915_s9 = scalar_lea.hbm %s5588_s6, %s4768_s2  ;;  %p4215_p5 = pneg %p4214_p4 }
 0x156   : > { %p4220_p3 = pnand %p4218_p9, %p4215_p5 }
 0x158   : > { %4223 = shalt.err (!%p4220_p3)
}
 0x159   : > { %s4224_s8 = scalar_lea.vmem %s698_s13, 32  ;;  %p4232_p1 = scmp.lt.s32.totalorder %s698_s13, %s698_s13 }
 0x15a   : > { %p4225_p0 = scmp.ne.s32.totalorder %s698_s13, %s4224_s8  ;;  %p4233_p10 = scmp.lt.s32.totalorder %s4224_s8, %s4224_s8 }
 0x15c   : > { %p4227_p2 = pnand %p4225_p0, %p5582_p8  ;;  %p4234_p11 = por %p4233_p10, %p4232_p1 }
 0x15e   : > { %p4228_p7 = pneg %p4227_p2 }
 0x160   : > { %p4235_p12 = pnand %p4234_p11, %p4228_p7 }
 0x162   : > { %4238 = shalt.err (!%p4235_p12)
}
 0x163   : > { %3757 = dma.hbm_to_vmem [thread:$0]  (!%p5583_p6), %s5479_s17, 32, %s698_s13, [#allocation24], %s5568_s27, %s5568_s27, %s5567_s4  }
 0x164   : > { %s727_s5 = scalar_lea.vmem [#allocation2], %s4765_s12  ;;  %s5589_s15 = sld [smem:[#allocation46_spill]] }
 0x165   : > { %s734_s22 = sshll.u32 %s727_s5, 4  ;;  %s724_s3 = scalar_lea.sflag [#allocation3], %s4758_s19  ;;  %s4939_s22 = int_to_ptr.vmem [resolvable:$true] %s734_s22 }
 0x166   : > { %s4239_s24 = scalar_lea.hbm %s4915_s9, 128  ;;  %p5590_p13 = scmp.ne.s32.totalorder %s5580_s11, 0 }
 0x167   : > { %p4240_p8 = scmp.ne.s32.totalorder %s4915_s9, %s4239_s24  ;;  %s4244_s18 = scalar_lea.hbm %s5588_s6, 256 }
 0x168   : > { %p4245_p6 = scmp.lt.u32.totalorder %s4915_s9, %s5588_s6  ;;  %p4246_p9 = scmp.lt.u32.totalorder %s4244_s18, %s4239_s24 }
 0x169   : > { %p4242_p4 = pnand %p4240_p8, %p5590_p13  ;;  %p4248_p0 = scmp.lt.u32.totalorder %s4239_s24, %s4915_s9 }
 0x16a   : > { %s4945_s20 = scalar_lea.hbm %s5589_s15, %s4768_s2  ;;  %p4247_p3 = por %p4246_p9, %p4245_p6 }
 0x16b   : > { %p4243_p5 = pneg %p4242_p4 }
 0x16c   : > { %p4249_p2 = por %p4248_p0, %p4247_p3 }
 0x16e   : > { %p4250_p7 = pnand %p4249_p2, %p4243_p5 }
 0x170   : > { %4253 = shalt.err (!%p4250_p7)
}
 0x171   : > { %s4254_s2 = scalar_lea.vmem %s4939_s22, 128  ;;  %s4444_s13 = smov [#allocation2]  }
 0x172   : > { %p4255_p1 = scmp.ne.s32.totalorder %s4939_s22, %s4254_s2  ;;  %s4259_s7 = sshll.u32 %s4444_s13, 4  ;;  %s4260_s7 = int_to_ptr.vmem [resolvable:$false] %s4259_s7 }
 0x173   : > { %s4261_s8 = scalar_lea.vmem %s4260_s7, 256  ;;  %p4262_p12 = scmp.lt.s32.totalorder %s4939_s22, %s4260_s7 }
 0x174   : > { %p4257_p10 = pnand %p4255_p1, %p5590_p13  ;;  %p4263_p8 = scmp.lt.s32.totalorder %s4261_s8, %s4254_s2 }
 0x176   : > { %p4258_p11 = pneg %p4257_p10  ;;  %p4264_p4 = por %p4263_p8, %p4262_p12 }
 0x178   : > { %p4265_p6 = pnand %p4264_p4, %p4258_p11 }
 0x17a   : > { %4268 = shalt.err (!%p4265_p6)
}
 0x17b   : > { %p5591_p5 = scmp.ne.s32.totalorder %s5578_s0, 0  ;;  %s763_s10 = scalar_lea.vmem [#allocation7], %s4765_s12 }
 0x17c   : > { %s770_s14 = sshll.u32 %s763_s10, 4  ;;  %s3254_s5 = sshll.u32 %s4427_s30, 4  ;;  %s771_s14 = int_to_ptr.vmem [resolvable:$true] %s770_s14 }
 0x17d   : > { %3761 = dma.hbm_to_vmem [thread:$0]  (!%p5591_p5), %s4915_s9, 128, %s4939_s22, %s724_s3  }
 0x17e   : > { %s4269_s26 = scalar_lea.hbm %s4945_s20, 128  ;;  %s4274_s25 = scalar_lea.hbm %s5589_s15, 256 }
 0x17f   : > { %p4270_p9 = scmp.ne.s32.totalorder %s4945_s20, %s4269_s26  ;;  %p4275_p2 = scmp.lt.u32.totalorder %s4945_s20, %s5589_s15 }
 0x180   : > { %p4276_p7 = scmp.lt.u32.totalorder %s4274_s25, %s4269_s26  ;;  %p4278_p10 = scmp.lt.u32.totalorder %s4269_s26, %s4945_s20 }
 0x181   : > { %p4272_p3 = pnand %p4270_p9, %p5590_p13 }
 0x182   : > { %p4277_p1 = por %p4276_p7, %p4275_p2 }
 0x183   : > { %p4273_p0 = pneg %p4272_p3 }
 0x184   : > { %p4279_p11 = por %p4278_p10, %p4277_p1 }
 0x186   : > { %p4280_p12 = pnand %p4279_p11, %p4273_p0 }
 0x188   : > { %4283 = shalt.err (!%p4280_p12)
}
 0x189   : > { %s4284_s12 = scalar_lea.vmem %s771_s14, 128  ;;  %s4445_s9 = smov [#allocation7]  }
 0x18a   : > { %p4285_p8 = scmp.ne.s32.totalorder %s771_s14, %s4284_s12  ;;  %s4289_s22 = sshll.u32 %s4445_s9, 4  ;;  %s4290_s22 = int_to_ptr.vmem [resolvable:$false] %s4289_s22 }
 0x18b   : > { %s4291_s3 = scalar_lea.vmem %s4290_s22, 256  ;;  %p4292_p9 = scmp.lt.s32.totalorder %s771_s14, %s4290_s22 }
 0x18c   : > { %p4287_p4 = pnand %p4285_p8, %p5590_p13  ;;  %p4293_p3 = scmp.lt.s32.totalorder %s4291_s3, %s4284_s12 }
 0x18e   : > { %p4288_p6 = pneg %p4287_p4  ;;  %p4294_p5 = por %p4293_p3, %p4292_p9 }
 0x190   : > { %p4295_p2 = pnand %p4294_p5, %p4288_p6 }
 0x192   : > { %4298 = shalt.err (!%p4295_p2)
}
 0x193   : > { %p5592_p7 = scmp.ne.s32.totalorder %s5578_s0, 0  ;;  %s5593_s2 = sld [smem:[#allocation47_spill]] }
 0x194   : > { %s780_s7 = scalar_lea.vmem [#allocation8], %s4758_s19  ;;  %s5594_s10 = sand.u32 1, %s4427_s30  }
 0x195   : > { %3767 = dma.hbm_to_vmem [thread:$0]  (!%p5592_p7), %s4945_s20, 128, %s771_s14, %s4786_s29  }
 0x196   : > { %s787_s8 = sshll.u32 %s780_s7, 4  ;;  %s778_s26 = scalar_lea.sflag [#allocation9], %s5594_s10  ;;  %s788_s8 = int_to_ptr.vmem [resolvable:$true] %s787_s8 }
 0x199   : > { %s4992_s13 = scalar_lea.hbm %s5593_s2, %s3254_s5  ;;  %s4304_s14 = scalar_lea.hbm %s5593_s2, 32 }
 0x19a   : > { %s4299_s21 = scalar_lea.hbm %s4992_s13, 16  ;;  %p4305_p10 = scmp.lt.u32.totalorder %s4992_s13, %s5593_s2 }
 0x19b   : > { %p4300_p5 = scmp.ne.s32.totalorder %s4992_s13, %s4299_s21  ;;  %p4306_p11 = scmp.lt.u32.totalorder %s4304_s14, %s4299_s21 }
 0x19c   : > { %p4308_p8 = scmp.lt.u32.totalorder %s4299_s21, %s4992_s13 }
 0x19d   : > { %p4302_p0 = pnand %p4300_p5, %p5590_p13  ;;  %p4307_p12 = por %p4306_p11, %p4305_p10 }
 0x19f   : > { %p4303_p1 = pneg %p4302_p0  ;;  %p4309_p4 = por %p4308_p8, %p4307_p12 }
 0x1a1   : > { %p4310_p6 = pnand %p4309_p4, %p4303_p1 }
 0x1a3   : > { %4313 = shalt.err (!%p4310_p6)
}
 0x1a4   : > { %s4314_s19 = scalar_lea.vmem %s788_s8, 16  ;;  %s4446_s25 = smov [#allocation8]  }
 0x1a5   : > { %p4315_p9 = scmp.ne.s32.totalorder %s788_s8, %s4314_s19  ;;  %s4319_s23 = sshll.u32 %s4446_s25, 4  ;;  %s4320_s23 = int_to_ptr.vmem [resolvable:$false] %s4319_s23 }
 0x1a6   : > { %s4321_s18 = scalar_lea.vmem %s4320_s23, 32  ;;  %p4322_p5 = scmp.lt.s32.totalorder %s788_s8, %s4320_s23 }
 0x1a7   : > { %p4317_p3 = pnand %p4315_p9, %p5590_p13  ;;  %p4323_p0 = scmp.lt.s32.totalorder %s4321_s18, %s4314_s19 }
 0x1a9   : > { %p4318_p2 = pneg %p4317_p3  ;;  %p4324_p7 = por %p4323_p0, %p4322_p5 }
 0x1ab   : > { %p4325_p10 = pnand %p4324_p7, %p4318_p2 }
 0x1ad   : > { %4328 = shalt.err (!%p4325_p10)
}
 0x1ae   : > { %p5595_p11 = scmp.ne.s32.totalorder %s5578_s0, 0  ;;  %p5596_p1 = scmp.ne.s32.totalorder %s5559_s1, 0 }
 0x1af   : > { %s5597_s11 = sld [smem:[#allocation41_spill]] (!%p5596_p1)  ;;  %s5017_s12 = sand.u32 (!%p5596_p1), 1, %s4419_s28  }
 0x1b0   : > { %3770 = dma.hbm_to_vmem [thread:$0]  (!%p5595_p11), %s4992_s13, 16, %s788_s8, %s778_s26  }
 0x1b1   : > { %796 = sbr.rel (%p5596_p1) target bundleno = 9210 (0x23fa), region = 108  ;;  %s5020_s9 = sshll.u32 (!%p5596_p1), %s5017_s12, 3 }
 0x1b2   : > { %s799_s22 = scalar_lea.sflag (!%p5596_p1), [#allocation3], %s5017_s12  ;;  %s802_s3 = scalar_lea.vmem (!%p5596_p1), [#allocation2], %s5020_s9 }
 0x1b5   : > { %p5598_p13 = scmp.ne.s32.totalorder (!%p5596_p1), %s5597_s11, 0 }
 0x1b8   : > { %4374 = dma.done.wait (%p5598_p13), %s799_s22, 128  }
 0x1b9   : > { %4376 = vsyncadd (%p5598_p13), %s799_s22, 4294967168  ;;  %s5599_s0 = sld [smem:[#allocation38_spill]]  ;;  %s811_s27 = scalar_lea.vmem [#allocation5], %s5020_s9 }
 0x1bf   : > { %s807_s1 = sand.u32 1, %s5599_s0  }
 0x1c0   : > { %s808_s4 = scalar_lea.sflag [#allocation6], %s807_s1 }
 0x1c1   : > { %4378 = dma.done.wait (%p5598_p13), %s808_s4, 256  }
 0x1c2   : > { %4380 = vsyncadd (%p5598_p13), %s808_s4, 4294967040  ;;  %s820_s13 = scalar_lea.vmem [#allocation7], %s5020_s9  ;;  %s826_s7 = scalar_lea.sflag [#allocation9], %s807_s1 }
 0x1c3   : > { %s828_s8 = scalar_lea.vmem [#allocation8], %s5017_s12 }
 0x1c4   : > { %4382 = dma.done.wait (%p5598_p13), %s826_s7, 16  }
 0x1c5   : > { %4384 = vsyncadd (%p5598_p13), %s826_s7, 4294967280  ;;  %p5600_p7 = scmp.eq.s32.totalorder %s5599_s0, 0 }
 0x1c7   : > { %4386 = dma.done.wait (%p5600_p7), [#allocation9], 128   ;;  %p5601_p12 = pmov %p5600_p7 }
 0x1c8   : > { %p5602_p8 = pmov %p5600_p7 }
 0x1c9   : > { %4388 = vsyncadd (%p5601_p12), [#allocation9], 4294967168 }
 0x1ca   : > { %4390 = dma.done.wait (%p5602_p8), [#allocation12], 32   ;;  %p5603_p4 = pmov %p5600_p7 }
 0x1cc   : > { %4392 = vsyncadd (%p5603_p4), [#allocation12], 4294967264  ;;  %p5604_p6 = pmov %p5603_p4 }
 0x1cd   : > { %p5605_p9 = pmov %p5603_p4 }
 0x1ce   : > { %4394 = dma.done.wait (%p5604_p6), [#allocation15], 64  }
 0x1cf   : > { %4396 = vsyncadd (%p5605_p9), [#allocation15], 4294967232  ;;  %p5606_p3 = pmov %p5603_p4 }
 0x1d1   : > { %4398 = dma.done.wait (%p5606_p3), [#allocation18], 544   ;;  %p5607_p2 = pmov %p5606_p3 }
 0x1d3   : > { %4400 = vsyncadd (%p5607_p2), [#allocation18], 4294966752  ;;  %p5608_p5 = pmov %p5607_p2 }
 0x1d4   : > { %p5609_p0 = pmov %p5607_p2 }
 0x1d5   : > { %4402 = dma.done.wait (%p5608_p5), [#allocation21], 544  }
 0x1d6   : > { %4404 = vsyncadd (%p5609_p0), [#allocation21], 4294966752  ;;  %p5610_p10 = pmov %p5609_p0 }
 0x1d7   : > { %p5611_p11 = pmov %p5609_p0 }
 0x1d8   : > { %4406 = dma.done.wait (%p5610_p10), [#allocation24], 32  }
 0x1d9   : > { %4408 = vsyncadd (%p5611_p11), [#allocation24], 4294967264  ;;  %v944_v0 = vld [vmem:[%s802_s3] sm:$0xff]  ;;  %v945_v1 = vld [vmem:[#allocation10] sm:$0xff]  ;;  %vm949_vm0 = vcmask 261120   ;;  %s5612_s21 = sld [smem:[#allocation51_spill]] }
 0x1da   : > { %v946_v2 = vadd.f32 %v945_v1, %v944_v0  ;;  %v4447_v10 = vmov 0.0   ;;  %vm4448_vm1 = vmmov 0   ;;  %v3270_v16 = vld [vmem:[#allocation11] ss:$0 sm:$0xff]  ;;  %v3271_v18 = vld [vmem:[#allocation13] ss:$0 sm:$0xff] }
 0x1db   : > { %3461 = vmatprep.subr.bf16.mxu1 %v4447_v10  ;;  %3475 = vmatprep.subr.bf16.mxu0 %v4447_v10  ;;  %s4449_s14 = smov 96   ;;  %s4450_s5 = smov 112   ;;  %vm1058_vm2 = vcmask 130048   ;;  %v980_v34 = vld [vmem:[%s820_s13] sm:$0xff]  ;;  %vm1105_vm3 = vcmask 64512   ;;  %vm1123_vm4 = vcmask 1043456  }
 0x1dc   : > { %v950_v3 = vsel %vm949_vm0, %v946_v2, 0.0  ;;  %3465 = vmatprep.mubr.msk.bf16.mxu1 %vm4448_vm1, %v4447_v10  ;;  %3477 = vmatprep.mubr.msk.bf16.mxu0 %vm4448_vm1, %v4447_v10  ;;  %s4451_s24 = smov 80   ;;  %v3272_v35 = vadd.f32 -1.0, %v980_v34  ;;  %s4452_s19 = smov 48   ;;  %v978_v34 = vld [vmem:[%s811_s27] sm:$0xff]  ;;  %vm1916_vm5 = vcmask 523264  }
 0x1dd   : > { %951 = vadd.xlane.f32.xlu0 %v950_v3  ;;  %s4453_s25 = smov 64   ;;  %s5613_s11 = sld [smem:[#allocation52_spill]] }
 0x1de   : > { %v5102_v36 = vmul.f32 1e+09, %v3272_v35  ;;  %s4454_s1 = smov 16   ;;  %s5614_s7 = sld [smem:[#allocation56_spill]]  ;;  %v5147_v35 = vpack.c.bf16 %v978_v34, %v978_v34 }
 0x1df   : > { %v3851_v9 = vld [vmem:[%s5612_s21] sm:$0xff]   ;;  %v3852_v11 = vld [vmem:[%s5612_s21 + $0x8] sm:$0xff]   ;;  %s5615_s23 = sld [smem:[#allocation55_spill]]  ;;  %s5616_s3 = sld [smem:[#allocation60_spill]] }
 0x1e0   : > { %3462 = vmatpush3.bf16.msra.mxu1 %v3851_v9  ;;  %s5619_s18 = sld [smem:[#allocation62_spill]]  ;;  %s5623_s22 = sld [smem:[#allocation64_spill]] }
 0x1e1   : > { %3463 = vmatprep.subr.bf16.mxu1 %v4447_v10 }
 0x1e4   : > { %3464 = vmatpush3.bf16.msra.mxu1 %v3852_v11 }
 0x1e5   : > { %3469 = vmatprep.subr.bf16.mxu1 %v4447_v10  ;;  %s5617_s4 = smov %s5616_s3 }
 0x26a   : > { %v952_v4 = vpop.xlane.xlu0 %951 }
 0x26b   : > { %v954_v5 = vmul.f32 0.03125, %v952_v4 }
 0x26d   : > { %v955_v6 = vsub.f32 %v946_v2, %v954_v5 }
 0x26f   : > { %v956_v7 = vmul.f32 %v955_v6, %v955_v6 }
 0x271   : > { %v957_v8 = vsel %vm949_vm0, %v956_v7, 0.0  ;;  %v3853_v7 = vld [vmem:[%s5613_s11] sm:$0xff]  }
 0x272   : > { %958 = vadd.xlane.f32.xlu0 %v957_v8  ;;  %v3854_v8 = vld [vmem:[%s5613_s11 + $0x8] sm:$0xff]  }
 0x2ff   : > { %v959_v12 = vpop.xlane.xlu0 %958 }
 0x300   : > { %v960_v13 = vmul.f32 0.03125, %v959_v12 }
 0x302   : > { %v961_v14 = vadd.f32 1e-06, %v960_v13 }
 0x304   : > { %3883 = vrsqrt.f32 %v961_v14 }
 0x30e   : > { %v3884_v15 = vpop.eup %3883 }
 0x30f   : > { %v963_v17 = vmul.f32 %v3884_v15, %v955_v6 }
 0x311   : > { %v970_v19 = vmul.f32 %v3270_v16, %v963_v17 }
 0x313   : > { %v5080_v20 = vadd.f32 %v3271_v18, %v970_v19 }
 0x315   : > { %v986_v21 = vpack.c.bf16 %v5080_v20, %v5080_v20 }
 0x317   : > { %3466 = vmatmul.mubr.msk.bf16.vlgmr.msra.gmra.mrb[0].mxu1 %vm949_vm0, %v986_v21 }
 0x318   : > { %3471 = vmatprep.mubr.msk.bf16.mxu1 %vm4448_vm1, %v4447_v10 }
 0x3ea   : > { %v1040_v22 = vpop.f32.mrb[0].mxu1 }
 0x3eb   : > { %v1052_v23 = vmul.f32 0.25, %v1040_v22  ;;  %v1054_v24 = vpack.c.bf16 %v1040_v22, %v1040_v22  ;;  %v3467_v25 = vpop.f32.mrb[1].mxu1 }
 0x3ec   : > { %v1043_v26 = vpop.f32.mrb[2].mxu1 }
 0x3ed   : > { %v1053_v27 = vpack.c.bf16 %v1052_v23, %v1052_v23  ;;  %1056 = vrot.lane.b32.xlu1 %v1054_v24, %s4449_s14  ;;  %v3468_v28 = vpop.f32.mrb[3].mxu1 }
 0x3ef   : > { %1168 = vrot.lane.b32.xlu0 %v1053_v27, %s4450_s5 }
 0x3f1   : > { %1170 = vrot.lane.b32.xlu1 %v1054_v24, %s4451_s24 }
 0x45f   : > { %v1057_v29 = vpop.permute.xlu1 %1056 }
 0x460   : > { %v1063_v30 = vsel %vm1058_vm2, %v1057_v29, 0 }
 0x461   : > { %3470 = vmatpush3.bf16.xpose.msra.mxu1 %v1063_v30  ;;  %v1169_v33 = vpop.permute.xlu0 %1168 }
 0x462   : > { %3481 = vmatprep.subr.bf16.mxu1 %v4447_v10 }
 0x463   : > { %v1171_v31 = vpop.permute.xlu1 %1170 }
 0x464   : > { %v1176_v32 = vsel %vm1058_vm2, %v1171_v31, 0 }
 0x468   : > { %3472 = vmatmul.mubr.msk.bf16.vlgmr.msra.gmra.mrb[4].mxu1 %vm1058_vm2, %v1053_v27 }
 0x469   : > { %3482 = vmatpush3.bf16.xpose.msra.mxu1 %v1176_v32  ;;  %3483 = vmatprep.mubr.msk.bf16.mxu1 %vm4448_vm1, %v4447_v10 }
 0x46a   : > { %3493 = vmatprep.subr.bf16.mxu1 %v4447_v10 }
 0x470   : > { %3484 = vmatmul.mubr.msk.bf16.vlgmr.msra.gmra.mrb[8].mxu1 %vm1058_vm2, %v1169_v33  ;;  %v3855_v33 = vld [vmem:[%s5614_s7] sm:$0xff]  }
 0x471   : > { %3497 = vmatprep.mubr.msk.bf16.mxu1 %vm4448_vm1, %v4447_v10  ;;  %3494 = vmatpush3.bf16.msra.mxu1 %v3853_v7 }
 0x472   : > { %3495 = vmatprep.subr.bf16.mxu1 %v4447_v10 }
 0x475   : > { %3496 = vmatpush3.bf16.msra.mxu1 %v3854_v8 }
 0x476   : > { %3509 = vmatprep.subr.bf16.mxu1 %v4447_v10 }
 0x53b   : > { %v1099_v37 = vpop.f32.mrb[4].mxu1 }
 0x53c   : > { %v1100_v38 = vadd.f32 %v1099_v37, %v5102_v36  ;;  %v3473_v39 = vpop.f32.mrb[5].mxu1  ;;  %v3857_v37 = vld [vmem:[%s5615_s23] sm:$0xff]  }
 0x53d   : > { %v1102_v40 = vpop.f32.mrb[6].mxu1 }
 0x53e   : > { %v3474_v41 = vpop.f32.mrb[7].mxu1  ;;  %v1106_v42 = vsel %vm1105_vm3, %v1100_v38, -inf }
 0x53f   : > { %1107 = vmax.xlane.f32.xlu1 %v1106_v42 }
 0x543   : > { %v1212_v43 = vpop.f32.mrb[8].mxu1 }
 0x544   : > { %v1213_v44 = vadd.f32 %v1212_v43, %v5102_v36  ;;  %v3485_v45 = vpop.f32.mrb[9].mxu1  ;;  %v3284_v43 = vld [vmem:[#allocation14] ss:$0 sm:$0xff] }
 0x545   : > { %v1215_v46 = vpop.f32.mrb[10].mxu1  ;;  %v3285_v45 = vld [vmem:[#allocation16] ss:$0 sm:$0xff] }
 0x546   : > { %v3486_v47 = vpop.f32.mrb[11].mxu1  ;;  %v1218_v48 = vsel %vm1105_vm3, %v1213_v44, -inf }
 0x547   : > { %1219 = vmax.xlane.f32.xlu0 %v1218_v48 }
 0x55d   : > { %1230 = vrot.lane.b32.xlu0 %v1054_v24, %s4452_s19 }
 0x5cc   : > { %v1108_v49 = vpop.xlane.xlu1 %1107 }
 0x5cd   : > { %v1109_v50 = vsub.f32 %v1100_v38, %v1108_v49  ;;  %v3858_v38 = vld [vmem:[%s5615_s23 + $0x8] sm:$0xff]  }
 0x5cf   : > { %v1110_v51 = vmul.f32 1.442695, %v1109_v50 }
 0x5d1   : > { %3885 = vpow2.f32 %v1110_v51 }
 0x5d4   : > { %v1220_v52 = vpop.xlane.xlu0 %1219 }
 0x5d5   : > { %v1221_v53 = vsub.f32 %v1213_v44, %v1220_v52 }
 0x5d7   : > { %v1222_v54 = vmul.f32 1.442695, %v1221_v53 }
 0x5d8   : > { %v1231_v1 = vpop.permute.xlu0 %1230 }
 0x5d9   : > { %3887 = vpow2.f32 %v1222_v54  ;;  %v1236_v3 = vsel %vm1123_vm4, %v1231_v1, 0  ;;  %v983_v1 = vld [vmem:[%s828_s8] sm:$0x1]  ;;  %s5618_s8 = sld [smem:[#allocation61_spill]] }
 0x5db   : > { %v3886_v55 = vpop.eup %3885 }
 0x5dc   : > { %v1112_v56 = vsel %vm1105_vm3, %v3886_v55, 0.0 }
 0x5dd   : > { %1113 = vadd.xlane.f32.xlu1 %v1112_v56 }
 0x5e3   : > { %v3888_v57 = vpop.eup %3887 }
 0x5e4   : > { %v1224_v58 = vsel %vm1105_vm3, %v3888_v57, 0.0 }
 0x5e5   : > { %1225 = vadd.xlane.f32.xlu1 %v1224_v58 }
 0x5f6   : > { %1118 = vrot.lane.b32.xlu1 %v1054_v24, %s4453_s25 }
 0x66a   : > { %v1114_v59 = vpop.xlane.xlu1 %1113 }
 0x66b   : > { %3889 = vrcp.f32 %v1114_v59 }
 0x672   : > { %v1226_v60 = vpop.xlane.xlu1 %1225 }
 0x673   : > { %3891 = vrcp.f32 %v1226_v60 }
 0x675   : > { %v3890_v61 = vpop.eup %3889 }
 0x676   : > { %v1119_v62 = vpop.permute.xlu1 %1118  ;;  %v1116_v63 = vmul.f32 %v3890_v61, %v3886_v55 }
 0x677   : > { %v1125_v0 = vsel %vm1123_vm4, %v1119_v62, 0 }
 0x678   : > { %3476 = vmatpush3.bf16.msra.mxu0 %v1125_v0  ;;  %v1117_v2 = vpack.c.bf16 %v1116_v63, %v1116_v63  ;;  %v1495_v0 = vlaneseq }
 0x679   : > { %3487 = vmatprep.subr.bf16.mxu0 %v4447_v10 }
 0x67b   : > { %3478 = vmatmul.mubr.msk.bf16.vlgmr.msra.gmra.mrb[0].mxu0 %vm1105_vm3, %v1117_v2  ;;  %v3273_v2 = vadd.f32 -1.0, %v983_v1 }
 0x67c   : > { %3488 = vmatpush3.bf16.msra.mxu0 %v1236_v3  ;;  %3489 = vmatprep.mubr.msk.bf16.mxu0 %vm4448_vm1, %v4447_v10  ;;  %v1496_v3 = vshrl.u32 %v1495_v0, 7 }
 0x67d   : > { %v3892_v4 = vpop.eup %3891  ;;  %3501 = vmatprep.subr.bf16.mxu0 %v4447_v10 }
 0x67e   : > { %v1228_v5 = vmul.f32 %v3892_v4, %v3888_v57  ;;  %v985_v4 = vmul.f32 1e+09, %v3273_v2 }
 0x680   : > { %v1229_v6 = vpack.c.bf16 %v1228_v5, %v1228_v5  ;;  %v1497_v5 = vsub.s32 0, %v1496_v3 }
 0x683   : > { %3490 = vmatmul.mubr.msk.bf16.vlgmr.msra.gmra.mrb[4].mxu0 %vm1105_vm3, %v1229_v6  ;;  %v5187_v6 = vrot.slane %v985_v4, %v1497_v5  ;;  %v3861_v5 = vld [vmem:[#allocation22] sm:$0xff]  }
 0x684   : > { %3505 = vmatprep.mubr.msk.bf16.mxu0 %vm4448_vm1, %v4447_v10  ;;  %3502 = vmatpush3.bf16.msra.mxu0 %v3857_v37 }
 0x685   : > { %3503 = vmatprep.subr.bf16.mxu0 %v4447_v10 }
 0x688   : > { %3504 = vmatpush3.bf16.msra.mxu0 %v3858_v38 }
 0x689   : > { %3517 = vmatprep.subr.bf16.mxu0 %v4447_v10 }
 0x74e   : > { %v1161_v9 = vpop.f32.mrb[0].mxu0 }
 0x74f   : > { %v3479_v11 = vpop.f32.mrb[1].mxu0 }
 0x750   : > { %v1164_v12 = vpop.f32.mrb[2].mxu0 }
 0x751   : > { %v3480_v13 = vpop.f32.mrb[3].mxu0 }
 0x756   : > { %v1272_v14 = vpop.f32.mrb[4].mxu0 }
 0x757   : > { %1279 = vrot.lane.b32.xlu1 %v1272_v14, %s4454_s1  ;;  %v3491_v15 = vpop.f32.mrb[5].mxu0 }
 0x758   : > { %v1275_v16 = vpop.f32.mrb[6].mxu0 }
 0x759   : > { %v3492_v17 = vpop.f32.mrb[7].mxu0 }
 0x7c9   : > { %v1280_v18 = vpop.permute.xlu1 %1279 }
 0x7ca   : > { %v1282_v19 = vsel %vm1058_vm2, %v1161_v9, %v1280_v18 }
 0x7cb   : > { %v1283_v21 = vpack.c.bf16 %v1282_v19, %v1282_v19 }
 0x7cd   : > { %3498 = vmatmul.mubr.msk.bf16.vlgmr.msra.gmra.mrb[12].mxu1 %vm949_vm0, %v1283_v21 }
 0x7ce   : > { %3513 = vmatprep.mubr.msk.bf16.mxu1 %vm4448_vm1, %v4447_v10  ;;  %3510 = vmatpush3.bf16.msra.mxu1 %v3855_v33 }
 0x7cf   : > { %3511 = vmatprep.subr.bf16.mxu1 %v4447_v10 }
 0x8a0   : > { %v1333_v22 = vpop.f32.mrb[12].mxu1 }
 0x8a1   : > { %v1334_v23 = vadd.f32 %v1333_v22, %v5080_v20  ;;  %v3499_v24 = vpop.f32.mrb[13].mxu1  ;;  %v3856_v20 = vld [vmem:[%s5614_s7 + $0x8] sm:$0xff]  }
 0x8a2   : > { %v1336_v25 = vpop.f32.mrb[14].mxu1  ;;  %3512 = vmatpush3.bf16.msra.mxu1 %v3856_v20 }
 0x8a3   : > { %v3500_v26 = vpop.f32.mrb[15].mxu1  ;;  %v1339_v27 = vsel %vm949_vm0, %v1334_v23, 0.0  ;;  %3523 = vmatprep.subr.bf16.mxu1 %v4447_v10 }
 0x8a4   : > { %1340 = vadd.xlane.f32.xlu1 %v1339_v27 }
 0x8a5   : > { %3514 = vmatmul.mubr.msk.bf16.vlgmr.msra.gmra.mrb[16].mxu1 %vm949_vm0, %v5147_v35 }
 0x8a6   : > { %3525 = vmatprep.mubr.msk.bf16.mxu1 %vm4448_vm1, %v4447_v10 }
 0x931   : > { %v1341_v28 = vpop.xlane.xlu1 %1340 }
 0x932   : > { %v1342_v29 = vmul.f32 0.03125, %v1341_v28 }
 0x934   : > { %v1343_v30 = vsub.f32 %v1334_v23, %v1342_v29 }
 0x936   : > { %v1344_v31 = vmul.f32 %v1343_v30, %v1343_v30 }
 0x938   : > { %v1345_v32 = vsel %vm949_vm0, %v1344_v31, 0.0 }
 0x939   : > { %1346 = vadd.xlane.f32.xlu0 %v1345_v32 }
 0x978   : > { %v1479_v49 = vpop.f32.mrb[16].mxu1 }
 0x979   : > { %v5169_v50 = vpack.c.bf16 %v1479_v49, %v1479_v49  ;;  %v3515_v51 = vpop.f32.mrb[17].mxu1 }
 0x97a   : > { %v1482_v52 = vpop.f32.mrb[18].mxu1 }
 0x97b   : > { %v3516_v53 = vpop.f32.mrb[19].mxu1  ;;  %1610 = vrot.lane.b32.xlu1 %v5169_v50, %s4450_s5  ;;  %v1504_v54 = vsel %vm1058_vm2, %v5169_v50, 0 }
 0x9c6   : > { %v1347_v39 = vpop.xlane.xlu0 %1346 }
 0x9c7   : > { %v1348_v40 = vmul.f32 0.03125, %v1347_v39 }
 0x9c9   : > { %v1349_v41 = vadd.f32 1e-06, %v1348_v40 }
 0x9cb   : > { %3893 = vrsqrt.f32 %v1349_v41 }
 0x9d5   : > { %v3894_v42 = vpop.eup %3893 }
 0x9d6   : > { %v1351_v44 = vmul.f32 %v3894_v42, %v1343_v30 }
 0x9d8   : > { %v1358_v46 = vmul.f32 %v3284_v43, %v1351_v44  ;;  %v3859_v44 = vld [vmem:[#allocation17] sm:$0xff]  }
 0x9da   : > { %v5162_v47 = vadd.f32 %v3285_v45, %v1358_v46 }
 0x9dc   : > { %v1366_v48 = vpack.c.bf16 %v5162_v47, %v5162_v47 }
 0x9de   : > { %3506 = vmatmul.mubr.msk.bf16.vlgmr.msra.gmra.mrb[8].mxu0 %vm949_vm0, %v1366_v48 }
 0x9df   : > { %3519 = vmatprep.mubr.msk.bf16.mxu0 %vm4448_vm1, %v4447_v10  ;;  %3518 = vmatpush3.bf16.xpose.msra.mxu0 %v1504_v54 }
 0x9e0   : > { %3529 = vmatprep.subr.bf16.mxu0 %v4447_v10 }
 0x9ed   : > { %v1611_v56 = vpop.permute.xlu1 %1610 }
 0x9ee   : > { %v1616_v62 = vsel %vm1058_vm2, %v1611_v56, 0 }
 0xab1   : > { %v1420_v55 = vpop.f32.mrb[8].mxu0 }
 0xab2   : > { %v1491_v57 = vmul.f32 0.25, %v1420_v55  ;;  %v3507_v58 = vpop.f32.mrb[9].mxu0 }
 0xab3   : > { %v1423_v59 = vpop.f32.mrb[10].mxu0 }
 0xab4   : > { %v1492_v60 = vpack.c.bf16 %v1491_v57, %v1491_v57  ;;  %v3508_v61 = vpop.f32.mrb[11].mxu0 }
 0xab6   : > { %1608 = vrot.lane.b32.xlu0 %v1492_v60, %s4450_s5  ;;  %3520 = vmatmul.mubr.msk.bf16.vlgmr.msra.gmra.mrb[12].mxu0 %vm1058_vm2, %v1492_v60 }
 0xab7   : > { %3530 = vmatpush3.bf16.xpose.msra.mxu0 %v1616_v62  ;;  %3531 = vmatprep.mubr.msk.bf16.mxu0 %vm4448_vm1, %v4447_v10 }
 0xab8   : > { %3541 = vmatprep.subr.bf16.mxu0 %v4447_v10 }
 0xb28   : > { %v1609_v63 = vpop.permute.xlu0 %1608 }
 0xb29   : > { %3532 = vmatmul.mubr.msk.bf16.vlgmr.msra.gmra.mrb[16].mxu0 %vm1058_vm2, %v1609_v63 }
 0xb2a   : > { %3545 = vmatprep.mubr.msk.bf16.mxu0 %vm4448_vm1, %v4447_v10  ;;  %3542 = vmatpush3.bf16.msra.mxu0 %v3859_v44 }
 0xb2b   : > { %3543 = vmatprep.subr.bf16.mxu0 %v4447_v10 }
 0xb89   : > { %v1540_v7 = vpop.f32.mrb[12].mxu0 }
 0xb8a   : > { %v1541_v8 = vadd.f32 %v1540_v7, %v5187_v6  ;;  %v3521_v9 = vpop.f32.mrb[13].mxu0  ;;  %v3862_v7 = vld [vmem:[#allocation22 + $0x8] sm:$0xff]  }
 0xb8b   : > { %v1543_v11 = vpop.f32.mrb[14].mxu0 }
 0xb8c   : > { %v3522_v12 = vpop.f32.mrb[15].mxu0  ;;  %v1546_v13 = vsel %vm1105_vm3, %v1541_v8, -inf }
 0xb8d   : > { %1547 = vmax.xlane.f32.xlu1 %v1546_v13 }
 0xbfc   : > { %v1652_v14 = vpop.f32.mrb[16].mxu0 }
 0xbfd   : > { %v1653_v15 = vadd.f32 %v1652_v14, %v5187_v6  ;;  %v3533_v16 = vpop.f32.mrb[17].mxu0  ;;  %v3299_v14 = vld [vmem:[#allocation19] ss:$0 sm:$0xff] }
 0xbfe   : > { %v1655_v17 = vpop.f32.mrb[18].mxu0  ;;  %v3300_v16 = vld [vmem:[#allocation20] ss:$0 sm:$0xff] }
 0xbff   : > { %v3534_v18 = vpop.f32.mrb[19].mxu0  ;;  %v1658_v19 = vsel %vm1105_vm3, %v1653_v15, -inf }
 0xc00   : > { %1659 = vmax.xlane.f32.xlu0 %v1658_v19 }
 0xc16   : > { %1559 = vrot.lane.b32.xlu0 %v5169_v50, %s4449_s14 }
 0xc1a   : > { %v1548_v21 = vpop.xlane.xlu1 %1547 }
 0xc1b   : > { %v1549_v22 = vsub.f32 %v1541_v8, %v1548_v21  ;;  %v3864_v8 = vld [vmem:[%s5617_s4 + $0x8] sm:$0xff]   ;;  %v3865_v21 = vld [vmem:[%s5617_s4 + $0x10] sm:$0xff]  }
 0xc1d   : > { %v1550_v23 = vmul.f32 1.442695, %v1549_v22  ;;  %v3866_v22 = vld [vmem:[%s5617_s4 + $0x18] sm:$0xff]  }
 0xc1f   : > { %3895 = vpow2.f32 %v1550_v23  ;;  %v3301_v23 = vld [vmem:[#allocation23] ss:$0 sm:$0xff] }
 0xc29   : > { %v3896_v24 = vpop.eup %3895 }
 0xc2a   : > { %v1552_v25 = vsel %vm1105_vm3, %v3896_v24, 0.0 }
 0xc2b   : > { %1553 = vadd.xlane.f32.xlu1 %v1552_v25 }
 0xc8d   : > { %v1660_v26 = vpop.xlane.xlu0 %1659 }
 0xc8e   : > { %v1661_v27 = vsub.f32 %v1653_v15, %v1660_v26 }
 0xc90   : > { %v1662_v28 = vmul.f32 1.442695, %v1661_v27 }
 0xc91   : > { %v1560_v29 = vpop.permute.xlu0 %1559 }
 0xc92   : > { %3897 = vpow2.f32 %v1662_v28  ;;  %v1565_v30 = vsel %vm1123_vm4, %v1560_v29, 0 }
 0xc93   : > { %3524 = vmatpush3.bf16.msra.mxu1 %v1565_v30 }
 0xc94   : > { %3535 = vmatprep.subr.bf16.mxu1 %v4447_v10 }
 0xc9c   : > { %v3898_v31 = vpop.eup %3897 }
 0xc9d   : > { %v1664_v32 = vsel %vm1105_vm3, %v3898_v31, 0.0 }
 0xc9e   : > { %1665 = vadd.xlane.f32.xlu1 %v1664_v32 }
 0xcaf   : > { %1670 = vrot.lane.b32.xlu1 %v5169_v50, %s4451_s24  ;;  %v3860_v50 = vld [vmem:[#allocation17 + $0x8] sm:$0xff]  }
 0xcb0   : > { %3544 = vmatpush3.bf16.msra.mxu0 %v3860_v50 }
 0xcb1   : > { %3557 = vmatprep.subr.bf16.mxu0 %v4447_v10 }
 0xcb8   : > { %v1554_v33 = vpop.xlane.xlu1 %1553 }
 0xcb9   : > { %3899 = vrcp.f32 %v1554_v33 }
 0xcc3   : > { %v3900_v20 = vpop.eup %3899 }
 0xcc4   : > { %v1556_v34 = vmul.f32 %v3900_v20, %v3896_v24 }
 0xcc6   : > { %v1557_v37 = vpack.c.bf16 %v1556_v34, %v1556_v34 }
 0xcc8   : > { %3526 = vmatmul.mubr.msk.bf16.vlgmr.msra.gmra.mrb[20].mxu1 %vm1105_vm3, %v1557_v37 }
 0xcc9   : > { %3537 = vmatprep.mubr.msk.bf16.mxu1 %vm4448_vm1, %v4447_v10 }
 0xd2b   : > { %v1666_v38 = vpop.xlane.xlu1 %1665 }
 0xd2c   : > { %3901 = vrcp.f32 %v1666_v38 }
 0xd2f   : > { %v1671_v39 = vpop.permute.xlu1 %1670 }
 0xd30   : > { %v1676_v40 = vsel %vm1123_vm4, %v1671_v39, 0 }
 0xd31   : > { %3536 = vmatpush3.bf16.msra.mxu1 %v1676_v40 }
 0xd32   : > { %3549 = vmatprep.subr.bf16.mxu1 %v4447_v10 }
 0xd36   : > { %v3902_v41 = vpop.eup %3901 }
 0xd37   : > { %v1668_v42 = vmul.f32 %v3902_v41, %v3898_v31  ;;  %v3305_v31 = vld [vmem:[%s5618_s8] ss:$0 sm:$0xff] }
 0xd39   : > { %v1669_v43 = vpack.c.bf16 %v1668_v42, %v1668_v42 }
 0xd3b   : > { %3538 = vmatmul.mubr.msk.bf16.vlgmr.msra.gmra.mrb[24].mxu1 %vm1105_vm3, %v1669_v43 }
 0xd3c   : > { %3553 = vmatprep.mubr.msk.bf16.mxu1 %vm4448_vm1, %v4447_v10  ;;  %3550 = vmatpush3.bf16.msra.mxu1 %v3861_v5 }
 0xd3d   : > { %3551 = vmatprep.subr.bf16.mxu1 %v4447_v10 }
 0xd40   : > { %3552 = vmatpush3.bf16.msra.mxu1 %v3862_v7 }
 0xd41   : > { %3569 = vmatprep.subr.bf16.mxu1 %v4447_v10 }
 0xd9b   : > { %v1601_v45 = vpop.f32.mrb[20].mxu1 }
 0xd9c   : > { %v3527_v46 = vpop.f32.mrb[21].mxu1 }
 0xd9d   : > { %v1604_v48 = vpop.f32.mrb[22].mxu1  ;;  %v3868_v46 = vld [vmem:[%s5612_s21 + $0x18] sm:$0xff]  }
 0xd9e   : > { %v3528_v49 = vpop.f32.mrb[23].mxu1 }
 0xe0e   : > { %v1712_v51 = vpop.f32.mrb[24].mxu1 }
 0xe0f   : > { %1719 = vrot.lane.b32.xlu1 %v1712_v51, %s4454_s1  ;;  %v3539_v52 = vpop.f32.mrb[25].mxu1 }
 0xe10   : > { %v1715_v53 = vpop.f32.mrb[26].mxu1  ;;  %v3311_v52 = vld [vmem:[%s5619_s18] ss:$0 sm:$0xff] }
 0xe11   : > { %v3540_v54 = vpop.f32.mrb[27].mxu1 }
 0xe81   : > { %v1720_v55 = vpop.permute.xlu1 %1719 }
 0xe82   : > { %v1722_v56 = vsel %vm1058_vm2, %v1601_v45, %v1720_v55  ;;  %v3867_v45 = vld [vmem:[%s5612_s21 + $0x10] sm:$0xff]  }
 0xe83   : > { %v1723_v57 = vpack.c.bf16 %v1722_v56, %v1722_v56 }
 0xe85   : > { %3546 = vmatmul.mubr.msk.bf16.vlgmr.msra.gmra.mrb[20].mxu0 %vm949_vm0, %v1723_v57 }
 0xe86   : > { %3565 = vmatprep.mubr.msk.bf16.mxu0 %vm4448_vm1, %v4447_v10 }
 0xf58   : > { %v1773_v58 = vpop.f32.mrb[20].mxu0 }
 0xf59   : > { %v1774_v59 = vadd.f32 %v1773_v58, %v5162_v47  ;;  %v3547_v60 = vpop.f32.mrb[21].mxu0  ;;  %v3863_v47 = vld [vmem:[%s5616_s3] sm:$0xff]   ;;  %s5620_s3 = sld [smem:[#allocation63_spill]] }
 0xf5a   : > { %v1776_v61 = vpop.f32.mrb[22].mxu0  ;;  %3558 = vmatpush3.bf16.msra.mxu0 %v3863_v47 }
 0xf5b   : > { %v3548_v62 = vpop.f32.mrb[23].mxu0  ;;  %v1779_v63 = vsel %vm949_vm0, %v1774_v59, 0.0  ;;  %3559 = vmatprep.subr.bf16.mxu0 %v4447_v10 }
 0xf5c   : > { %1780 = vadd.xlane.f32.xlu0 %v1779_v63 }
 0xf5e   : > { %3560 = vmatpush3.bf16.msra.mxu0 %v3864_v8 }
 0xf5f   : > { %3561 = vmatprep.subr.bf16.mxu0 %v4447_v10  ;;  %s5621_s13 = smov %s5620_s3  ;;  %v3312_v54 = vld [vmem:[%s5620_s3] ss:$0 sm:$0xff]  ;;  %s2994_s3 = scalar_lea.sflag [#allocation4], %s5017_s12 }
 0xf62   : > { %3562 = vmatpush3.bf16.msra.mxu0 %v3865_v21 }
 0xf63   : > { %3563 = vmatprep.subr.bf16.mxu0 %v4447_v10 }
 0xf66   : > { %3564 = vmatpush3.bf16.msra.mxu0 %v3866_v22 }
 0xf67   : > { %3583 = vmatprep.subr.bf16.mxu0 %v4447_v10 }
 0xfe9   : > { %v1781_v0 = vpop.xlane.xlu0 %1780 }
 0xfea   : > { %v1782_v1 = vmul.f32 0.03125, %v1781_v0 }
 0xfec   : > { %v1783_v2 = vsub.f32 %v1774_v59, %v1782_v1 }
 0xfee   : > { %v1784_v3 = vmul.f32 %v1783_v2, %v1783_v2 }
 0xff0   : > { %v1785_v4 = vsel %vm949_vm0, %v1784_v3, 0.0 }
 0xff1   : > { %1786 = vadd.xlane.f32.xlu1 %v1785_v4 }
0x107e   : > { %v1787_v9 = vpop.xlane.xlu1 %1786 }
0x107f   : > { %v1788_v11 = vmul.f32 0.03125, %v1787_v9 }
0x1081   : > { %v1789_v12 = vadd.f32 1e-06, %v1788_v11 }
0x1083   : > { %3903 = vrsqrt.f32 %v1789_v12 }
0x108d   : > { %v3904_v13 = vpop.eup %3903 }
0x108e   : > { %v1791_v15 = vmul.f32 %v3904_v13, %v1783_v2 }
0x1090   : > { %v1798_v17 = vmul.f32 %v3299_v14, %v1791_v15 }
0x1092   : > { %v1805_v18 = vadd.f32 %v3300_v16, %v1798_v17 }
0x1094   : > { %v1822_v19 = vpack.c.bf16 %v1805_v18, %v1805_v18 }
0x1096   : > { %3554 = vmatmul.mubr.msk.bf16.vlgmr.msra.gmra.mrb[28].mxu1 %vm949_vm0, %v1822_v19 }
0x1097   : > { %3573 = vmatprep.mubr.msk.bf16.mxu1 %vm4448_vm1, %v4447_v10  ;;  %3570 = vmatpush3.bf16.msra.mxu1 %v3867_v45 }
0x1098   : > { %3571 = vmatprep.subr.bf16.mxu1 %v4447_v10 }
0x109b   : > { %3572 = vmatpush3.bf16.msra.mxu1 %v3868_v46 }
0x109c   : > { %3577 = vmatprep.subr.bf16.mxu1 %v4447_v10 }
0x1169   : > { %v1878_v24 = vpop.f32.mrb[28].mxu1 }
0x116a   : > { %v1879_v25 = vadd.f32 %v3301_v23, %v1878_v24  ;;  %v3555_v26 = vpop.f32.mrb[29].mxu1 }
0x116b   : > { %v1881_v27 = vpop.f32.mrb[30].mxu1 }
0x116c   : > { %v1884_v28 = vmax.f32 %v1879_v25, 0.0  ;;  %v3556_v29 = vpop.f32.mrb[31].mxu1 }
0x116e   : > { %v1885_v30 = vpack.c.bf16 %v1884_v28, %v1884_v28 }
0x1170   : > { %3566 = vmatmul.mubr.msk.bf16.vlgmr.msra.gmra.mrb[24].mxu0 %vm1916_vm5, %v1885_v30 }
0x1171   : > { %3585 = vmatprep.mubr.msk.bf16.mxu0 %vm4448_vm1, %v4447_v10 }
0x1243   : > { %v1954_v32 = vpop.f32.mrb[24].mxu0 }
0x1244   : > { %v1955_v33 = vadd.f32 %v3305_v31, %v1954_v32  ;;  %v3567_v20 = vpop.f32.mrb[25].mxu0 }
0x1245   : > { %v1957_v34 = vpop.f32.mrb[26].mxu0 }
0x1246   : > { %v3568_v37 = vpop.f32.mrb[27].mxu0  ;;  %v1960_v38 = vadd.f32 %v1955_v33, %v1805_v18 }
0x1248   : > { %v1961_v39 = vsel %vm949_vm0, %v1960_v38, 0.0 }
0x1249   : > { %1962 = vadd.xlane.f32.xlu0 %v1961_v39 }
0x12d6   : > { %v1963_v40 = vpop.xlane.xlu0 %1962 }
0x12d7   : > { %v1964_v41 = vmul.f32 0.03125, %v1963_v40 }
0x12d9   : > { %v1965_v42 = vsub.f32 %v1960_v38, %v1964_v41 }
0x12db   : > { %v1966_v43 = vmul.f32 %v1965_v42, %v1965_v42 }
0x12dd   : > { %v1967_v44 = vsel %vm949_vm0, %v1966_v43, 0.0  ;;  %v3870_v43 = vld [vmem:[%s5613_s11 + $0x18] sm:$0xff]  }
0x12de   : > { %1968 = vadd.xlane.f32.xlu0 %v1967_v44 }
0x136b   : > { %v1969_v48 = vpop.xlane.xlu0 %1968 }
0x136c   : > { %v1970_v49 = vmul.f32 0.03125, %v1969_v48 }
0x136e   : > { %v1971_v50 = vadd.f32 1e-06, %v1970_v49 }
0x1370   : > { %3905 = vrsqrt.f32 %v1971_v50 }
0x137a   : > { %v3906_v51 = vpop.eup %3905 }
0x137b   : > { %v1973_v53 = vmul.f32 %v3906_v51, %v1965_v42  ;;  %v3869_v42 = vld [vmem:[%s5613_s11 + $0x10] sm:$0xff]  }
0x137d   : > { %v1980_v55 = vmul.f32 %v3311_v52, %v1973_v53 }
0x137f   : > { %v5262_v56 = vadd.f32 %v3312_v54, %v1980_v55 }
0x1381   : > { %v1988_v57 = vpack.c.bf16 %v5262_v56, %v5262_v56 }
0x1383   : > { %3574 = vmatmul.mubr.msk.bf16.vlgmr.msra.gmra.mrb[32].mxu1 %vm949_vm0, %v1988_v57 }
0x1384   : > { %3579 = vmatprep.mubr.msk.bf16.mxu1 %vm4448_vm1, %v4447_v10 }
0x1456   : > { %v2043_v58 = vpop.f32.mrb[32].mxu1 }
0x1457   : > { %v2058_v59 = vmul.f32 0.25, %v2043_v58  ;;  %v2060_v60 = vpack.c.bf16 %v2043_v58, %v2043_v58  ;;  %v3575_v61 = vpop.f32.mrb[33].mxu1 }
0x1458   : > { %v2046_v62 = vpop.f32.mrb[34].mxu1 }
0x1459   : > { %2173 = vrot.lane.b32.xlu0 %v2060_v60, %s4451_s24  ;;  %2062 = vrot.lane.b32.xlu1 %v2060_v60, %s4449_s14  ;;  %v3576_v63 = vpop.f32.mrb[35].mxu1  ;;  %v2059_v0 = vpack.c.bf16 %v2058_v59, %v2058_v59 }
0x145d   : > { %2171 = vrot.lane.b32.xlu1 %v2059_v0, %s4450_s5 }
0x14cb   : > { %v2063_v1 = vpop.permute.xlu1 %2062  ;;  %v2174_v3 = vpop.permute.xlu0 %2173 }
0x14cc   : > { %v2068_v2 = vsel %vm1058_vm2, %v2063_v1, 0  ;;  %v2179_v4 = vsel %vm1058_vm2, %v2174_v3, 0 }
0x14cd   : > { %3578 = vmatpush3.bf16.xpose.msra.mxu1 %v2068_v2 }
0x14ce   : > { %3589 = vmatprep.subr.bf16.mxu1 %v4447_v10 }
0x14cf   : > { %v2172_v5 = vpop.permute.xlu1 %2171 }
0x14d4   : > { %3580 = vmatmul.mubr.msk.bf16.vlgmr.msra.gmra.mrb[36].mxu1 %vm1058_vm2, %v2059_v0 }
0x14d5   : > { %3590 = vmatpush3.bf16.xpose.msra.mxu1 %v2179_v4  ;;  %3591 = vmatprep.mubr.msk.bf16.mxu1 %vm4448_vm1, %v4447_v10  ;;  %v3871_v4 = vld [vmem:[%s5614_s7 + $0x10] sm:$0xff]  }
0x14d6   : > { %3601 = vmatprep.subr.bf16.mxu1 %v4447_v10 }
0x14dc   : > { %3592 = vmatmul.mubr.msk.bf16.vlgmr.msra.gmra.mrb[40].mxu1 %vm1058_vm2, %v2172_v5  ;;  %v3873_v5 = vld [vmem:[%s5615_s23 + $0x10] sm:$0xff]  }
0x14dd   : > { %3605 = vmatprep.mubr.msk.bf16.mxu1 %vm4448_vm1, %v4447_v10  ;;  %3602 = vmatpush3.bf16.msra.mxu1 %v3869_v42 }
0x14de   : > { %3603 = vmatprep.subr.bf16.mxu1 %v4447_v10 }
0x14e1   : > { %3604 = vmatpush3.bf16.msra.mxu1 %v3870_v43 }
0x14e2   : > { %3617 = vmatprep.subr.bf16.mxu1 %v4447_v10 }
0x15a7   : > { %v2104_v7 = vpop.f32.mrb[36].mxu1 }
0x15a8   : > { %v2105_v47 = vadd.f32 %v2104_v7, %v5102_v36  ;;  %v3581_v8 = vpop.f32.mrb[37].mxu1  ;;  %v3874_v7 = vld [vmem:[%s5615_s23 + $0x18] sm:$0xff]  }
0x15a9   : > { %v2107_v9 = vpop.f32.mrb[38].mxu1 }
0x15aa   : > { %v3582_v11 = vpop.f32.mrb[39].mxu1  ;;  %v2110_v12 = vsel %vm1105_vm3, %v2105_v47, -inf }
0x15ab   : > { %2111 = vmax.xlane.f32.xlu1 %v2110_v12  ;;  %v3331_v11 = vld [vmem:[#allocation14 + $0x1] ss:$0 sm:$0xff] }
0x15af   : > { %v2215_v13 = vpop.f32.mrb[40].mxu1 }
0x15b0   : > { %v2216_v14 = vadd.f32 %v2215_v13, %v5102_v36  ;;  %v3593_v15 = vpop.f32.mrb[41].mxu1  ;;  %v3332_v13 = vld [vmem:[#allocation16 + $0x1] ss:$0 sm:$0xff] }
0x15b1   : > { %v2218_v16 = vpop.f32.mrb[42].mxu1 }
0x15b2   : > { %v3594_v17 = vpop.f32.mrb[43].mxu1  ;;  %v2221_v18 = vsel %vm1105_vm3, %v2216_v14, -inf }
0x15b3   : > { %2222 = vmax.xlane.f32.xlu0 %v2221_v18 }
0x1638   : > { %v2112_v19 = vpop.xlane.xlu1 %2111 }
0x1639   : > { %v2113_v21 = vsub.f32 %v2105_v47, %v2112_v19 }
0x163b   : > { %v2114_v22 = vmul.f32 1.442695, %v2113_v21 }
0x163d   : > { %3907 = vpow2.f32 %v2114_v22 }
0x1640   : > { %v2223_v23 = vpop.xlane.xlu0 %2222 }
0x1641   : > { %v2224_v24 = vsub.f32 %v2216_v14, %v2223_v23 }
0x1643   : > { %v2225_v25 = vmul.f32 1.442695, %v2224_v24 }
0x1645   : > { %3909 = vpow2.f32 %v2225_v25 }
0x1647   : > { %v3908_v26 = vpop.eup %3907 }
0x1648   : > { %v2116_v27 = vsel %vm1105_vm3, %v3908_v26, 0.0 }
0x1649   : > { %2117 = vadd.xlane.f32.xlu0 %v2116_v27 }
0x164f   : > { %v3910_v28 = vpop.eup %3909 }
0x1650   : > { %v2227_v36 = vsel %vm1105_vm3, %v3910_v28, 0.0 }
0x1651   : > { %2228 = vadd.xlane.f32.xlu1 %v2227_v36 }
0x165f   : > { %2122 = vrot.lane.b32.xlu0 %v2060_v60, %s4453_s25 }
0x1662   : > { %2233 = vrot.lane.b32.xlu1 %v2060_v60, %s4452_s19  ;;  %s5622_s19 = sld [smem:[#allocation42_spill]] }
0x1668   : > { %p5624_p13 = scmp.ne.s32.totalorder %s5622_s19, 0 }
0x16d6   : > { %v2118_v29 = vpop.xlane.xlu0 %2117 }
0x16d7   : > { %3911 = vrcp.f32 %v2118_v29 }
0x16da   : > { %v2123_v30 = vpop.permute.xlu0 %2122 }
0x16db   : > { %v2128_v31 = vsel %vm1123_vm4, %v2123_v30, 0 }
0x16dc   : > { %3584 = vmatpush3.bf16.msra.mxu0 %v2128_v31 }
0x16dd   : > { %3595 = vmatprep.subr.bf16.mxu0 %v4447_v10 }
0x16de   : > { %v2229_v32 = vpop.xlane.xlu1 %2228 }
0x16df   : > { %3913 = vrcp.f32 %v2229_v32 }
0x16e1   : > { %v3912_v33 = vpop.eup %3911 }
0x16e2   : > { %v2120_v20 = vmul.f32 %v3912_v33, %v3908_v26  ;;  %v2234_v34 = vpop.permute.xlu1 %2233 }
0x16e3   : > { %v2239_v38 = vsel %vm1123_vm4, %v2234_v34, 0 }
0x16e4   : > { %v2121_v37 = vpack.c.bf16 %v2120_v20, %v2120_v20 }
0x16e6   : > { %3586 = vmatmul.mubr.msk.bf16.vlgmr.msra.gmra.mrb[28].mxu0 %vm1105_vm3, %v2121_v37 }
0x16e7   : > { %3596 = vmatpush3.bf16.msra.mxu0 %v2239_v38  ;;  %3597 = vmatprep.mubr.msk.bf16.mxu0 %vm4448_vm1, %v4447_v10 }
0x16e8   : > { %3609 = vmatprep.subr.bf16.mxu0 %v4447_v10 }
0x16e9   : > { %v3914_v39 = vpop.eup %3913 }
0x16ea   : > { %v2231_v40 = vmul.f32 %v3914_v39, %v3910_v28 }
0x16ec   : > { %v2232_v41 = vpack.c.bf16 %v2231_v40, %v2231_v40 }
0x16ee   : > { %3598 = vmatmul.mubr.msk.bf16.vlgmr.msra.gmra.mrb[32].mxu0 %vm1105_vm3, %v2232_v41 }
0x16ef   : > { %3613 = vmatprep.mubr.msk.bf16.mxu0 %vm4448_vm1, %v4447_v10  ;;  %3610 = vmatpush3.bf16.msra.mxu0 %v3873_v5 }
0x16f0   : > { %3611 = vmatprep.subr.bf16.mxu0 %v4447_v10 }
0x16f3   : > { %3612 = vmatpush3.bf16.msra.mxu0 %v3874_v7 }
0x16f4   : > { %3625 = vmatprep.subr.bf16.mxu0 %v4447_v10 }
0x17b9   : > { %v2164_v44 = vpop.f32.mrb[28].mxu0 }
0x17ba   : > { %v3587_v45 = vpop.f32.mrb[29].mxu0 }
0x17bb   : > { %v2167_v46 = vpop.f32.mrb[30].mxu0 }
0x17bc   : > { %v3588_v48 = vpop.f32.mrb[31].mxu0 }
0x17c1   : > { %v2275_v49 = vpop.f32.mrb[32].mxu0 }
0x17c2   : > { %2282 = vrot.lane.b32.xlu1 %v2275_v49, %s4454_s1  ;;  %v3599_v50 = vpop.f32.mrb[33].mxu0 }
0x17c3   : > { %v2278_v51 = vpop.f32.mrb[34].mxu0 }
0x17c4   : > { %v3600_v52 = vpop.f32.mrb[35].mxu0 }
0x1834   : > { %v2283_v53 = vpop.permute.xlu1 %2282 }
0x1835   : > { %v2285_v54 = vsel %vm1058_vm2, %v2164_v44, %v2283_v53 }
0x1836   : > { %v2286_v55 = vpack.c.bf16 %v2285_v54, %v2285_v54 }
0x1838   : > { %3606 = vmatmul.mubr.msk.bf16.vlgmr.msra.gmra.mrb[44].mxu1 %vm949_vm0, %v2286_v55 }
0x1839   : > { %3621 = vmatprep.mubr.msk.bf16.mxu1 %vm4448_vm1, %v4447_v10  ;;  %3618 = vmatpush3.bf16.msra.mxu1 %v3871_v4  ;;  %v3875_v4 = vld [vmem:[#allocation17 + $0x10] sm:$0xff]  }
0x183a   : > { %3619 = vmatprep.subr.bf16.mxu1 %v4447_v10 }
0x190b   : > { %v2336_v57 = vpop.f32.mrb[44].mxu1 }
0x190c   : > { %v2337_v58 = vadd.f32 %v2336_v57, %v5262_v56  ;;  %v3607_v59 = vpop.f32.mrb[45].mxu1  ;;  %v3872_v56 = vld [vmem:[%s5614_s7 + $0x18] sm:$0xff]  }
0x190d   : > { %v2339_v60 = vpop.f32.mrb[46].mxu1  ;;  %3620 = vmatpush3.bf16.msra.mxu1 %v3872_v56 }
0x190e   : > { %v3608_v61 = vpop.f32.mrb[47].mxu1  ;;  %v2342_v62 = vsel %vm949_vm0, %v2337_v58, 0.0  ;;  %3631 = vmatprep.subr.bf16.mxu1 %v4447_v10 }
0x190f   : > { %2343 = vadd.xlane.f32.xlu0 %v2342_v62 }
0x1910   : > { %3622 = vmatmul.mubr.msk.bf16.vlgmr.msra.gmra.mrb[48].mxu1 %vm949_vm0, %v5147_v35 }
0x1911   : > { %3633 = vmatprep.mubr.msk.bf16.mxu1 %vm4448_vm1, %v4447_v10 }
0x199c   : > { %v2344_v63 = vpop.xlane.xlu0 %2343 }
0x199d   : > { %v2345_v0 = vmul.f32 0.03125, %v2344_v63 }
0x199f   : > { %v2346_v1 = vsub.f32 %v2337_v58, %v2345_v0 }
0x19a1   : > { %v2347_v2 = vmul.f32 %v2346_v1, %v2346_v1 }
0x19a3   : > { %v2348_v3 = vsel %vm949_vm0, %v2347_v2, 0.0 }
0x19a4   : > { %2349 = vadd.xlane.f32.xlu1 %v2348_v3 }
0x19e3   : > { %v2481_v17 = vpop.f32.mrb[48].mxu1 }
0x19e4   : > { %v2498_v18 = vpack.c.bf16 %v2481_v17, %v2481_v17  ;;  %v3623_v19 = vpop.f32.mrb[49].mxu1 }
0x19e5   : > { %v2484_v21 = vpop.f32.mrb[50].mxu1 }
0x19e6   : > { %v3624_v22 = vpop.f32.mrb[51].mxu1  ;;  %2609 = vrot.lane.b32.xlu0 %v2498_v18, %s4450_s5  ;;  %v2503_v23 = vsel %vm1058_vm2, %v2498_v18, 0 }
0x1a31   : > { %v2350_v47 = vpop.xlane.xlu1 %2349 }
0x1a32   : > { %v2351_v8 = vmul.f32 0.03125, %v2350_v47 }
0x1a34   : > { %v2352_v35 = vadd.f32 1e-06, %v2351_v8  ;;  %v3876_v8 = vld [vmem:[#allocation17 + $0x18] sm:$0xff]  }
0x1a36   : > { %3915 = vrsqrt.f32 %v2352_v35 }
0x1a40   : > { %v3916_v9 = vpop.eup %3915 }
0x1a41   : > { %v2354_v12 = vmul.f32 %v3916_v9, %v2346_v1 }
0x1a43   : > { %v2361_v14 = vmul.f32 %v3331_v11, %v2354_v12 }
0x1a45   : > { %v5336_v15 = vadd.f32 %v3332_v13, %v2361_v14 }
0x1a47   : > { %v2369_v16 = vpack.c.bf16 %v5336_v15, %v5336_v15 }
0x1a49   : > { %3614 = vmatmul.mubr.msk.bf16.vlgmr.msra.gmra.mrb[36].mxu0 %vm949_vm0, %v2369_v16 }
0x1a4a   : > { %3627 = vmatprep.mubr.msk.bf16.mxu0 %vm4448_vm1, %v4447_v10  ;;  %3626 = vmatpush3.bf16.xpose.msra.mxu0 %v2503_v23 }
0x1a4b   : > { %3637 = vmatprep.subr.bf16.mxu0 %v4447_v10 }
0x1a58   : > { %v2610_v25 = vpop.permute.xlu0 %2609 }
0x1a59   : > { %v2615_v30 = vsel %vm1058_vm2, %v2610_v25, 0 }
0x1b1c   : > { %v2424_v24 = vpop.f32.mrb[36].mxu0 }
0x1b1d   : > { %v2496_v26 = vmul.f32 0.25, %v2424_v24  ;;  %v3615_v27 = vpop.f32.mrb[37].mxu0 }
0x1b1e   : > { %v2427_v28 = vpop.f32.mrb[38].mxu0 }
0x1b1f   : > { %v2497_v36 = vpack.c.bf16 %v2496_v26, %v2496_v26  ;;  %v3616_v29 = vpop.f32.mrb[39].mxu0 }
0x1b20   : > { %v3878_v29 = vld [vmem:[#allocation22 + $0x18] sm:$0xff]  }
0x1b21   : > { %2607 = vrot.lane.b32.xlu1 %v2497_v36, %s4450_s5  ;;  %3628 = vmatmul.mubr.msk.bf16.vlgmr.msra.gmra.mrb[40].mxu0 %vm1058_vm2, %v2497_v36  ;;  %v3877_v36 = vld [vmem:[#allocation22 + $0x10] sm:$0xff]  }
0x1b22   : > { %3638 = vmatpush3.bf16.xpose.msra.mxu0 %v2615_v30  ;;  %3639 = vmatprep.mubr.msk.bf16.mxu0 %vm4448_vm1, %v4447_v10  ;;  %v3880_v30 = vld [vmem:[%s5617_s4 + $0x28] sm:$0xff]  }
0x1b23   : > { %3649 = vmatprep.subr.bf16.mxu0 %v4447_v10 }
0x1b93   : > { %v2608_v31 = vpop.permute.xlu1 %2607 }
0x1b94   : > { %3640 = vmatmul.mubr.msk.bf16.vlgmr.msra.gmra.mrb[44].mxu0 %vm1058_vm2, %v2608_v31 }
0x1b95   : > { %3653 = vmatprep.mubr.msk.bf16.mxu0 %vm4448_vm1, %v4447_v10  ;;  %3650 = vmatpush3.bf16.msra.mxu0 %v3875_v4 }
0x1b96   : > { %3651 = vmatprep.subr.bf16.mxu0 %v4447_v10 }
0x1b99   : > { %3652 = vmatpush3.bf16.msra.mxu0 %v3876_v8 }
0x1b9a   : > { %3665 = vmatprep.subr.bf16.mxu0 %v4447_v10 }
0x1bf4   : > { %v2539_v32 = vpop.f32.mrb[40].mxu0 }
0x1bf5   : > { %v2540_v33 = vadd.f32 %v2539_v32, %v5187_v6  ;;  %v3629_v20 = vpop.f32.mrb[41].mxu0 }
0x1bf6   : > { %v2542_v34 = vpop.f32.mrb[42].mxu0 }
0x1bf7   : > { %v3630_v37 = vpop.f32.mrb[43].mxu0  ;;  %v2545_v38 = vsel %vm1105_vm3, %v2540_v33, -inf  ;;  %v3354_v34 = vld [vmem:[#allocation19 + $0x1] ss:$0 sm:$0xff] }
0x1bf8   : > { %2546 = vmax.xlane.f32.xlu0 %v2545_v38  ;;  %v3355_v38 = vld [vmem:[#allocation20 + $0x1] ss:$0 sm:$0xff] }
0x1c67   : > { %v2651_v39 = vpop.f32.mrb[44].mxu0 }
0x1c68   : > { %v2652_v40 = vadd.f32 %v2651_v39, %v5187_v6  ;;  %v3641_v41 = vpop.f32.mrb[45].mxu0 }
0x1c69   : > { %v2654_v42 = vpop.f32.mrb[46].mxu0 }
0x1c6a   : > { %v3642_v43 = vpop.f32.mrb[47].mxu0  ;;  %v2657_v44 = vsel %vm1105_vm3, %v2652_v40, -inf  ;;  %v3881_v42 = vld [vmem:[%s5617_s4 + $0x30] sm:$0xff]  }
0x1c6b   : > { %2658 = vmax.xlane.f32.xlu1 %v2657_v44  ;;  %v3882_v43 = vld [vmem:[%s5617_s4 + $0x38] sm:$0xff]   ;;  %v3367_v44 = vld [vmem:[#allocation23 + $0x1] ss:$0 sm:$0xff] }
0x1c7c   : > { %2558 = vrot.lane.b32.xlu1 %v2498_v18, %s4449_s14 }
0x1c85   : > { %v2547_v45 = vpop.xlane.xlu0 %2546 }
0x1c86   : > { %v2548_v46 = vsub.f32 %v2540_v33, %v2547_v45 }
0x1c88   : > { %v2549_v48 = vmul.f32 1.442695, %v2548_v46 }
0x1c8a   : > { %3917 = vpow2.f32 %v2549_v48 }
0x1c94   : > { %v3918_v49 = vpop.eup %3917 }
0x1c95   : > { %v2551_v50 = vsel %vm1105_vm3, %v3918_v49, 0.0 }
0x1c96   : > { %2552 = vadd.xlane.f32.xlu0 %v2551_v50 }
0x1cf8   : > { %v2659_v51 = vpop.xlane.xlu1 %2658 }
0x1cf9   : > { %v2660_v52 = vsub.f32 %v2652_v40, %v2659_v51 }
0x1cfb   : > { %v2661_v53 = vmul.f32 1.442695, %v2660_v52 }
0x1cfc   : > { %v2559_v6 = vpop.permute.xlu1 %2558 }
0x1cfd   : > { %3919 = vpow2.f32 %v2661_v53  ;;  %v2564_v54 = vsel %vm1123_vm4, %v2559_v6, 0  ;;  %v3371_v53 = vld [vmem:[%s5618_s8 + $0x1] ss:$0 sm:$0xff] }
0x1cfe   : > { %3632 = vmatpush3.bf16.msra.mxu1 %v2564_v54 }
0x1cff   : > { %3643 = vmatprep.subr.bf16.mxu1 %v4447_v10 }
0x1d07   : > { %v3920_v55 = vpop.eup %3919 }
0x1d08   : > { %v2663_v57 = vsel %vm1105_vm3, %v3920_v55, 0.0 }
0x1d09   : > { %2664 = vadd.xlane.f32.xlu0 %v2663_v57 }
0x1d1f   : > { %2669 = vrot.lane.b32.xlu0 %v2498_v18, %s4451_s24  ;;  %s3380_s24 = sshll.u32 %s5599_s0, 7 }
0x1d20   : > { %s5417_s27 = scalar_lea.hbm %s5623_s22, %s3380_s24 }
0x1d23   : > { %v2553_v58 = vpop.xlane.xlu0 %2552 }
0x1d24   : > { %3921 = vrcp.f32 %v2553_v58 }
0x1d2e   : > { %v3922_v59 = vpop.eup %3921 }
0x1d2f   : > { %v2555_v60 = vmul.f32 %v3922_v59, %v3918_v49 }
0x1d31   : > { %v2556_v61 = vpack.c.bf16 %v2555_v60, %v2555_v60 }
0x1d33   : > { %3634 = vmatmul.mubr.msk.bf16.vlgmr.msra.gmra.mrb[52].mxu1 %vm1105_vm3, %v2556_v61 }
0x1d34   : > { %3645 = vmatprep.mubr.msk.bf16.mxu1 %vm4448_vm1, %v4447_v10 }
0x1d96   : > { %v2665_v62 = vpop.xlane.xlu0 %2664 }
0x1d97   : > { %3923 = vrcp.f32 %v2665_v62 }
0x1d9a   : > { %v2670_v63 = vpop.permute.xlu0 %2669 }
0x1d9b   : > { %v2675_v0 = vsel %vm1123_vm4, %v2670_v63, 0 }
0x1d9c   : > { %3644 = vmatpush3.bf16.msra.mxu1 %v2675_v0 }
0x1d9d   : > { %3657 = vmatprep.subr.bf16.mxu1 %v4447_v10 }
0x1da1   : > { %v3924_v1 = vpop.eup %3923 }
0x1da2   : > { %v2667_v2 = vmul.f32 %v3924_v1, %v3920_v55 }
0x1da4   : > { %v2668_v3 = vpack.c.bf16 %v2667_v2, %v2667_v2 }
0x1da6   : > { %3646 = vmatmul.mubr.msk.bf16.vlgmr.msra.gmra.mrb[56].mxu1 %vm1105_vm3, %v2668_v3 }
0x1da7   : > { %3661 = vmatprep.mubr.msk.bf16.mxu1 %vm4448_vm1, %v4447_v10  ;;  %3658 = vmatpush3.bf16.msra.mxu1 %v3877_v36 }
0x1da8   : > { %3659 = vmatprep.subr.bf16.mxu1 %v4447_v10 }
0x1dab   : > { %3660 = vmatpush3.bf16.msra.mxu1 %v3878_v29 }
0x1e06   : > { %v2600_v56 = vpop.f32.mrb[52].mxu1 }
0x1e07   : > { %v3635_v5 = vpop.f32.mrb[53].mxu1 }
0x1e08   : > { %v2603_v7 = vpop.f32.mrb[54].mxu1 }
0x1e09   : > { %v3636_v47 = vpop.f32.mrb[55].mxu1  ;;  %v3378_v7 = vld [vmem:[%s5621_s13 + $0x1] ss:$0 sm:$0xff] }
0x1e79   : > { %v2711_v35 = vpop.f32.mrb[56].mxu1 }
0x1e7a   : > { %2718 = vrot.lane.b32.xlu1 %v2711_v35, %s4454_s1  ;;  %v3647_v9 = vpop.f32.mrb[57].mxu1  ;;  %s942_s1 = scalar_lea.vmem [#allocation25], %s5020_s9  ;;  %s4455_s9 = smov [#allocation25]  }
0x1e7b   : > { %v2714_v11 = vpop.f32.mrb[58].mxu1  ;;  %s3007_s26 = sshll.u32 %s942_s1, 4  ;;  %s4333_s0 = sshll.u32 %s4455_s9, 4  ;;  %s5419_s26 = int_to_ptr.vmem [resolvable:$true] %s3007_s26  ;;  %s4334_s0 = int_to_ptr.vmem [resolvable:$false] %s4333_s0 }
0x1e7c   : > { %v3648_v12 = vpop.f32.mrb[59].mxu1  ;;  %s4329_s25 = scalar_lea.vmem %s5419_s26, 128  ;;  %s4335_s10 = scalar_lea.vmem %s4334_s0, 256 }
0x1e7d   : > { %p4330_p1 = scmp.ne.s32.totalorder %s5419_s26, %s4329_s25  ;;  %p4336_p8 = scmp.lt.s32.totalorder %s5419_s26, %s4334_s0 }
0x1e7e   : > { %p4337_p4 = scmp.lt.s32.totalorder %s4335_s10, %s4329_s25 }
0x1e7f   : > { %p4331_p7 = pnand %p4330_p1, %p5624_p13 }
0x1e80   : > { %p4338_p6 = por %p4337_p4, %p4336_p8 }
0x1e81   : > { %p4332_p12 = pneg %p4331_p7 }
0x1e83   : > { %p4339_p9 = pnand %p4338_p6, %p4332_p12 }
0x1eec   : > { %v2719_v13 = vpop.permute.xlu1 %2718 }
0x1eed   : > { %v2721_v14 = vsel %vm1058_vm2, %v2600_v56, %v2719_v13  ;;  %v3377_v56 = vld [vmem:[%s5619_s18 + $0x1] ss:$0 sm:$0xff] }
0x1eee   : > { %v2722_v16 = vpack.c.bf16 %v2721_v14, %v2721_v14 }
0x1ef0   : > { %3654 = vmatmul.mubr.msk.bf16.vlgmr.msra.gmra.mrb[48].mxu0 %vm949_vm0, %v2722_v16 }
0x1ef1   : > { %3673 = vmatprep.mubr.msk.bf16.mxu0 %vm4448_vm1, %v4447_v10 }
0x1fc3   : > { %v2772_v17 = vpop.f32.mrb[48].mxu0 }
0x1fc4   : > { %v2773_v18 = vadd.f32 %v2772_v17, %v5336_v15  ;;  %v3655_v19 = vpop.f32.mrb[49].mxu0  ;;  %v3879_v15 = vld [vmem:[%s5617_s4 + $0x20] sm:$0xff]  }
0x1fc5   : > { %v2775_v21 = vpop.f32.mrb[50].mxu0  ;;  %3666 = vmatpush3.bf16.msra.mxu0 %v3879_v15 }
0x1fc6   : > { %v3656_v22 = vpop.f32.mrb[51].mxu0  ;;  %v2778_v23 = vsel %vm949_vm0, %v2773_v18, 0.0  ;;  %3667 = vmatprep.subr.bf16.mxu0 %v4447_v10 }
0x1fc7   : > { %2779 = vadd.xlane.f32.xlu1 %v2778_v23 }
0x1fc9   : > { %3668 = vmatpush3.bf16.msra.mxu0 %v3880_v30 }
0x1fca   : > { %3669 = vmatprep.subr.bf16.mxu0 %v4447_v10 }
0x1fcd   : > { %3670 = vmatpush3.bf16.msra.mxu0 %v3881_v42 }
0x1fce   : > { %3671 = vmatprep.subr.bf16.mxu0 %v4447_v10 }
0x1fd1   : > { %3672 = vmatpush3.bf16.msra.mxu0 %v3882_v43 }
0x2054   : > { %v2780_v24 = vpop.xlane.xlu1 %2779 }
0x2055   : > { %v2781_v25 = vmul.f32 0.03125, %v2780_v24 }
0x2057   : > { %v2782_v26 = vsub.f32 %v2773_v18, %v2781_v25 }
0x2059   : > { %v2783_v27 = vmul.f32 %v2782_v26, %v2782_v26 }
0x205b   : > { %v2784_v28 = vsel %vm949_vm0, %v2783_v27, 0.0 }
0x205c   : > { %2785 = vadd.xlane.f32.xlu0 %v2784_v28 }
0x20e9   : > { %v2786_v31 = vpop.xlane.xlu0 %2785 }
0x20ea   : > { %v2787_v32 = vmul.f32 0.03125, %v2786_v31 }
0x20ec   : > { %v2788_v33 = vadd.f32 1e-06, %v2787_v32 }
0x20ee   : > { %3925 = vrsqrt.f32 %v2788_v33 }
0x20f8   : > { %v3926_v20 = vpop.eup %3925 }
0x20f9   : > { %v2790_v37 = vmul.f32 %v3926_v20, %v2782_v26 }
0x20fb   : > { %v2797_v39 = vmul.f32 %v3354_v34, %v2790_v37 }
0x20fd   : > { %v2804_v40 = vadd.f32 %v3355_v38, %v2797_v39 }
0x20ff   : > { %v2827_v41 = vpack.c.bf16 %v2804_v40, %v2804_v40 }
0x2101   : > { %3662 = vmatmul.mubr.msk.bf16.vlgmr.msra.gmra.mrb[60].mxu1 %vm949_vm0, %v2827_v41 }
0x21d4   : > { %v2883_v45 = vpop.f32.mrb[60].mxu1 }
0x21d5   : > { %v2884_v46 = vadd.f32 %v3367_v44, %v2883_v45  ;;  %v3663_v48 = vpop.f32.mrb[61].mxu1 }
0x21d6   : > { %v2886_v49 = vpop.f32.mrb[62].mxu1 }
0x21d7   : > { %v2889_v50 = vmax.f32 %v2884_v46, 0.0  ;;  %v3664_v51 = vpop.f32.mrb[63].mxu1 }
0x21d9   : > { %v2890_v52 = vpack.c.bf16 %v2889_v50, %v2889_v50 }
0x21db   : > { %3674 = vmatmul.mubr.msk.bf16.vlgmr.msra.gmra.mrb[52].mxu0 %vm1916_vm5, %v2890_v52 }
0x22ae   : > { %v2958_v10 = vpop.f32.mrb[52].mxu0 }
0x22af   : > { %v2959_v6 = vadd.f32 %v3371_v53, %v2958_v10  ;;  %v3675_v54 = vpop.f32.mrb[53].mxu0 }
0x22b0   : > { %v2961_v55 = vpop.f32.mrb[54].mxu0 }
0x22b1   : > { %v3676_v57 = vpop.f32.mrb[55].mxu0  ;;  %v2964_v58 = vadd.f32 %v2959_v6, %v2804_v40 }
0x22b3   : > { %v2965_v59 = vsel %vm949_vm0, %v2964_v58, 0.0 }
0x22b4   : > { %2966 = vadd.xlane.f32.xlu0 %v2965_v59 }
0x2341   : > { %v2967_v60 = vpop.xlane.xlu0 %2966 }
0x2342   : > { %v2968_v61 = vmul.f32 0.03125, %v2967_v60 }
0x2344   : > { %v2969_v62 = vsub.f32 %v2964_v58, %v2968_v61 }
0x2346   : > { %v2970_v63 = vmul.f32 %v2969_v62, %v2969_v62 }
0x2348   : > { %v2971_v0 = vsel %vm949_vm0, %v2970_v63, 0.0 }
0x2349   : > { %2972 = vadd.xlane.f32.xlu1 %v2971_v0 }
0x23d6   : > { %v2973_v1 = vpop.xlane.xlu1 %2972 }
0x23d7   : > { %v2974_v2 = vmul.f32 0.03125, %v2973_v1 }
0x23d9   : > { %v2975_v3 = vadd.f32 1e-06, %v2974_v2 }
0x23db   : > { %3927 = vrsqrt.f32 %v2975_v3 }
0x23e5   : > { %v3928_v4 = vpop.eup %3927 }
0x23e6   : > { %v2977_v5 = vmul.f32 %v3928_v4, %v2969_v62 }
0x23e8   : > { %v2984_v47 = vmul.f32 %v3377_v56, %v2977_v5 }
0x23ea   : > { %v2991_v8 = vadd.f32 %v3378_v7, %v2984_v47 }
0x23ec   : > { %2992 = vst.msk [vmem:[%s942_s1] sm:$0xff] %vm949_vm0, %v2991_v8 }
0x23ed   : > { %4342 = shalt.err (!%p4339_p9)
}
0x23ee   : > { %s4343_s12 = scalar_lea.hbm %s5417_s27, 128  ;;  %s4347_s24 = scalar_lea.hbm %s5623_s22, 256 }
0x23ef   : > { %p4344_p3 = scmp.ne.s32.totalorder %s5417_s27, %s4343_s12  ;;  %p4348_p0 = scmp.lt.u32.totalorder %s5417_s27, %s5623_s22 }
0x23f0   : > { %p4349_p10 = scmp.lt.u32.totalorder %s4347_s24, %s4343_s12  ;;  %p4351_p1 = scmp.lt.u32.totalorder %s4343_s12, %s5417_s27 }
0x23f1   : > { %p4345_p2 = pnand %p4344_p3, %p5624_p13 }
0x23f2   : > { %p4350_p11 = por %p4349_p10, %p4348_p0 }
0x23f3   : > { %p4346_p5 = pneg %p4345_p2 }
0x23f4   : > { %p4352_p7 = por %p4351_p1, %p4350_p11 }
0x23f6   : > { %p4353_p12 = pnand %p4352_p7, %p4346_p5 }
0x23f8   : > { %4356 = shalt.err (!%p4353_p12)
}
0x23f9   : > { %3725 = dma.vmem_to_hbm [thread:$0]  (%p5624_p13), %s5419_s26, 128, %s5417_s27, %s2994_s3  }
0x23fa PF: > { %s5625_s20 = sld [smem:[#allocation36_spill]]  ;;  %s5626_s25 = sld [smem:[#allocation43_spill]] }
0x23fb   : > { %p5628_p4 = scmp.ge.s32.totalorder %s4427_s30, 2 }
0x2400   : > { %s3019_s9 = sand.u32 1, %s5625_s20   ;;  %p5627_p8 = scmp.ne.s32.totalorder %s5626_s25, 0 }
0x2401   : > { %s3020_s0 = scalar_lea.sflag [#allocation4], %s3019_s9 }
0x2402   : > { %p3772_p6 = pnand %p5628_p4, %p5627_p8 }
0x2404   : > { %4410 = dma.done.wait (!%p3772_p6), %s3020_s0, 128  }
0x2405   : > { %4412 = vsyncadd (!%p3772_p6), %s3020_s0, 4294967168  ;;  %s5629_s30 = sld [smem:[#allocation39_spill]]  ;;  %s5630_s10 = sld [smem:[#allocation37_spill]] }
0x2406   : > { %s5631_s29 = sld [smem:[#allocation40_spill]]  ;;  %s5632_s3 = smov %s4419_s28 }
0x240b   : > { %p46_p9 = scmp.ge.s32.totalorder %s5629_s30, 4   ;;  %s5633_s28 = smov %s5630_s10 }
0x240d   :  { %48 = sbr.rel (!%p46_p9) target bundleno = 36 (0x24), region = 245 }
0x2414   :  { %3025 = vsyncpa [#allocation3], 1 }
0x2415   :  { %3027 = vsyncpa [#allocation3 + $0x1], 1 }
0x2416   :  { %3028 = vsyncpa [#allocation6], 1 }
0x2417   :  { %3030 = vsyncpa [#allocation6 + $0x1], 1 }
0x2418   :  { %3031 = vsyncpa [#allocation9], 1 }
0x2419   :  { %3033 = vsyncpa [#allocation9 + $0x1], 1 }
0x241a   :  { %3034 = vsyncpa [#allocation12], 1 }
0x241b   :  { %3035 = vsyncpa [#allocation15], 1 }
0x241c   :  { %3036 = vsyncpa [#allocation18], 1 }
0x241d   :  { %3037 = vsyncpa [#allocation21], 1 }
0x241e   :  { %3038 = vsyncpa [#allocation24], 1 }
0x241f   :  { %3039 = vsyncpa [#allocation4], 1 }
0x2420   :  { %3041 = vsyncpa [#allocation4 + $0x1], 1 }

</bundles_post_ra>
